<compile_context>
chip_gen: v6e
topology: v6e:2x2x1
jax: 0.10.0
libtpu: 0.0.40
codegen_flags: <defaults>
</compile_context>

<pallas_src>
import math
import functools

import jax
import jax.numpy as jnp
from jax.experimental import pallas as pl
from jax.experimental.pallas import tpu as pltpu


_SQRT2_INV = 1.0 / math.sqrt(2.0)


def _erf_poly(x):
    """Abramowitz & Stegun 7.1.26 erf approximation (|err| <= 1.5e-7).

    Used inside the kernel so exact-GELU semantics never depend on a
    lax.erf lowering being available; built only from mul/add/exp/where.
    """
    a1, a2, a3, a4, a5 = (0.254829592, -0.284496736, 1.421413741,
                          -1.453152027, 1.061405429)
    p = 0.3275911
    ax = jnp.abs(x)
    t = 1.0 / (1.0 + p * ax)
    poly = ((((a5 * t + a4) * t + a3) * t + a2) * t + a1) * t
    y = 1.0 - poly * jnp.exp(-ax * ax)
    return jnp.where(x >= 0, y, -y)


def _gelu_exact(x, erf_fn):
    """Exact (erf) GELU — matches torch activation='gelu' default."""
    return 0.5 * x * (1.0 + erf_fn(x * _SQRT2_INV))


# ----------------------------------------------------------------------------
# Pallas kernel: one batch block (BT sequences, R = BT*S rows) per grid step.
# ----------------------------------------------------------------------------
def _critic_kernel(state_ref, act_ref, pe_ref,
                   ws_ref, wa_ref, bemb_ref,
                   wqkv_ref, bqkv_ref, wo_ref, bo_ref,
                   ln1g_ref, ln1b_ref, ln2g_ref, ln2b_ref,
                   w1_ref, b1_ref, w2_ref, b2_ref,
                   wqt_ref, bq_ref,
                   q_out_ref, *, nhead):
    BT = state_ref.shape[0]
    S, H = pe_ref.shape
    R = act_ref.shape[0]                      # == BT * S
    hd = H // nhead
    scale = 1.0 / math.sqrt(hd)
    eps = 1e-5
    bf16 = jnp.bfloat16
    f32 = jnp.float32

    # ---- state/action embeddings (f32: K is tiny, keeps input precision) ---
    a_emb = jnp.dot(act_ref[...], wa_ref[...],
                    preferred_element_type=f32)                     # (R, H)
    st = state_ref[...][:, 0, :]                                    # (BT, Ds)
    s_emb = jnp.dot(st, ws_ref[...],
                    preferred_element_type=f32) + bemb_ref[...]     # (BT, H)
    x3 = a_emb.reshape(BT, S, H) + s_emb[:, None, :] + pe_ref[...][None]
    x = x3.reshape(R, H)                                            # (R, H) f32

    # ---- QKV projection (bf16 MXU operands, f32 accumulation) --------------
    qkv = jnp.dot(x.astype(bf16), wqkv_ref[...],
                  preferred_element_type=f32) + bqkv_ref[...]       # (R, 3H)
    qkv3 = qkv.astype(bf16).reshape(BT, S, 3 * H)                   # one cast

    # heads folded into the leading batch axis (head-major): (nhead*BT, S, hd)
    def heads(base):
        return jnp.concatenate(
            [qkv3[:, :, base + h * hd: base + (h + 1) * hd]
             for h in range(nhead)], axis=0)

    qh, kh, vh = heads(0), heads(H), heads(2 * H)

    # causal additive bias, shared across heads / batch
    rows = jax.lax.broadcasted_iota(jnp.int32, (S, S), 0)
    cols = jax.lax.broadcasted_iota(jnp.int32, (S, S), 1)
    bias = jnp.where(cols > rows, jnp.float32(-1e30), jnp.float32(0.0))

    # ---- batched causal self-attention (all heads in one pair of einsums) ---
    sc = jnp.einsum('bqd,bkd->bqk', qh, kh,
                    preferred_element_type=f32) * scale             # (NB,S,S)
    sc = sc + bias[None]
    sc = sc - jnp.max(sc, axis=-1, keepdims=True)
    p = jnp.exp(sc)
    p = p * pl.reciprocal(jnp.sum(p, axis=-1, keepdims=True), approx=True)
    pv = jnp.einsum('bqk,bkd->bqd', p.astype(bf16), vh,
                    preferred_element_type=f32)                     # (NB,S,hd)

    # concat heads back along lanes -> (BT,S,H); flatten rows (H lanes: trivial)
    pv_cat = jnp.concatenate(
        [pv[h * BT:(h + 1) * BT] for h in range(nhead)], axis=-1)   # (BT,S,H)
    attn = jnp.dot(pv_cat.reshape(R, H).astype(bf16), wo_ref[...],
                   preferred_element_type=f32) + bo_ref[...]        # (R, H)

    # ---- residual + LayerNorm 1 (post-norm, torch default) -----------------
    y = x + attn
    mu = jnp.mean(y, axis=-1, keepdims=True)
    var = jnp.mean((y - mu) ** 2, axis=-1, keepdims=True)
    y = (y - mu) * jax.lax.rsqrt(var + eps) * ln1g_ref[...] + ln1b_ref[...]

    # ---- feed-forward (exact-erf GELU) --------------------------------------
    h1 = jnp.dot(y.astype(bf16), w1_ref[...],
                 preferred_element_type=f32) + b1_ref[...]          # (R, 2H)
    h1 = _gelu_exact(h1, _erf_poly)
    ff = jnp.dot(h1.astype(bf16), w2_ref[...],
                 preferred_element_type=f32) + b2_ref[...]          # (R, H)

    # ---- residual + LayerNorm 2 ---------------------------------------------
    z = y + ff
    mu2 = jnp.mean(z, axis=-1, keepdims=True)
    var2 = jnp.mean((z - mu2) ** 2, axis=-1, keepdims=True)
    z = (z - mu2) * jax.lax.rsqrt(var2 + eps) * ln2g_ref[...] + ln2b_ref[...]

    # ---- per-position Q heads, written as one lane-dense (1, R) slab --------
    # wqt is the per-position head weights tiled over the BT sequences and
    # pre-transposed to (H, R): a 2-D transpose of z plus a sublane reduction
    # yields the q values already laid out along lanes (no masked S-lane store).
    qv = jnp.sum(z.T * wqt_ref[...], axis=0, keepdims=True) + bq_ref[...]  # (1,R)
    q_out_ref[...] = qv[None]                                       # (1, 1, R)


# ----------------------------------------------------------------------------
# Tiling / wrapper
# ----------------------------------------------------------------------------
def _choose_tiling(B, S, target_rows=128, max_rows=1024):
    """Pick (BT, nb, B_pad): BT*S rows per step ~fills the MXU M-dim; the grid
    is kept even so v7x can shard the parallel axis; B is zero-padded to
    nb*BT in the wrapper (free compute vs. an under-filled MXU)."""
    bt_cap = max(1, max_rows // S)
    bt_min = max(1, -(-target_rows // S))
    bt_half = -(-B // 2)                       # rows/step if split over 2 steps
    BT = min(bt_cap, max(bt_min, bt_half))
    while (BT * S) % 8:                        # keep flattened blocks 8-row aligned
        BT += 1
    nb = max(2, -(-B // BT))
    if nb % 2:
        nb += 1
    return BT, nb, nb * BT


def transformer_critic_forward(state, actions, params, *, nhead=2):
    """state: (B, Ds) f32, actions: (B, S, Da) f32  ->  q values (B, S) f32."""
    B, Ds = state.shape
    _, S, Da = actions.shape
    H = params["ws"].shape[1]
    assert H % nhead == 0
    BT, nb, B_pad = _choose_tiling(B, S)
    R = BT * S

    f32 = jnp.float32
    bf16 = jnp.bfloat16

    pad = B_pad - B
    if pad:
        state = jnp.concatenate([state, jnp.zeros((pad, Ds), state.dtype)], 0)
        actions = jnp.concatenate(
            [actions, jnp.zeros((pad, S, Da), actions.dtype)], 0)

    state3 = state.reshape(B_pad, 1, Ds).astype(f32)            # (B_pad, 1, Ds)
    act_flat = actions.reshape(B_pad * S, Da).astype(f32)       # (B_pad*S, Da)
    pe = params["pe"][:S].astype(f32)                           # (S, H)
    bemb = (params["bs"] + params["ba"]).astype(f32)            # (1, H)
    # per-position Q-head weights tiled over the BT sequences of a block and
    # pre-transposed so the kernel's output store is lane-dense.
    wqt = jnp.tile(params["wq"][:S], (BT, 1)).T.astype(f32)     # (H, R)
    bqr = jnp.tile(params["bq"][:, :S], (1, BT)).astype(f32)    # (1, R)

    full = lambda a: pl.BlockSpec(a.shape, lambda b: (0,) * a.ndim)

    in_specs = [
        pl.BlockSpec((BT, 1, Ds), lambda b: (b, 0, 0)),         # state
        pl.BlockSpec((R, Da), lambda b: (b, 0)),                # actions (flat)
        full(pe),
        full(params["ws"]), full(params["wa"]), full(bemb),
        full(params["wqkv"]), full(params["bqkv"]),
        full(params["wo"]), full(params["bo"]),
        full(params["ln1_g"]), full(params["ln1_b"]),
        full(params["ln2_g"]), full(params["ln2_b"]),
        full(params["w1"]), full(params["b1"]),
        full(params["w2"]), full(params["b2"]),
        full(wqt), full(bqr),
    ]

    q_all = pl.pallas_call(
        functools.partial(_critic_kernel, nhead=nhead),
        out_shape=jax.ShapeDtypeStruct((nb, 1, R), f32),
        grid_spec=pltpu.PrefetchScalarGridSpec(
            num_scalar_prefetch=0,
            grid=(nb,),
            in_specs=in_specs,
            out_specs=pl.BlockSpec((1, 1, R), lambda b: (b, 0, 0))),
        compiler_params=pltpu.CompilerParams(
            dimension_semantics=("parallel",),
            vmem_limit_bytes=32 * 1024 * 1024),
    )(state3, act_flat, pe,
      params["ws"].astype(f32), params["wa"].astype(f32), bemb,
      params["wqkv"].astype(bf16), params["bqkv"].astype(f32),
      params["wo"].astype(bf16), params["bo"].astype(f32),
      params["ln1_g"].astype(f32), params["ln1_b"].astype(f32),
      params["ln2_g"].astype(f32), params["ln2_b"].astype(f32),
      params["w1"].astype(bf16), params["b1"].astype(f32),
      params["w2"].astype(bf16), params["b2"].astype(f32),
      wqt, bqr)

    return q_all.reshape(B_pad, S)[:B]                          # (B, S)


def q_values_list(q):
    """Mirror the torch module's list-of-(B, 1) API (sliced outside the kernel)."""
    return [q[:, i:i + 1] for i in range(q.shape[1])]


# ----------------------------------------------------------------------------
# Deterministic parameter construction (synthetic, not a checkpoint load)
# ----------------------------------------------------------------------------
def make_params(key, state_dim, action_dim, hidden_dim, max_seq_len):
    H = hidden_dim
    ks = jax.random.split(key, 14)
    sc = 0.1

    def rnd(k, shape):
        return (sc * jax.random.normal(k, shape)).astype(jnp.float32)

    # positional encoding buffer (same construction as PositionalEncoding)
    pos = jnp.arange(max_seq_len, dtype=jnp.float32)[:, None]
    div = jnp.exp(jnp.arange(0, H, 2, dtype=jnp.float32) * (-math.log(10000.0) / H))
    pe = jnp.zeros((max_seq_len, H), jnp.float32)
    pe = pe.at[:, 0::2].set(jnp.sin(pos * div)).at[:, 1::2].set(jnp.cos(pos * div))

    return {
        "pe": pe,
        # embeddings, stored (in, out)
        "ws": rnd(ks[0], (state_dim, H)),  "bs": rnd(ks[1], (1, H)),
        "wa": rnd(ks[2], (action_dim, H)), "ba": rnd(ks[3], (1, H)),
        # multi-head attention in_proj (q|k|v along output dim) and out_proj
        "wqkv": rnd(ks[4], (H, 3 * H)),    "bqkv": rnd(ks[5], (1, 3 * H)),
        "wo": rnd(ks[6], (H, H)),          "bo": rnd(ks[7], (1, H)),
        # layer norms
        "ln1_g": jnp.ones((1, H), jnp.float32), "ln1_b": jnp.zeros((1, H), jnp.float32),
        "ln2_g": jnp.ones((1, H), jnp.float32), "ln2_b": jnp.zeros((1, H), jnp.float32),
        # feed-forward
        "w1": rnd(ks[8], (H, 2 * H)),      "b1": rnd(ks[9], (1, 2 * H)),
        "w2": rnd(ks[10], (2 * H, H)),     "b2": rnd(ks[11], (1, H)),
        # per-position Q output heads (max_seq_len of them, packed row-wise)
        "wq": rnd(ks[12], (max_seq_len, H)),
        "bq": rnd(ks[13], (1, max_seq_len)),
    }


# ----------------------------------------------------------------------------
# Pure-JAX f32 reference (mirrors the torch module, eval mode)
# ----------------------------------------------------------------------------
def reference_forward(state, actions, params, *, nhead=2):
    B, S, Da = actions.shape
    H = params["ws"].shape[1]
    hd = H // nhead
    hp = jax.lax.Precision.HIGHEST

    s_emb = jnp.dot(state, params["ws"], precision=hp) + params["bs"]       # (B, H)
    a_emb = jnp.einsum("bsf,fh->bsh", actions, params["wa"], precision=hp) + params["ba"]
    x = a_emb + s_emb[:, None, :] + params["pe"][:S][None]

    qkv = jnp.einsum("bsh,hk->bsk", x, params["wqkv"], precision=hp) + params["bqkv"]
    q, k, v = qkv[..., :H], qkv[..., H:2 * H], qkv[..., 2 * H:]
    q = q.reshape(B, S, nhead, hd).transpose(0, 2, 1, 3)
    k = k.reshape(B, S, nhead, hd).transpose(0, 2, 1, 3)
    v = v.reshape(B, S, nhead, hd).transpose(0, 2, 1, 3)
    sc = jnp.einsum("bhqd,bhkd->bhqk", q, k, precision=hp) / math.sqrt(hd)
    mask = jnp.triu(jnp.full((S, S), -1e30, jnp.float32), k=1)
    p = jax.nn.softmax(sc + mask, axis=-1)
    attn = jnp.einsum("bhqk,bhkd->bhqd", p, v, precision=hp)
    attn = attn.transpose(0, 2, 1, 3).reshape(B, S, H)
    attn = jnp.einsum("bsh,hk->bsk", attn, params["wo"], precision=hp) + params["bo"]

    def ln(t, g, b):
        mu = jnp.mean(t, -1, keepdims=True)
        var = jnp.mean((t - mu) ** 2, -1, keepdims=True)
        return (t - mu) * jax.lax.rsqrt(var + 1e-5) * g + b

    y = ln(x + attn, params["ln1_g"], params["ln1_b"])
    h1 = _gelu_exact(jnp.einsum("bsh,hk->bsk", y, params["w1"], precision=hp)
                     + params["b1"], jax.lax.erf)
    ff = jnp.einsum("bsk,kh->bsh", h1, params["w2"], precision=hp) + params["b2"]
    z = ln(y + ff, params["ln2_g"], params["ln2_b"])
    qv = jnp.sum(z * params["wq"][:S][None], axis=-1) + params["bq"][0, :S]  # (B, S)
    return qv


if __name__ == "__main__":
    # Module defaults: hidden_dim=128, nhead=2, max_seq_len=16.
    B, S = 2, 8
    state_dim, action_dim, hidden_dim, max_seq_len = 12, 4, 128, 16

    key = jax.random.PRNGKey(0)
    k_state, k_act, k_par = jax.random.split(key, 3)
    state = jax.random.normal(k_state, (B, state_dim), jnp.float32)
    actions = jax.random.normal(k_act, (B, S, action_dim), jnp.float32)
    params = make_params(k_par, state_dim, action_dim, hidden_dim, max_seq_len)

    q = transformer_critic_forward(state, actions, params)
    q = jax.block_until_ready(q)                                   # (B, S)

    # Correctness check vs pure-f32 reference (bf16 MXU operands + approx
    # reciprocal in the kernel -> loose-ish tolerance).
    q_ref = reference_forward(state, actions, params)
    assert q.shape == (B, S)
    assert bool(jnp.all(jnp.isfinite(q)))
    assert jnp.allclose(q, q_ref, rtol=5e-2, atol=5e-2), (q, q_ref)

    # Module API: list of (B, 1) per-position Q values.
    q_list = q_values_list(q)
    assert len(q_list) == S and all(t.shape == (B, 1) for t in q_list)

    print("KERNEL_OK")
</pallas_src>

<mosaic_0001>
module attributes {stable_mosaic.version = 11 : i64} {
  func.func @_critic_kernel(%arg0: i32, %arg1: memref<16x1x12xf32, #tpu.memory_space<vmem>>, %arg2: memref<128x4xf32, #tpu.memory_space<vmem>>, %arg3: memref<8x128xf32, #tpu.memory_space<vmem>>, %arg4: memref<12x128xf32, #tpu.memory_space<vmem>>, %arg5: memref<4x128xf32, #tpu.memory_space<vmem>>, %arg6: memref<1x128xf32, #tpu.memory_space<vmem>>, %arg7: memref<128x384xbf16, #tpu.memory_space<vmem>>, %arg8: memref<1x384xf32, #tpu.memory_space<vmem>>, %arg9: memref<128x128xbf16, #tpu.memory_space<vmem>>, %arg10: memref<1x128xf32, #tpu.memory_space<vmem>>, %arg11: memref<1x128xf32, #tpu.memory_space<vmem>>, %arg12: memref<1x128xf32, #tpu.memory_space<vmem>>, %arg13: memref<1x128xf32, #tpu.memory_space<vmem>>, %arg14: memref<1x128xf32, #tpu.memory_space<vmem>>, %arg15: memref<128x256xbf16, #tpu.memory_space<vmem>>, %arg16: memref<1x256xf32, #tpu.memory_space<vmem>>, %arg17: memref<256x128xbf16, #tpu.memory_space<vmem>>, %arg18: memref<1x128xf32, #tpu.memory_space<vmem>>, %arg19: memref<128x128xf32, #tpu.memory_space<vmem>>, %arg20: memref<1x128xf32, #tpu.memory_space<vmem>>, %arg21: memref<1x1x128xf32, #tpu.memory_space<vmem>>) attributes {dimension_semantics = [#tpu.dimension_semantics<parallel>], iteration_bounds = array<i64: 2>, scalar_prefetch = 0 : i64, scratch_operands = 0 : i64, tpu.core_type = #tpu.core_type<tc>, window_params = [{transform_indices = @transform_0, window_bounds = array<i64: 16, 1, 12>}, {transform_indices = @transform_1, window_bounds = array<i64: 128, 4>}, {pipeline_mode = #tpu.pipeline_mode<synchronous>, transform_indices = @transform_2, window_bounds = array<i64: 8, 128>}, {pipeline_mode = #tpu.pipeline_mode<synchronous>, transform_indices = @transform_3, window_bounds = array<i64: 12, 128>}, {pipeline_mode = #tpu.pipeline_mode<synchronous>, transform_indices = @transform_4, window_bounds = array<i64: 4, 128>}, {pipeline_mode = #tpu.pipeline_mode<synchronous>, transform_indices = @transform_5, window_bounds = array<i64: 1, 128>}, {pipeline_mode = #tpu.pipeline_mode<synchronous>, transform_indices = @transform_6, window_bounds = array<i64: 128, 384>}, {pipeline_mode = #tpu.pipeline_mode<synchronous>, transform_indices = @transform_7, window_bounds = array<i64: 1, 384>}, {pipeline_mode = #tpu.pipeline_mode<synchronous>, transform_indices = @transform_8, window_bounds = array<i64: 128, 128>}, {pipeline_mode = #tpu.pipeline_mode<synchronous>, transform_indices = @transform_9, window_bounds = array<i64: 1, 128>}, {pipeline_mode = #tpu.pipeline_mode<synchronous>, transform_indices = @transform_10, window_bounds = array<i64: 1, 128>}, {pipeline_mode = #tpu.pipeline_mode<synchronous>, transform_indices = @transform_11, window_bounds = array<i64: 1, 128>}, {pipeline_mode = #tpu.pipeline_mode<synchronous>, transform_indices = @transform_12, window_bounds = array<i64: 1, 128>}, {pipeline_mode = #tpu.pipeline_mode<synchronous>, transform_indices = @transform_13, window_bounds = array<i64: 1, 128>}, {pipeline_mode = #tpu.pipeline_mode<synchronous>, transform_indices = @transform_14, window_bounds = array<i64: 128, 256>}, {pipeline_mode = #tpu.pipeline_mode<synchronous>, transform_indices = @transform_15, window_bounds = array<i64: 1, 256>}, {pipeline_mode = #tpu.pipeline_mode<synchronous>, transform_indices = @transform_16, window_bounds = array<i64: 256, 128>}, {pipeline_mode = #tpu.pipeline_mode<synchronous>, transform_indices = @transform_17, window_bounds = array<i64: 1, 128>}, {pipeline_mode = #tpu.pipeline_mode<synchronous>, transform_indices = @transform_18, window_bounds = array<i64: 128, 128>}, {pipeline_mode = #tpu.pipeline_mode<synchronous>, transform_indices = @transform_19, window_bounds = array<i64: 1, 128>}, {transform_indices = @transform_20, window_bounds = array<i64: 1, 1, 128>}]} {
    %c0 = arith.constant 0 : index
    %c0_0 = arith.constant 0 : index
    %0 = vector.load %arg2[%c0, %c0_0] : memref<128x4xf32, #tpu.memory_space<vmem>>, vector<128x4xf32>
    %c0_1 = arith.constant 0 : index
    %c0_2 = arith.constant 0 : index
    %1 = vector.load %arg5[%c0_1, %c0_2] : memref<4x128xf32, #tpu.memory_space<vmem>>, vector<4x128xf32>
    %cst = arith.constant dense<0.000000e+00> : vector<128x128xf32>
    %2 = tpu.matmul %0, %1, %cst {dimension_numbers = #tpu.dot_dimension_numbers<[1], [0], [0], [1], [0, 0, 1, 1], [], []>} : vector<128x4xf32>, vector<4x128xf32>, vector<128x128xf32> -> vector<128x128xf32>
    %c0_3 = arith.constant 0 : index
    %c0_4 = arith.constant 0 : index
    %c0_5 = arith.constant 0 : index
    %3 = vector.load %arg1[%c0_3, %c0_4, %c0_5] : memref<16x1x12xf32, #tpu.memory_space<vmem>>, vector<16x1x12xf32>
    %4 = vector.shape_cast %3 : vector<16x1x12xf32> to vector<16x12xf32>
    %c0_6 = arith.constant 0 : index
    %c0_7 = arith.constant 0 : index
    %5 = vector.load %arg4[%c0_6, %c0_7] : memref<12x128xf32, #tpu.memory_space<vmem>>, vector<12x128xf32>
    %cst_8 = arith.constant dense<0.000000e+00> : vector<16x128xf32>
    %6 = tpu.matmul %4, %5, %cst_8 {dimension_numbers = #tpu.dot_dimension_numbers<[1], [0], [0], [1], [0, 0, 1, 1], [], []>} : vector<16x12xf32>, vector<12x128xf32>, vector<16x128xf32> -> vector<16x128xf32>
    %c0_9 = arith.constant 0 : index
    %c0_10 = arith.constant 0 : index
    %7 = vector.load %arg6[%c0_9, %c0_10] : memref<1x128xf32, #tpu.memory_space<vmem>>, vector<1x128xf32>
    %8 = vector.broadcast %7 : vector<1x128xf32> to vector<16x128xf32>
    %9 = arith.addf %6, %8 : vector<16x128xf32>
    %10 = vector.shape_cast %2 : vector<128x128xf32> to vector<16x8x128xf32>
    %11 = vector.shape_cast %9 : vector<16x128xf32> to vector<16x1x128xf32>
    %12 = vector.broadcast %11 : vector<16x1x128xf32> to vector<16x8x128xf32>
    %13 = arith.addf %10, %12 : vector<16x8x128xf32>
    %c0_11 = arith.constant 0 : index
    %c0_12 = arith.constant 0 : index
    %14 = vector.load %arg3[%c0_11, %c0_12] : memref<8x128xf32, #tpu.memory_space<vmem>>, vector<8x128xf32>
    %15 = vector.shape_cast %14 : vector<8x128xf32> to vector<1x8x128xf32>
    %16 = vector.broadcast %15 : vector<1x8x128xf32> to vector<16x8x128xf32>
    %17 = arith.addf %13, %16 : vector<16x8x128xf32>
    %18 = vector.shape_cast %17 : vector<16x8x128xf32> to vector<128x128xf32>
    %19 = arith.truncf %18 : vector<128x128xf32> to vector<128x128xbf16>
    %c0_13 = arith.constant 0 : index
    %c0_14 = arith.constant 0 : index
    %20 = vector.load %arg7[%c0_13, %c0_14] : memref<128x384xbf16, #tpu.memory_space<vmem>>, vector<128x384xbf16>
    %cst_15 = arith.constant dense<0.000000e+00> : vector<128x384xf32>
    %21 = tpu.matmul %19, %20, %cst_15 {dimension_numbers = #tpu.dot_dimension_numbers<[1], [0], [0], [1], [0, 0, 1, 1], [], []>} : vector<128x128xbf16>, vector<128x384xbf16>, vector<128x384xf32> -> vector<128x384xf32>
    %c0_16 = arith.constant 0 : index
    %c0_17 = arith.constant 0 : index
    %22 = vector.load %arg8[%c0_16, %c0_17] : memref<1x384xf32, #tpu.memory_space<vmem>>, vector<1x384xf32>
    %23 = vector.broadcast %22 : vector<1x384xf32> to vector<128x384xf32>
    %24 = arith.addf %21, %23 : vector<128x384xf32>
    %25 = arith.truncf %24 : vector<128x384xf32> to vector<128x384xbf16>
    %26 = vector.shape_cast %25 : vector<128x384xbf16> to vector<16x8x384xbf16>
    %27 = vector.extract_strided_slice %26 {offsets = [0, 0, 0], sizes = [16, 8, 64], strides = [1, 1, 1]} : vector<16x8x384xbf16> to vector<16x8x64xbf16>
    %28 = vector.extract_strided_slice %26 {offsets = [0, 0, 64], sizes = [16, 8, 64], strides = [1, 1, 1]} : vector<16x8x384xbf16> to vector<16x8x64xbf16>
    %29 = tpu.concatenate %27, %28 in 0 : vector<16x8x64xbf16>, vector<16x8x64xbf16> -> vector<32x8x64xbf16>
    %30 = vector.extract_strided_slice %26 {offsets = [0, 0, 128], sizes = [16, 8, 64], strides = [1, 1, 1]} : vector<16x8x384xbf16> to vector<16x8x64xbf16>
    %31 = vector.extract_strided_slice %26 {offsets = [0, 0, 192], sizes = [16, 8, 64], strides = [1, 1, 1]} : vector<16x8x384xbf16> to vector<16x8x64xbf16>
    %32 = tpu.concatenate %30, %31 in 0 : vector<16x8x64xbf16>, vector<16x8x64xbf16> -> vector<32x8x64xbf16>
    %33 = vector.extract_strided_slice %26 {offsets = [0, 0, 256], sizes = [16, 8, 64], strides = [1, 1, 1]} : vector<16x8x384xbf16> to vector<16x8x64xbf16>
    %34 = vector.extract_strided_slice %26 {offsets = [0, 0, 320], sizes = [16, 8, 64], strides = [1, 1, 1]} : vector<16x8x384xbf16> to vector<16x8x64xbf16>
    %35 = tpu.concatenate %33, %34 in 0 : vector<16x8x64xbf16>, vector<16x8x64xbf16> -> vector<32x8x64xbf16>
    %36 = tpu.iota {dimensions = array<i32: 0>} : vector<8x8xi32>
    %37 = tpu.iota {dimensions = array<i32: 1>} : vector<8x8xi32>
    %38 = arith.cmpi sgt, %37, %36 : vector<8x8xi32>
    %cst_18 = arith.constant -1.000000e+30 : f32
    %cst_19 = arith.constant 0.000000e+00 : f32
    %39 = vector.broadcast %cst_18 : f32 to vector<8x8xf32>
    %40 = vector.broadcast %cst_19 : f32 to vector<8x8xf32>
    %41 = arith.select %38, %39, %40 : vector<8x8xi1>, vector<8x8xf32>
    "tpu.trace_start"() <{level = 10 : i32, message = "bqd,bkd->bqk"}> : () -> ()
    %cst_20 = arith.constant dense<0.000000e+00> : vector<32x8x8xf32>
    %42 = tpu.matmul %29, %32, %cst_20 {dimension_numbers = #tpu.dot_dimension_numbers<[2], [2], [1], [1], [0, 0, 0, 1, 1, 1], [0], [0]>} : vector<32x8x64xbf16>, vector<32x8x64xbf16>, vector<32x8x8xf32> -> vector<32x8x8xf32>
    "tpu.trace_stop"() : () -> ()
    %cst_21 = arith.constant 1.250000e-01 : f32
    %43 = vector.broadcast %cst_21 : f32 to vector<32x8x8xf32>
    %44 = arith.mulf %42, %43 : vector<32x8x8xf32>
    %45 = vector.shape_cast %41 : vector<8x8xf32> to vector<1x8x8xf32>
    %46 = vector.broadcast %45 : vector<1x8x8xf32> to vector<32x8x8xf32>
    %47 = arith.addf %44, %46 : vector<32x8x8xf32>
    %cst_22 = arith.constant dense<0xFF800000> : vector<32x8xf32>
    %48 = vector.multi_reduction <maximumf>, %47, %cst_22 [2] : vector<32x8x8xf32> to vector<32x8xf32>
    %49 = vector.shape_cast %48 : vector<32x8xf32> to vector<32x8x1xf32>
    %50 = vector.broadcast %49 : vector<32x8x1xf32> to vector<32x8x8xf32>
    %51 = arith.subf %47, %50 : vector<32x8x8xf32>
    %52 = math.exp %51 : vector<32x8x8xf32>
    %cst_23 = arith.constant dense<0.000000e+00> : vector<32x8xf32>
    %53 = vector.multi_reduction <add>, %52, %cst_23 [2] : vector<32x8x8xf32> to vector<32x8xf32>
    %54 = vector.shape_cast %53 : vector<32x8xf32> to vector<32x8x1xf32>
    %55 = tpu.reciprocal %54 {approx = true} : vector<32x8x1xf32> -> vector<32x8x1xf32>
    %56 = vector.broadcast %55 : vector<32x8x1xf32> to vector<32x8x8xf32>
    %57 = arith.mulf %52, %56 : vector<32x8x8xf32>
    %58 = arith.truncf %57 : vector<32x8x8xf32> to vector<32x8x8xbf16>
    "tpu.trace_start"() <{level = 10 : i32, message = "bqk,bkd->bqd"}> : () -> ()
    %cst_24 = arith.constant dense<0.000000e+00> : vector<32x8x64xf32>
    %59 = tpu.matmul %58, %35, %cst_24 {dimension_numbers = #tpu.dot_dimension_numbers<[2], [1], [1], [2], [0, 0, 0, 1, 1, 2], [0], [0]>} : vector<32x8x8xbf16>, vector<32x8x64xbf16>, vector<32x8x64xf32> -> vector<32x8x64xf32>
    "tpu.trace_stop"() : () -> ()
    %60 = vector.extract_strided_slice %59 {offsets = [0, 0, 0], sizes = [16, 8, 64], strides = [1, 1, 1]} : vector<32x8x64xf32> to vector<16x8x64xf32>
    %61 = vector.extract_strided_slice %59 {offsets = [16, 0, 0], sizes = [16, 8, 64], strides = [1, 1, 1]} : vector<32x8x64xf32> to vector<16x8x64xf32>
    %62 = tpu.concatenate %60, %61 in 2 : vector<16x8x64xf32>, vector<16x8x64xf32> -> vector<16x8x128xf32>
    %63 = vector.shape_cast %62 : vector<16x8x128xf32> to vector<128x128xf32>
    %64 = arith.truncf %63 : vector<128x128xf32> to vector<128x128xbf16>
    %c0_25 = arith.constant 0 : index
    %c0_26 = arith.constant 0 : index
    %65 = vector.load %arg9[%c0_25, %c0_26] : memref<128x128xbf16, #tpu.memory_space<vmem>>, vector<128x128xbf16>
    %cst_27 = arith.constant dense<0.000000e+00> : vector<128x128xf32>
    %66 = tpu.matmul %64, %65, %cst_27 {dimension_numbers = #tpu.dot_dimension_numbers<[1], [0], [0], [1], [0, 0, 1, 1], [], []>} : vector<128x128xbf16>, vector<128x128xbf16>, vector<128x128xf32> -> vector<128x128xf32>
    %c0_28 = arith.constant 0 : index
    %c0_29 = arith.constant 0 : index
    %67 = vector.load %arg10[%c0_28, %c0_29] : memref<1x128xf32, #tpu.memory_space<vmem>>, vector<1x128xf32>
    %68 = vector.broadcast %67 : vector<1x128xf32> to vector<128x128xf32>
    %69 = arith.addf %66, %68 : vector<128x128xf32>
    %70 = arith.addf %18, %69 : vector<128x128xf32>
    %cst_30 = arith.constant dense<0.000000e+00> : vector<128xf32>
    %71 = vector.multi_reduction <add>, %70, %cst_30 [1] : vector<128x128xf32> to vector<128xf32>
    %72 = vector.shape_cast %71 : vector<128xf32> to vector<128x1xf32>
    %cst_31 = arith.constant 1.280000e+02 : f32
    %73 = vector.broadcast %cst_31 : f32 to vector<128x1xf32>
    %74 = arith.divf %72, %73 : vector<128x1xf32>
    %75 = vector.broadcast %74 : vector<128x1xf32> to vector<128x128xf32>
    %76 = arith.subf %70, %75 : vector<128x128xf32>
    %77 = arith.mulf %76, %76 : vector<128x128xf32>
    %cst_32 = arith.constant dense<0.000000e+00> : vector<128xf32>
    %78 = vector.multi_reduction <add>, %77, %cst_32 [1] : vector<128x128xf32> to vector<128xf32>
    %79 = vector.shape_cast %78 : vector<128xf32> to vector<128x1xf32>
    %cst_33 = arith.constant 1.280000e+02 : f32
    %80 = vector.broadcast %cst_33 : f32 to vector<128x1xf32>
    %81 = arith.divf %79, %80 : vector<128x1xf32>
    %82 = vector.broadcast %74 : vector<128x1xf32> to vector<128x128xf32>
    %83 = arith.subf %70, %82 : vector<128x128xf32>
    %cst_34 = arith.constant 9.99999974E-6 : f32
    %84 = vector.broadcast %cst_34 : f32 to vector<128x1xf32>
    %85 = arith.addf %81, %84 : vector<128x1xf32>
    %86 = math.rsqrt %85 : vector<128x1xf32>
    %87 = vector.broadcast %86 : vector<128x1xf32> to vector<128x128xf32>
    %88 = arith.mulf %83, %87 : vector<128x128xf32>
    %c0_35 = arith.constant 0 : index
    %c0_36 = arith.constant 0 : index
    %89 = vector.load %arg11[%c0_35, %c0_36] : memref<1x128xf32, #tpu.memory_space<vmem>>, vector<1x128xf32>
    %90 = vector.broadcast %89 : vector<1x128xf32> to vector<128x128xf32>
    %91 = arith.mulf %88, %90 : vector<128x128xf32>
    %c0_37 = arith.constant 0 : index
    %c0_38 = arith.constant 0 : index
    %92 = vector.load %arg12[%c0_37, %c0_38] : memref<1x128xf32, #tpu.memory_space<vmem>>, vector<1x128xf32>
    %93 = vector.broadcast %92 : vector<1x128xf32> to vector<128x128xf32>
    %94 = arith.addf %91, %93 : vector<128x128xf32>
    %95 = arith.truncf %94 : vector<128x128xf32> to vector<128x128xbf16>
    %c0_39 = arith.constant 0 : index
    %c0_40 = arith.constant 0 : index
    %96 = vector.load %arg15[%c0_39, %c0_40] : memref<128x256xbf16, #tpu.memory_space<vmem>>, vector<128x256xbf16>
    %cst_41 = arith.constant dense<0.000000e+00> : vector<128x256xf32>
    %97 = tpu.matmul %95, %96, %cst_41 {dimension_numbers = #tpu.dot_dimension_numbers<[1], [0], [0], [1], [0, 0, 1, 1], [], []>} : vector<128x128xbf16>, vector<128x256xbf16>, vector<128x256xf32> -> vector<128x256xf32>
    %c0_42 = arith.constant 0 : index
    %c0_43 = arith.constant 0 : index
    %98 = vector.load %arg16[%c0_42, %c0_43] : memref<1x256xf32, #tpu.memory_space<vmem>>, vector<1x256xf32>
    %99 = vector.broadcast %98 : vector<1x256xf32> to vector<128x256xf32>
    %100 = arith.addf %97, %99 : vector<128x256xf32>
    %cst_44 = arith.constant 5.000000e-01 : f32
    %101 = vector.broadcast %cst_44 : f32 to vector<128x256xf32>
    %102 = arith.mulf %101, %100 : vector<128x256xf32>
    %cst_45 = arith.constant 0.707106769 : f32
    %103 = vector.broadcast %cst_45 : f32 to vector<128x256xf32>
    %104 = arith.mulf %100, %103 : vector<128x256xf32>
    %105 = math.absf %104 : vector<128x256xf32>
    %cst_46 = arith.constant 0.327591091 : f32
    %106 = vector.broadcast %cst_46 : f32 to vector<128x256xf32>
    %107 = arith.mulf %106, %105 : vector<128x256xf32>
    %cst_47 = arith.constant 1.000000e+00 : f32
    %108 = vector.broadcast %cst_47 : f32 to vector<128x256xf32>
    %109 = arith.addf %108, %107 : vector<128x256xf32>
    %cst_48 = arith.constant 1.000000e+00 : f32
    %110 = vector.broadcast %cst_48 : f32 to vector<128x256xf32>
    %111 = arith.divf %110, %109 : vector<128x256xf32>
    %cst_49 = arith.constant 1.06140542 : f32
    %112 = vector.broadcast %cst_49 : f32 to vector<128x256xf32>
    %113 = arith.mulf %112, %111 : vector<128x256xf32>
    %cst_50 = arith.constant -1.45315206 : f32
    %114 = vector.broadcast %cst_50 : f32 to vector<128x256xf32>
    %115 = arith.addf %113, %114 : vector<128x256xf32>
    %116 = arith.mulf %115, %111 : vector<128x256xf32>
    %cst_51 = arith.constant 1.42141378 : f32
    %117 = vector.broadcast %cst_51 : f32 to vector<128x256xf32>
    %118 = arith.addf %116, %117 : vector<128x256xf32>
    %119 = arith.mulf %118, %111 : vector<128x256xf32>
    %cst_52 = arith.constant -0.284496725 : f32
    %120 = vector.broadcast %cst_52 : f32 to vector<128x256xf32>
    %121 = arith.addf %119, %120 : vector<128x256xf32>
    %122 = arith.mulf %121, %111 : vector<128x256xf32>
    %cst_53 = arith.constant 0.254829586 : f32
    %123 = vector.broadcast %cst_53 : f32 to vector<128x256xf32>
    %124 = arith.addf %122, %123 : vector<128x256xf32>
    %125 = arith.mulf %124, %111 : vector<128x256xf32>
    %cst_54 = arith.constant 0.000000e+00 : f32
    %126 = vector.broadcast %cst_54 : f32 to vector<128x256xf32>
    %127 = arith.subf %126, %105 : vector<128x256xf32>
    %128 = arith.mulf %127, %105 : vector<128x256xf32>
    %129 = math.exp %128 : vector<128x256xf32>
    %130 = arith.mulf %125, %129 : vector<128x256xf32>
    %cst_55 = arith.constant 1.000000e+00 : f32
    %131 = vector.broadcast %cst_55 : f32 to vector<128x256xf32>
    %132 = arith.subf %131, %130 : vector<128x256xf32>
    %cst_56 = arith.constant 0.000000e+00 : f32
    %133 = vector.broadcast %cst_56 : f32 to vector<128x256xf32>
    %134 = arith.cmpf oge, %104, %133 : vector<128x256xf32>
    %cst_57 = arith.constant 0.000000e+00 : f32
    %135 = vector.broadcast %cst_57 : f32 to vector<128x256xf32>
    %136 = arith.subf %135, %132 : vector<128x256xf32>
    %137 = arith.select %134, %132, %136 : vector<128x256xi1>, vector<128x256xf32>
    %cst_58 = arith.constant 1.000000e+00 : f32
    %138 = vector.broadcast %cst_58 : f32 to vector<128x256xf32>
    %139 = arith.addf %138, %137 : vector<128x256xf32>
    %140 = arith.mulf %102, %139 : vector<128x256xf32>
    %141 = arith.truncf %140 : vector<128x256xf32> to vector<128x256xbf16>
    %c0_59 = arith.constant 0 : index
    %c0_60 = arith.constant 0 : index
    %142 = vector.load %arg17[%c0_59, %c0_60] : memref<256x128xbf16, #tpu.memory_space<vmem>>, vector<256x128xbf16>
    %cst_61 = arith.constant dense<0.000000e+00> : vector<128x128xf32>
    %143 = tpu.matmul %141, %142, %cst_61 {dimension_numbers = #tpu.dot_dimension_numbers<[1], [0], [0], [1], [0, 0, 1, 1], [], []>} : vector<128x256xbf16>, vector<256x128xbf16>, vector<128x128xf32> -> vector<128x128xf32>
    %c0_62 = arith.constant 0 : index
    %c0_63 = arith.constant 0 : index
    %144 = vector.load %arg18[%c0_62, %c0_63] : memref<1x128xf32, #tpu.memory_space<vmem>>, vector<1x128xf32>
    %145 = vector.broadcast %144 : vector<1x128xf32> to vector<128x128xf32>
    %146 = arith.addf %143, %145 : vector<128x128xf32>
    %147 = arith.addf %94, %146 : vector<128x128xf32>
    %cst_64 = arith.constant dense<0.000000e+00> : vector<128xf32>
    %148 = vector.multi_reduction <add>, %147, %cst_64 [1] : vector<128x128xf32> to vector<128xf32>
    %149 = vector.shape_cast %148 : vector<128xf32> to vector<128x1xf32>
    %cst_65 = arith.constant 1.280000e+02 : f32
    %150 = vector.broadcast %cst_65 : f32 to vector<128x1xf32>
    %151 = arith.divf %149, %150 : vector<128x1xf32>
    %152 = vector.broadcast %151 : vector<128x1xf32> to vector<128x128xf32>
    %153 = arith.subf %147, %152 : vector<128x128xf32>
    %154 = arith.mulf %153, %153 : vector<128x128xf32>
    %cst_66 = arith.constant dense<0.000000e+00> : vector<128xf32>
    %155 = vector.multi_reduction <add>, %154, %cst_66 [1] : vector<128x128xf32> to vector<128xf32>
    %156 = vector.shape_cast %155 : vector<128xf32> to vector<128x1xf32>
    %cst_67 = arith.constant 1.280000e+02 : f32
    %157 = vector.broadcast %cst_67 : f32 to vector<128x1xf32>
    %158 = arith.divf %156, %157 : vector<128x1xf32>
    %159 = vector.broadcast %151 : vector<128x1xf32> to vector<128x128xf32>
    %160 = arith.subf %147, %159 : vector<128x128xf32>
    %cst_68 = arith.constant 9.99999974E-6 : f32
    %161 = vector.broadcast %cst_68 : f32 to vector<128x1xf32>
    %162 = arith.addf %158, %161 : vector<128x1xf32>
    %163 = math.rsqrt %162 : vector<128x1xf32>
    %164 = vector.broadcast %163 : vector<128x1xf32> to vector<128x128xf32>
    %165 = arith.mulf %160, %164 : vector<128x128xf32>
    %c0_69 = arith.constant 0 : index
    %c0_70 = arith.constant 0 : index
    %166 = vector.load %arg13[%c0_69, %c0_70] : memref<1x128xf32, #tpu.memory_space<vmem>>, vector<1x128xf32>
    %167 = vector.broadcast %166 : vector<1x128xf32> to vector<128x128xf32>
    %168 = arith.mulf %165, %167 : vector<128x128xf32>
    %c0_71 = arith.constant 0 : index
    %c0_72 = arith.constant 0 : index
    %169 = vector.load %arg14[%c0_71, %c0_72] : memref<1x128xf32, #tpu.memory_space<vmem>>, vector<1x128xf32>
    %170 = vector.broadcast %169 : vector<1x128xf32> to vector<128x128xf32>
    %171 = arith.addf %168, %170 : vector<128x128xf32>
    %172 = tpu.transpose %171, [1, 0] : vector<128x128xf32> -> vector<128x128xf32>
    %c0_73 = arith.constant 0 : index
    %c0_74 = arith.constant 0 : index
    %173 = vector.load %arg19[%c0_73, %c0_74] : memref<128x128xf32, #tpu.memory_space<vmem>>, vector<128x128xf32>
    %174 = arith.mulf %172, %173 : vector<128x128xf32>
    %cst_75 = arith.constant dense<0.000000e+00> : vector<128xf32>
    %175 = vector.multi_reduction <add>, %174, %cst_75 [0] : vector<128x128xf32> to vector<128xf32>
    %176 = vector.shape_cast %175 : vector<128xf32> to vector<1x128xf32>
    %c0_76 = arith.constant 0 : index
    %c0_77 = arith.constant 0 : index
    %177 = vector.load %arg20[%c0_76, %c0_77] : memref<1x128xf32, #tpu.memory_space<vmem>>, vector<1x128xf32>
    %178 = arith.addf %176, %177 : vector<1x128xf32>
    %179 = vector.shape_cast %178 : vector<1x128xf32> to vector<1x1x128xf32>
    %c0_78 = arith.constant 0 : index
    %c0_79 = arith.constant 0 : index
    %c0_80 = arith.constant 0 : index
    %180 = vector.load %arg21[%c0_78, %c0_79, %c0_80] : memref<1x1x128xf32, #tpu.memory_space<vmem>>, vector<1x1x128xf32>
    tpu.vector_store %arg21[%c0_78, %c0_79, %c0_80], %179 {strides = array<i32>} : memref<1x1x128xf32, #tpu.memory_space<vmem>>, vector<1x1x128xf32>,
    return
  }
  func.func @transform_0(%arg0: i32) -> (i32, i32, i32) {
    %c0_i32 = arith.constant 0 : i32
    %c0_i32_0 = arith.constant 0 : i32
    %c0_i32_1 = arith.constant 0 : i32
    return %arg0, %c0_i32, %c0_i32_0 : i32, i32, i32
  }
  func.func @transform_1(%arg0: i32) -> (i32, i32) {
    %c0_i32 = arith.constant 0 : i32
    %c0_i32_0 = arith.constant 0 : i32
    return %arg0, %c0_i32 : i32, i32
  }
  func.func @transform_2(%arg0: i32) -> (i32, i32) {
    %c0_i32 = arith.constant 0 : i32
    %c0_i32_0 = arith.constant 0 : i32
    %c0_i32_1 = arith.constant 0 : i32
    return %c0_i32, %c0_i32_0 : i32, i32
  }
  func.func @transform_3(%arg0: i32) -> (i32, i32) {
    %c0_i32 = arith.constant 0 : i32
    %c0_i32_0 = arith.constant 0 : i32
    %c0_i32_1 = arith.constant 0 : i32
    return %c0_i32, %c0_i32_0 : i32, i32
  }
  func.func @transform_4(%arg0: i32) -> (i32, i32) {
    %c0_i32 = arith.constant 0 : i32
    %c0_i32_0 = arith.constant 0 : i32
    %c0_i32_1 = arith.constant 0 : i32
    return %c0_i32, %c0_i32_0 : i32, i32
  }
  func.func @transform_5(%arg0: i32) -> (i32, i32) {
    %c0_i32 = arith.constant 0 : i32
    %c0_i32_0 = arith.constant 0 : i32
    %c0_i32_1 = arith.constant 0 : i32
    return %c0_i32, %c0_i32_0 : i32, i32
  }
  func.func @transform_6(%arg0: i32) -> (i32, i32) {
    %c0_i32 = arith.constant 0 : i32
    %c0_i32_0 = arith.constant 0 : i32
    %c0_i32_1 = arith.constant 0 : i32
    return %c0_i32, %c0_i32_0 : i32, i32
  }
  func.func @transform_7(%arg0: i32) -> (i32, i32) {
    %c0_i32 = arith.constant 0 : i32
    %c0_i32_0 = arith.constant 0 : i32
    %c0_i32_1 = arith.constant 0 : i32
    return %c0_i32, %c0_i32_0 : i32, i32
  }
  func.func @transform_8(%arg0: i32) -> (i32, i32) {
    %c0_i32 = arith.constant 0 : i32
    %c0_i32_0 = arith.constant 0 : i32
    %c0_i32_1 = arith.constant 0 : i32
    return %c0_i32, %c0_i32_0 : i32, i32
  }
  func.func @transform_9(%arg0: i32) -> (i32, i32) {
    %c0_i32 = arith.constant 0 : i32
    %c0_i32_0 = arith.constant 0 : i32
    %c0_i32_1 = arith.constant 0 : i32
    return %c0_i32, %c0_i32_0 : i32, i32
  }
  func.func @transform_10(%arg0: i32) -> (i32, i32) {
    %c0_i32 = arith.constant 0 : i32
    %c0_i32_0 = arith.constant 0 : i32
    %c0_i32_1 = arith.constant 0 : i32
    return %c0_i32, %c0_i32_0 : i32, i32
  }
  func.func @transform_11(%arg0: i32) -> (i32, i32) {
    %c0_i32 = arith.constant 0 : i32
    %c0_i32_0 = arith.constant 0 : i32
    %c0_i32_1 = arith.constant 0 : i32
    return %c0_i32, %c0_i32_0 : i32, i32
  }
  func.func @transform_12(%arg0: i32) -> (i32, i32) {
    %c0_i32 = arith.constant 0 : i32
    %c0_i32_0 = arith.constant 0 : i32
    %c0_i32_1 = arith.constant 0 : i32
    return %c0_i32, %c0_i32_0 : i32, i32
  }
  func.func @transform_13(%arg0: i32) -> (i32, i32) {
    %c0_i32 = arith.constant 0 : i32
    %c0_i32_0 = arith.constant 0 : i32
    %c0_i32_1 = arith.constant 0 : i32
    return %c0_i32, %c0_i32_0 : i32, i32
  }
  func.func @transform_14(%arg0: i32) -> (i32, i32) {
    %c0_i32 = arith.constant 0 : i32
    %c0_i32_0 = arith.constant 0 : i32
    %c0_i32_1 = arith.constant 0 : i32
    return %c0_i32, %c0_i32_0 : i32, i32
  }
  func.func @transform_15(%arg0: i32) -> (i32, i32) {
    %c0_i32 = arith.constant 0 : i32
    %c0_i32_0 = arith.constant 0 : i32
    %c0_i32_1 = arith.constant 0 : i32
    return %c0_i32, %c0_i32_0 : i32, i32
  }
  func.func @transform_16(%arg0: i32) -> (i32, i32) {
    %c0_i32 = arith.constant 0 : i32
    %c0_i32_0 = arith.constant 0 : i32
    %c0_i32_1 = arith.constant 0 : i32
    return %c0_i32, %c0_i32_0 : i32, i32
  }
  func.func @transform_17(%arg0: i32) -> (i32, i32) {
    %c0_i32 = arith.constant 0 : i32
    %c0_i32_0 = arith.constant 0 : i32
    %c0_i32_1 = arith.constant 0 : i32
    return %c0_i32, %c0_i32_0 : i32, i32
  }
  func.func @transform_18(%arg0: i32) -> (i32, i32) {
    %c0_i32 = arith.constant 0 : i32
    %c0_i32_0 = arith.constant 0 : i32
    %c0_i32_1 = arith.constant 0 : i32
    return %c0_i32, %c0_i32_0 : i32, i32
  }
  func.func @transform_19(%arg0: i32) -> (i32, i32) {
    %c0_i32 = arith.constant 0 : i32
    %c0_i32_0 = arith.constant 0 : i32
    %c0_i32_1 = arith.constant 0 : i32
    return %c0_i32, %c0_i32_0 : i32, i32
  }
  func.func @transform_20(%arg0: i32) -> (i32, i32, i32) {
    %c0_i32 = arith.constant 0 : i32
    %c0_i32_0 = arith.constant 0 : i32
    %c0_i32_1 = arith.constant 0 : i32
    return %arg0, %c0_i32, %c0_i32_0 : i32, i32, i32
  }
}

</mosaic_0001>

<bundles_post_ra>
// kernel: tpu_custom_call.1
= control target key start
LH: loop header
LB: loop body
LE: loop exit
PB: predicated region body
PF: predicated region fallthrough
CT: control target
= control target key end

     0   :  { %s12637_s0 = inlined_call_operand.vmem [shape: f32[32,1,12], index: 0, kind: input, shape index: {}]   ;;  %s12638_s1 = inlined_call_operand.vmem [shape: f32[256,4], index: 1, kind: input, shape index: {}]   ;;  %s12639_s2 = inlined_call_operand.hbm [shape: f32[8,128], index: 2, kind: input, shape index: {}]   ;;  %s12640_s3 = inlined_call_operand.hbm [shape: f32[12,128], index: 3, kind: input, shape index: {}]   ;;  %s12641_s4 = inlined_call_operand.hbm [shape: f32[4,128], index: 4, kind: input, shape index: {}]   ;;  %s12642_s5 = inlined_call_operand.hbm [shape: f32[1,128], index: 5, kind: input, shape index: {}]   ;;  %s12643_s6 = inlined_call_operand.vmem [shape: bf16[128,384], index: 6, kind: input, shape index: {}]   ;;  %s12644_s7 = inlined_call_operand.hbm [shape: f32[1,384], index: 7, kind: input, shape index: {}]   ;;  %s12645_s8 = inlined_call_operand.hbm [shape: bf16[128,128], index: 8, kind: input, shape index: {}]   ;;  %s12646_s9 = inlined_call_operand.hbm [shape: f32[1,128], index: 9, kind: input, shape index: {}]   ;;  %s12647_s10 = inlined_call_operand.vmem [shape: f32[1,128], index: 10, kind: input, shape index: {}]   ;;  %s12648_s11 = inlined_call_operand.vmem [shape: f32[1,128], index: 11, kind: input, shape index: {}]   ;;  %s12649_s12 = inlined_call_operand.vmem [shape: f32[1,128], index: 12, kind: input, shape index: {}]   ;;  %s12650_s13 = inlined_call_operand.vmem [shape: f32[1,128], index: 13, kind: input, shape index: {}]   ;;  %s12651_s14 = inlined_call_operand.vmem [shape: bf16[128,256], index: 14, kind: input, shape index: {}]   ;;  %s12652_s15 = inlined_call_operand.vmem [shape: f32[1,256], index: 15, kind: input, shape index: {}]   ;;  %s12653_s16 = inlined_call_operand.hbm [shape: bf16[256,128], index: 16, kind: input, shape index: {}]   ;;  %s12654_s17 = inlined_call_operand.vmem [shape: f32[1,128], index: 17, kind: input, shape index: {}]   ;;  %s12655_s18 = inlined_call_operand.hbm [shape: f32[128,128], index: 18, kind: input, shape index: {}]   ;;  %s12656_s19 = inlined_call_operand.vmem [shape: f32[1,128], index: 19, kind: input, shape index: {}]   ;;  %s12657_s20 = inlined_call_operand.hbm [shape: f32[2,1,128], index: 20, kind: output, shape index: {}]  }
   0x1   :  { %12712 = sst [smem:[#allocation58_spill]] %s12637_s0 }
   0x2   :  { %12713 = sst [smem:[#allocation59_spill]] %s12638_s1 }
   0x3   :  { %12714 = sst [smem:[#allocation60_spill]] %s12639_s2 }
   0x4   :  { %12715 = sst [smem:[#allocation61_spill]] %s12640_s3 }
   0x5   :  { %12716 = sst [smem:[#allocation62_spill]] %s12641_s4 }
   0x6   :  { %12717 = sst [smem:[#allocation63_spill]] %s12656_s19 }
   0x7   :  { %12718 = sst [smem:[#allocation64_spill]] %s12657_s20 }
   0x8   :  { %25 = vsyncpa [#allocation3], 0 }
   0x9   :  { %26 = vsyncpa [#allocation6], 0 }
   0xa   :  { %27 = vsyncpa [#allocation9], 0 }
   0xb   :  { %28 = vsyncpa [#allocation12], 0 }
   0xc   :  { %29 = vsyncpa [#allocation15], 0 }
   0xd   :  { %30 = vsyncpa [#allocation4], 0 }
   0xe   :  { %32 = vsyncpa [#allocation4 + $0x1], 0  ;;  %s9758_s1 = smov 0   ;;  %s9760_s22 = smov 0  }
   0xf   :  { %s9762_s23 = smov 0   ;;  %s9764_s24 = smov 0  }
  0x10 LB: > { %12719 = sst [smem:[#allocation24_spill]] %s9620_s1  ;;  %s9779_s2 = sadd.s32 4294967295, %s9632_s24   ;;  %s9632_s24 = sphi %s9764_s24, %s12851_s24   ;;  %s9628_s23 = sphi %s9762_s23, %s12853_s23   ;;  %s9624_s22 = sphi %s9760_s22, %s12855_s22   ;;  %s9620_s1 = sphi %s9758_s1, %s12854_s1  }
  0x11   : > { %12720 = sst [smem:[#allocation25_spill]] %s9628_s23  ;;  %s7766_s25 = sadd.s32 4294967294, %s9632_s24  }
  0x12   : > { %12721 = sst [smem:[#allocation26_spill]] %s9632_s24  ;;  %s9783_s3 = sadd.s32 1, %s9632_s24  }
  0x13   : > { %12722 = sst [smem:[#allocation27_spill]] %s9783_s3  ;;  %s475_s26 = sadd.s32 1, %s9628_s23 }
  0x14   : > { %s472_s27 = ssub.s32 %s9632_s24, %s9783_s3  ;;  %p485_p0 = scmp.ne.s32.totalorder %s9628_s23, %s9624_s22 }
  0x15   : > { %p473_p1 = scmp.eq.s32.totalorder %s472_s27, 0  ;;  %p486_p2 = scmp.eq.s32.totalorder %s9779_s2, 1 }
  0x16   : > { %p491_p3 = scmp.ne.s32.totalorder %s9624_s22, %s9620_s1  ;;  %p492_p4 = scmp.eq.s32.totalorder %s7766_s25, 1 }
  0x17   : > { %s9794_s28 = scalar_select %p473_p1, %s9628_s23, %s475_s26  }
  0x18   : > { %p9796_p5 = por %p486_p2, %p485_p0  ;;  %p9800_p6 = por %p492_p4, %p491_p3 }
  0x19   : > { %12723 = sst [smem:[#allocation28_spill]] %s9794_s28  ;;  %p7767_p7 = scmp.ge.s32.totalorder %s9632_s24, 1 }
  0x1a   : > { %s12724_s4 = scalar_select %p9796_p5, 1, 0 }
  0x1b   : > { %s12726_s29 = scalar_select %p9800_p6, 1, 0 }
  0x1c   : > { %12725 = sst [smem:[#allocation29_spill]] %s12724_s4  ;;  %p499_p8 = scmp.lt.s32.totalorder %s9632_s24, 3 }
  0x1d   : > { %12727 = sst [smem:[#allocation30_spill]] %s12726_s29  ;;  %p12667_p9 = scmp.eq.s32.totalorder %s9779_s2, 0 }
  0x1e   : > { %p9807_p10 = pnand %p7767_p7, %p499_p8  ;;  %s9634_s0 = smov [#allocation5]  }
  0x1f   : > { %s522_s21 = sshll.u32 %s9634_s0, 4  ;;  %s9635_s26 = smov [#allocation8]   ;;  %s523_s21 = int_to_ptr.vmem [resolvable:$true] %s522_s21 }
  0x20   : > { %s12728_s30 = scalar_select %p9807_p10, 1, 0 }
  0x21   : > { %p8777_p11 = pneg %p9807_p10  ;;  %s547_s27 = sshll.u32 %s9635_s26, 4  ;;  %s548_s27 = int_to_ptr.vmem [resolvable:$true] %s547_s27 }
  0x22   : > { %s9636_s28 = smov [#allocation11]   ;;  %s9329_s0 = scalar_lea.vmem %s523_s21, 256 }
  0x23   : > { %p9815_p12 = pnand %p12667_p9, %p8777_p11  ;;  %s571_s23 = sshll.u32 %s9636_s28, 4  ;;  %s572_s23 = int_to_ptr.vmem [resolvable:$true] %s571_s23 }
  0x24   : > { %p9330_p0 = scmp.ne.s32.totalorder %s523_s21, %s9329_s0  ;;  %p9337_p3 = scmp.lt.s32.totalorder %s523_s21, %s523_s21 }
  0x25   : > { %p9821_p13 = pneg %p9815_p12  ;;  %p9338_p4 = scmp.lt.s32.totalorder %s9329_s0, %s9329_s0 }
  0x27   : > { %p9332_p1 = pnand %p9330_p0, %p9821_p13  ;;  %p9339_p7 = por %p9338_p4, %p9337_p3 }
  0x29   : > { %p9333_p2 = pneg %p9332_p1 }
  0x2b   : > { %p9340_p8 = pnand %p9339_p7, %p9333_p2 }
  0x2d   : > { %9343 = shalt.err (!%p9340_p8)
}
  0x2e   : > { %s12670_s26 = smov 128   ;;  %s9638_s28 = smov 8  }
  0x2f   : > { %s12731_s24 = sld [smem:[#allocation61_spill]]  ;;  %s9355_s20 = scalar_lea.vmem %s548_s27, 16 }
  0x30   : > { %p9356_p11 = scmp.ne.s32.totalorder %s548_s27, %s9355_s20  ;;  %s9362_s0 = scalar_lea.vmem %s548_s27, 32 }
  0x31   : > { %p9363_p2 = scmp.lt.s32.totalorder %s548_s27, %s548_s27  ;;  %p9364_p3 = scmp.lt.s32.totalorder %s9362_s0, %s9355_s20 }
  0x32   : > { %p9358_p0 = pnand %p9356_p11, %p9821_p13 }
  0x33   : > { %p9365_p4 = por %p9364_p3, %p9363_p2 }
  0x34   : > { %p9359_p1 = pneg %p9358_p0 }
  0x35   : > { %8783 = dma.hbm_to_vmem [thread:$0]  (!%p9815_p12), %s12731_s24, 256, %s523_s21, [#allocation6], %s12670_s26, %s12670_s26, %s9638_s28  }
  0x36   : > { %p9366_p7 = pnand %p9365_p4, %p9359_p1 }
  0x38   : > { %9369 = shalt.err (!%p9366_p7)
}
  0x39   : > { %8789 = dma.hbm_to_vmem [thread:$0]  (!%p9815_p12), %s12642_s5, 16, %s548_s27, [#allocation9]  }
  0x3a   : > { %s9381_s1 = scalar_lea.vmem %s572_s23, 1024  ;;  %p9389_p0 = scmp.lt.s32.totalorder %s572_s23, %s572_s23 }
  0x3b   : > { %p9382_p8 = scmp.ne.s32.totalorder %s572_s23, %s9381_s1  ;;  %p9390_p6 = scmp.lt.s32.totalorder %s9381_s1, %s9381_s1 }
  0x3d   : > { %p9384_p9 = pnand %p9382_p8, %p9821_p13  ;;  %p9391_p5 = por %p9390_p6, %p9389_p0 }
  0x3f   : > { %p9385_p11 = pneg %p9384_p9 }
  0x41   : > { %p9392_p10 = pnand %p9391_p5, %p9385_p11 }
  0x43   : > { %9395 = shalt.err (!%p9392_p10)
}
  0x44   : > { %s9639_s20 = smov 64   ;;  %s9640_s24 = smov 4  }
  0x45   : > { %8795 = dma.hbm_to_vmem [thread:$0]  (!%p9815_p12), %s12645_s8, 1024, %s572_s23, [#allocation12], %s9639_s20, %s9639_s20, %s9640_s24  }
  0x46   : > { %s9641_s4 = smov [#allocation14]   ;;  %s9642_s27 = smov [#allocation2]  }
  0x47   : > { %s613_s21 = sshll.u32 %s9641_s4, 4  ;;  %s512_s0 = sshll.u32 %s9642_s27, 4  ;;  %s614_s21 = int_to_ptr.vmem [resolvable:$true] %s613_s21  ;;  %s513_s0 = int_to_ptr.vmem [resolvable:$true] %s512_s0 }
  0x48   : > { %s9407_s26 = scalar_lea.vmem %s614_s21, 2048  ;;  %p9415_p10 = scmp.lt.s32.totalorder %s614_s21, %s614_s21 }
  0x49   : > { %p9408_p9 = scmp.ne.s32.totalorder %s614_s21, %s9407_s26  ;;  %p9416_p1 = scmp.lt.s32.totalorder %s9407_s26, %s9407_s26 }
  0x4b   : > { %p9410_p6 = pnand %p9408_p9, %p9821_p13  ;;  %p9417_p2 = por %p9416_p1, %p9415_p10 }
  0x4d   : > { %p9411_p5 = pneg %p9410_p6 }
  0x4f   : > { %p9418_p3 = pnand %p9417_p2, %p9411_p5 }
  0x51   : > { %9421 = shalt.err (!%p9418_p3)
}
  0x52   : > { %8801 = dma.hbm_to_vmem [thread:$0]  (!%p9815_p12), %s12653_s16, 2048, %s614_s21, [#allocation15], %s9639_s20, %s9639_s20, %s9640_s24  }
  0x53   : > { %s9433_s23 = scalar_lea.vmem %s513_s0, 128  ;;  %p9441_p11 = scmp.lt.s32.totalorder %s513_s0, %s513_s0 }
  0x54   : > { %p9434_p4 = scmp.ne.s32.totalorder %s513_s0, %s9433_s23  ;;  %p9442_p0 = scmp.lt.s32.totalorder %s9433_s23, %s9433_s23 }
  0x56   : > { %p9436_p7 = pnand %p9434_p4, %p9821_p13  ;;  %p9443_p9 = por %p9442_p0, %p9441_p11 }
  0x58   : > { %p9437_p8 = pneg %p9436_p7 }
  0x5a   : > { %p9444_p6 = pnand %p9443_p9, %p9437_p8 }
  0x5c   : > { %9447 = shalt.err (!%p9444_p6)
}
  0x5d   : > { %s12732_s4 = sld [smem:[#allocation60_spill]]  ;;  %s9643_s27 = smov [#allocation7]  }
  0x5e   : > { %s536_s20 = sshll.u32 %s9643_s27, 4  ;;  %s9644_s24 = smov [#allocation10]   ;;  %s537_s20 = int_to_ptr.vmem [resolvable:$true] %s536_s20 }
  0x5f   : > { %s561_s21 = sshll.u32 %s9644_s24, 4  ;;  %s9459_s1 = scalar_lea.vmem %s537_s20, 64  ;;  %s562_s21 = int_to_ptr.vmem [resolvable:$true] %s561_s21 }
  0x60   : > { %p9460_p5 = scmp.ne.s32.totalorder %s537_s20, %s9459_s1  ;;  %p9467_p2 = scmp.lt.s32.totalorder %s537_s20, %s537_s20 }
  0x61   : > { %p9468_p3 = scmp.lt.s32.totalorder %s9459_s1, %s9459_s1 }
  0x62   : > { %p9462_p10 = pnand %p9460_p5, %p9821_p13 }
  0x63   : > { %8780 = dma.hbm_to_vmem [thread:$0]  (!%p9815_p12), %s12732_s4, 128, %s513_s0, [#allocation3]  }
  0x64   : > { %p9463_p1 = pneg %p9462_p10  ;;  %p9469_p4 = por %p9468_p3, %p9467_p2 }
  0x66   : > { %p9470_p7 = pnand %p9469_p4, %p9463_p1 }
  0x68   : > { %9473 = shalt.err (!%p9470_p7)
}
  0x69   : > { %s12733_s0 = sld [smem:[#allocation62_spill]]  ;;  %s9485_s26 = scalar_lea.vmem %s562_s21, 48 }
  0x6a   : > { %p9486_p8 = scmp.ne.s32.totalorder %s562_s21, %s9485_s26  ;;  %s9492_s19 = scalar_lea.vmem %s562_s21, 64 }
  0x6b   : > { %p9493_p9 = scmp.lt.s32.totalorder %s562_s21, %s562_s21  ;;  %p9494_p6 = scmp.lt.s32.totalorder %s9492_s19, %s9485_s26 }
  0x6c   : > { %p9488_p11 = pnand %p9486_p8, %p9821_p13 }
  0x6d   : > { %p9495_p5 = por %p9494_p6, %p9493_p9 }
  0x6e   : > { %p9489_p0 = pneg %p9488_p11 }
  0x6f   : > { %8786 = dma.hbm_to_vmem [thread:$0]  (!%p9815_p12), %s12733_s0, 64, %s537_s20, [#allocation6]  }
  0x70   : > { %p9496_p10 = pnand %p9495_p5, %p9489_p0 }
  0x72   : > { %9499 = shalt.err (!%p9496_p10)
}
  0x73   : > { %8792 = dma.hbm_to_vmem [thread:$0]  (!%p9815_p12), %s12644_s7, 48, %s562_s21, [#allocation9]  }
  0x74   : > { %s9645_s20 = smov [#allocation13]   ;;  %s9646_s1 = smov [#allocation16]  }
  0x75   : > { %s585_s24 = sshll.u32 %s9645_s20, 4  ;;  %s629_s29 = sshll.u32 %s9646_s1, 4  ;;  %s586_s24 = int_to_ptr.vmem [resolvable:$true] %s585_s24  ;;  %s630_s29 = int_to_ptr.vmem [resolvable:$true] %s629_s29 }
  0x76   : > { %s9511_s23 = scalar_lea.vmem %s586_s24, 16  ;;  %s9518_s0 = scalar_lea.vmem %s586_s24, 32 }
  0x77   : > { %p9512_p1 = scmp.ne.s32.totalorder %s586_s24, %s9511_s23  ;;  %p9519_p4 = scmp.lt.s32.totalorder %s586_s24, %s586_s24 }
  0x78   : > { %p9520_p7 = scmp.lt.s32.totalorder %s9518_s0, %s9511_s23 }
  0x79   : > { %p9514_p2 = pnand %p9512_p1, %p9821_p13 }
  0x7a   : > { %p9521_p8 = por %p9520_p7, %p9519_p4 }
  0x7b   : > { %p9515_p3 = pneg %p9514_p2 }
  0x7d   : > { %p9522_p11 = pnand %p9521_p8, %p9515_p3 }
  0x7f   : > { %9525 = shalt.err (!%p9522_p11)
}
  0x80   : > { %8798 = dma.hbm_to_vmem [thread:$0]  (!%p9815_p12), %s12646_s9, 16, %s586_s24, [#allocation12]  }
  0x81   : > { %s9537_s19 = scalar_lea.vmem %s630_s29, 2048  ;;  %p9545_p5 = scmp.lt.s32.totalorder %s630_s29, %s630_s29 }
  0x82   : > { %p9538_p0 = scmp.ne.s32.totalorder %s630_s29, %s9537_s19  ;;  %p9546_p10 = scmp.lt.s32.totalorder %s9537_s19, %s9537_s19 }
  0x84   : > { %p9540_p9 = pnand %p9538_p0, %p9821_p13  ;;  %p9547_p1 = por %p9546_p10, %p9545_p5 }
  0x86   : > { %p9541_p6 = pneg %p9540_p9 }
  0x88   : > { %p9548_p2 = pnand %p9547_p1, %p9541_p6 }
  0x8a   : > { %9551 = shalt.err (!%p9548_p2)
}
  0x8b   : > { %s12734_s4 = smov 128   ;;  %p12735_p3 = scmp.ne.s32.totalorder %s12728_s30, 0 }
  0x8c   : > { %8804 = dma.hbm_to_vmem [thread:$0]  (!%p9815_p12), %s12655_s18, 2048, %s630_s29, [#allocation15], %s12734_s4, %s12734_s4, %s9638_s28  }
  0x8d   : > { %665 = sbr.rel (%p12735_p3) target bundleno = 3190 (0xc76), region = 100 }
  0x92   : > { %p12736_p13 = scmp.eq.s32.totalorder %s9779_s2, 0 }
  0x94   : > { %9595 = dma.done.wait (%p12736_p13), [#allocation3], 128   ;;  %p12737_p4 = pmov %p12736_p13 }
  0x96   : > { %9597 = vsyncadd (%p12737_p4), [#allocation3], 4294967168  ;;  %p12738_p7 = pmov %p12737_p4 }
  0x97   : > { %p12739_p8 = pmov %p12737_p4 }
  0x98   : > { %9599 = dma.done.wait (%p12738_p7), [#allocation6], 320  }
  0x99   : > { %9601 = vsyncadd (%p12739_p8), [#allocation6], 4294966976  ;;  %p12740_p11 = pmov %p12737_p4 }
  0x9a   : > { %p12741_p12 = pmov %p12737_p4 }
  0x9b   : > { %9603 = dma.done.wait (%p12740_p11), [#allocation9], 64  }
  0x9c   : > { %9605 = vsyncadd (%p12741_p12), [#allocation9], 4294967232  ;;  %p12742_p0 = pmov %p12737_p4 }
  0x9e   : > { %9607 = dma.done.wait (%p12742_p0), [#allocation12], 1040   ;;  %p12743_p9 = pmov %p12742_p0 }
  0x9f   : > { %p12744_p6 = pmov %p12742_p0 }
  0xa0   : > { %9609 = vsyncadd (%p12743_p9), [#allocation12], 4294966256 }
  0xa1   : > { %9611 = dma.done.wait (%p12744_p6), [#allocation15], 4096   ;;  %p12745_p5 = pmov %p12742_p0 }
  0xa2   : > { %s9917_s3 = sshll.u32 %s9779_s2, 4  ;;  %v1033_v0 = vlaneseq  ;;  %v9647_v1 = vmov 1966171168   ;;  %vm836_vm0 = vcmask 1043456   ;;  %vm787_vm1 = vcmask 31744   ;;  %s12747_s1 = sld [smem:[#allocation59_spill]] }
  0xa3   : > { %9613 = vsyncadd (%p12745_p5), [#allocation15], 4294963200  ;;  %p759_p10 = scmp.lt.s32.totalorder %s9917_s3, 31  ;;  %v1031_v2 = vunpack.c.l.s4 %v9647_v1  ;;  %v786_v5 = vld [vmem:[#allocation7] sm:$0xf]  ;;  %s12748_s0 = sld [smem:[#allocation58_spill]] }
  0xa4   : > { %v9922_v4 = vshrl.u32 %v1033_v0, 7  ;;  %8258 = vmatprep.subr.msk.mxu0 %vm836_vm0, %v786_v5  ;;  %v1002_v9 = vld [vmem:[#allocation5 + $0x8] sm:$0xf]  ;;  %v1001_v11 = vld [vmem:[#allocation5] sm:$0xff]  ;;  %vm1124_vm2 = vcmask 97280   ;;  %vm9650_vm3 = vmmov 0  }
  0xa5   : > { %s760_s30 = scalar_select %p759_p10, %s9917_s3, 31  ;;  %v1032_v3 = vunpack.c.0.s8 %v1031_v2  ;;  %8259 = vmatpush3.msk.msra.mxu0 %vm836_vm0, %v786_v5  ;;  %8284 = vmatprep.subr.msk.mxu1 %vm836_vm0, %v1002_v9  ;;  %v8918_v55 = vld [vmem:[%s12643_s6 + $0xa8] ss:$12 sps:$4 sm:$0xff]   ;;  %v8920_v56 = vld [vmem:[%s12643_s6 + $0xac] ss:$12 sps:$4 sm:$0xff]   ;;  %vm2045_vm4 = vcmask 523264  }
  0xa6   : > { %12746 = vst [vmem:[#allocation31_spill] sm:$0xff] %v9922_v4  ;;  %8285 = vmatpush3.msk.msra.mxu1 %vm836_vm0, %v1002_v9  ;;  %v8921_v59 = vld [vmem:[%s12643_s6 + $0xb0] ss:$12 sps:$4 sm:$0xff]   ;;  %1605 = vmatprep.subr.bf16.mxu0 %v8920_v56  ;;  %v8924_v9 = vld [vmem:[%s12643_s6 + $0x94] ss:$12 sps:$4 sm:$0xff]   ;;  %s9651_s27 = smov 64  }
  0xa7   : > { %s7790_s25 = sshll.u32 %s760_s30, 3  ;;  %v9943_v12 = vsub.s32 %v1032_v3, %v9922_v4  ;;  %8286 = vmatprep.subr.mxu1 %v1001_v11  ;;  %vm3582_vm6 = vcmask 64512   ;;  %s756_s20 = sand.u32 1, %s9624_s22  }
  0xa8   : > { %s9927_s29 = scalar_lea.vmem %s12747_s1, %s7790_s25  ;;  %8287 = vmatpush3.msra.mxu1 %v1001_v11  ;;  %v8926_v11 = vld [vmem:[%s12643_s6 + $0x78] ss:$12 sps:$4 sm:$0xff]   ;;  %s12844_s28 = sld [smem:[#allocation63_spill]] }
  0xa9   : > { %s9932_s26 = scalar_lea.vmem %s12748_s0, %s760_s30  ;;  %v770_v6 = vld [vmem:[%s9927_s29] sm:$0xff]  ;;  %v771_v7 = vld [vmem:[%s9927_s29 + $0x8] sm:$0xff]  ;;  %v772_v8 = vld [vmem:[%s9927_s29 + $0x10] sm:$0xff]  ;;  %8291 = vmatprep.subr.bf16.mxu1 %v8921_v59  ;;  %s757_s24 = scalar_lea.vmem [#allocation17], %s756_s20 }
  0xaa   : > { %8260 = vmatprep.mubr.msk.f32.mxu0 %vm787_vm1, %v770_v6  ;;  %v773_v10 = vld [vmem:[%s9927_s29 + $0x18] sm:$0xff]  ;;  %v774_v13 = vld [vmem:[%s9927_s29 + $0x20] sm:$0xff]  ;;  %v993_v25 = vld [vmem:[%s9932_s26 + $0x8] sm:$0x1]  ;;  %s7614_s1 = sshll.u32 %s757_s24, 4  ;;  %s9652_s19 = smov [#allocation17]   ;;  %s7615_s1 = int_to_ptr.vmem [resolvable:$true] %s7614_s1 }
  0xab   : > { %8261 = vmatmul.mubr.msk.f32.vlgmr.msra.gmra.mxu0 %vm787_vm1, %v771_v7  ;;  %v985_v14 = vld [vmem:[%s9932_s26] sm:$0x1]  ;;  %v986_v15 = vld [vmem:[%s9932_s26 + $0x1] sm:$0x1]  ;;  %v987_v16 = vld [vmem:[%s9932_s26 + $0x2] sm:$0x1] }
  0xac   : > { %8263 = vmatprep.mubr.msk.f32.mxu0 %vm787_vm1, %v772_v8  ;;  %v988_v17 = vld [vmem:[%s9932_s26 + $0x3] sm:$0x1]  ;;  %v989_v18 = vld [vmem:[%s9932_s26 + $0x4] sm:$0x1]  ;;  %v990_v19 = vld [vmem:[%s9932_s26 + $0x5] sm:$0x1]  ;;  %v1026_v20 = vcombine.low %v985_v14, %v986_v15  ;;  %1606 = vmatpush1.bf16.msra.mxu0 %v8918_v55 }
  0xad   : > { %v991_v21 = vld [vmem:[%s9932_s26 + $0x6] sm:$0x1]  ;;  %v992_v22 = vld [vmem:[%s9932_s26 + $0x7] sm:$0x1]  ;;  %v1027_v23 = vcombine.low %v987_v16, %v988_v17  ;;  %v1028_v24 = vcombine.low %v989_v18, %v990_v19  ;;  %v994_v28 = vld [vmem:[%s9932_s26 + $0x9] sm:$0x1]  ;;  %1607 = vmatprep.subr.bf16.mxu0 %v8924_v9 }
  0xae   : > { %v1029_v26 = vcombine.low %v991_v21, %v992_v22  ;;  %v1036_v27 = vrot.slane %v1026_v20, %v9943_v12  ;;  %v995_v29 = vld [vmem:[%s9932_s26 + $0xa] sm:$0x1]  ;;  %v996_v30 = vld [vmem:[%s9932_s26 + $0xb] sm:$0x1]  ;;  %v997_v33 = vld [vmem:[%s9932_s26 + $0xc] sm:$0x1]  ;;  %v1075_v36 = vcombine.low %v993_v25, %v994_v28 }
  0xaf   : > { %8264 = vmatmul.mubr.msk.f32.gmra.mxu0 %vm787_vm1, %v773_v10  ;;  %v1043_v31 = vrot.slane %v1027_v23, %v9943_v12  ;;  %v1050_v32 = vrot.slane %v1028_v24, %v9943_v12  ;;  %v998_v34 = vld [vmem:[%s9932_s26 + $0xd] sm:$0x1]  ;;  %v999_v35 = vld [vmem:[%s9932_s26 + $0xe] sm:$0x1]  ;;  %v1076_v37 = vcombine.low %v995_v29, %v996_v30  ;;  %v1000_v40 = vld [vmem:[%s9932_s26 + $0xf] sm:$0x1] }
  0xb0   : > { %8266 = vmatprep.mubr.msk.f32.mxu0 %vm787_vm1, %v774_v13  ;;  %v775_v38 = vld [vmem:[%s9927_s29 + $0x28] sm:$0xff]  ;;  %v1057_v39 = vrot.slane %v1029_v26, %v9943_v12  ;;  %v1077_v41 = vcombine.low %v997_v33, %v998_v34  ;;  %v1078_v43 = vcombine.low %v999_v35, %v1000_v40  ;;  %v1085_v44 = vrot.slane %v1075_v36, %v9943_v12  ;;  %v776_v46 = vld [vmem:[%s9927_s29 + $0x30] sm:$0xff]  ;;  %v777_v52 = vld [vmem:[%s9927_s29 + $0x38] sm:$0xff]  ;;  %s7602_s26 = scalar_lea.sflag [#allocation4], %s756_s20  ;;  %s9552_s21 = scalar_lea.vmem %s7615_s1, 16 }
  0xb1   : > { %v1058_v42 = vcombine.low %v1036_v27, %v1043_v31  ;;  %v1092_v45 = vrot.slane %v1076_v37, %v9943_v12  ;;  %v778_v53 = vld [vmem:[%s9927_s29 + $0x40] sm:$0xff]  ;;  %v779_v61 = vld [vmem:[%s9927_s29 + $0x48] sm:$0xff]  ;;  %v780_v63 = vld [vmem:[%s9927_s29 + $0x50] sm:$0xff]  ;;  %v12672_v30 = vmov 0   ;;  %p9553_p1 = scmp.ne.s32.totalorder %s7615_s1, %s9552_s21  ;;  %s9556_s4 = sshll.u32 %s9652_s19, 4  ;;  %s9557_s4 = int_to_ptr.vmem [resolvable:$false] %s9556_s4 }
  0xb2   : > { %v1059_v47 = vcombine.low %v1050_v32, %v1057_v39  ;;  %v1099_v48 = vrot.slane %v1077_v41, %v9943_v12  ;;  %v1106_v50 = vrot.slane %v1078_v43, %v9943_v12  ;;  %v781_v2 = vld [vmem:[%s9927_s29 + $0x58] sm:$0xff]  ;;  %v782_v3 = vld [vmem:[%s9927_s29 + $0x60] sm:$0xff]  ;;  %v783_v5 = vld [vmem:[%s9927_s29 + $0x68] sm:$0xff]  ;;  %s9558_s30 = scalar_lea.vmem %s9557_s4, 32  ;;  %p9559_p4 = scmp.lt.s32.totalorder %s7615_s1, %s9557_s4 }
  0xb3   : > { %8267 = vmatmul.mubr.msk.f32.gmra.mxu0 %vm787_vm1, %v775_v38  ;;  %v1066_v49 = vrot.slane %v1058_v42, %v9943_v12  ;;  %v1107_v51 = vcombine.low %v1085_v44, %v1092_v45  ;;  %v784_v6 = vld [vmem:[%s9927_s29 + $0x70] sm:$0xff]  ;;  %v785_v7 = vld [vmem:[%s9927_s29 + $0x78] sm:$0xff]  ;;  %v8929_v14 = vld [vmem:[%s12643_s6 + $0x80] ss:$12 sps:$4 sm:$0xff]   ;;  %s12845_s29 = sld [smem:[#allocation64_spill]]  ;;  %p9560_p7 = scmp.lt.s32.totalorder %s9558_s30, %s9552_s21 }
  0xb4   : > { %v1073_v54 = vrot.slane %v1059_v47, %v9943_v12  ;;  %8269 = vmatprep.mubr.msk.f32.mxu0 %vm787_vm1, %v776_v46  ;;  %v1108_v57 = vcombine.low %v1099_v48, %v1106_v50  ;;  %v8922_v8 = vld [vmem:[%s12643_s6 + $0x90] ss:$12 sps:$4 sm:$0xff]   ;;  %v8925_v10 = vld [vmem:[%s12643_s6 + $0x98] ss:$12 sps:$4 sm:$0xff]   ;;  %v8930_v15 = vld [vmem:[%s12643_s6 + $0x60] ss:$12 sps:$4 sm:$0xff]  }
  0xb5   : > { %v1115_v58 = vrot.slane %v1107_v51, %v9943_v12  ;;  %1608 = vmatpush1.bf16.msra.mxu0 %v8922_v8  ;;  %v8928_v13 = vld [vmem:[%s12643_s6 + $0x7c] ss:$12 sps:$4 sm:$0xff]   ;;  %v8932_v16 = vld [vmem:[%s12643_s6 + $0x64] ss:$12 sps:$4 sm:$0xff]   ;;  %v8936_v18 = vld [vmem:[%s12643_s6 + $0x4c] ss:$12 sps:$4 sm:$0xff]   ;;  %p9561_p8 = por %p9560_p7, %p9559_p4 }
  0xb6   : > { %v1074_v60 = vcombine.low %v1066_v49, %v1073_v54  ;;  %v1122_v62 = vrot.slane %v1108_v57, %v9943_v12  ;;  %1609 = vmatprep.subr.bf16.mxu0 %v8928_v13  ;;  %v8933_v17 = vld [vmem:[%s12643_s6 + $0x68] ss:$12 sps:$4 sm:$0xff]   ;;  %v8937_v20 = vld [vmem:[%s12643_s6 + $0x50] ss:$12 sps:$4 sm:$0xff]   ;;  %v8941_v23 = vld [vmem:[%s12643_s6 + $0x38] ss:$12 sps:$4 sm:$0xff]  }
  0xb7   : > { %8270 = vmatmul.mubr.msk.f32.gmra.mxu0 %vm787_vm1, %v777_v52  ;;  %v8934_v19 = vld [vmem:[%s12643_s6 + $0x48] ss:$12 sps:$4 sm:$0xff]   ;;  %v8938_v22 = vld [vmem:[%s12643_s6 + $0x30] ss:$12 sps:$4 sm:$0xff]   ;;  %v8942_v25 = vld [vmem:[%s12643_s6 + $0x18] ss:$12 sps:$4 sm:$0xff]  }
  0xb8   : > { %8288 = vmatprep.mubr.msk.f32.mxu1 %vm1124_vm2, %v1074_v60  ;;  %8272 = vmatprep.mubr.msk.f32.mxu0 %vm787_vm1, %v778_v53  ;;  %v1123_v1 = vcombine.low %v1115_v58, %v1122_v62  ;;  %v8940_v21 = vld [vmem:[%s12643_s6 + $0x34] ss:$12 sps:$4 sm:$0xff]   ;;  %v8944_v24 = vld [vmem:[%s12643_s6 + $0x1c] ss:$12 sps:$4 sm:$0xff]   ;;  %v8948_v27 = vld [vmem:[%s12643_s6 + $0x4] ss:$12 sps:$4 sm:$0xff]  }
  0xb9   : > { %1610 = vmatpush1.bf16.msra.mxu0 %v8926_v11  ;;  %v8945_v26 = vld [vmem:[%s12643_s6 + $0x20] ss:$12 sps:$4 sm:$0xff]   ;;  %v8949_v29 = vld [vmem:[%s12643_s6 + $0x8] ss:$12 sps:$4 sm:$0xff]   ;;  %v7808_v38 = vld [vmem:[#allocation8] ss:$0 sm:$0xff]  ;;  %s7612_s0 = scalar_lea.hbm %s12845_s29, %s9917_s3 }
  0xba   : > { %8289 = vmatmul.mubr.msk.f32.vlgmr.msra.gmra.mxu1 %vm1124_vm2, %v1123_v1  ;;  %1611 = vmatprep.subr.bf16.mxu0 %v8932_v16  ;;  %v8946_v28 = vld [vmem:[%s12643_s6] ss:$12 sps:$4 sm:$0xff]   ;;  %v10080_v49 = vsub.s32 0, %v9922_v4 }
  0xbb   : > { %8273 = vmatmul.mubr.msk.f32.gmra.mxu0 %vm787_vm1, %v779_v61  ;;  %8292 = vmatpush3.bf16.msra.mxu1 %v8921_v59  ;;  %v10086_v60 = vld [vmem:[#allocation2] sm:$0xff] }
  0xbc   : > { %8275 = vmatprep.mubr.msk.f32.mxu0 %vm787_vm1, %v780_v63  ;;  %8293 = vmatprep.subr.bf16.mxu1 %v8925_v10  ;;  %12749 = vst [vmem:[#allocation32_spill] sm:$0xff] %v10080_v49 }
  0xbd   : > { %1612 = vmatpush1.bf16.msra.mxu0 %v8930_v15 }
  0xbe   : > { %1613 = vmatprep.subr.bf16.mxu0 %v8936_v18 }
  0xbf   : > { %8276 = vmatmul.mubr.msk.f32.gmra.mxu0 %vm787_vm1, %v781_v2  ;;  %8294 = vmatpush3.bf16.msra.mxu1 %v8925_v10 }
  0xc0   : > { %8278 = vmatprep.mubr.msk.f32.mxu0 %vm787_vm1, %v782_v3  ;;  %8295 = vmatprep.subr.bf16.mxu1 %v8929_v14 }
  0xc1   : > { %1614 = vmatpush1.bf16.msra.mxu0 %v8934_v19 }
  0xc2   : > { %1615 = vmatprep.subr.bf16.mxu0 %v8940_v21 }
  0xc3   : > { %8279 = vmatmul.mubr.msk.f32.gmra.mxu0 %vm787_vm1, %v783_v5  ;;  %8296 = vmatpush3.bf16.msra.mxu1 %v8929_v14 }
  0xc4   : > { %8281 = vmatprep.mubr.msk.f32.mxu0 %vm787_vm1, %v784_v6  ;;  %8297 = vmatprep.subr.bf16.mxu1 %v8933_v17 }
  0xc5   : > { %1616 = vmatpush1.bf16.msra.mxu0 %v8938_v22 }
  0xc6   : > { %1617 = vmatprep.subr.bf16.mxu0 %v8944_v24 }
  0xc7   : > { %8282 = vmatmul.mubr.msk.f32.gmra.mxu0 %vm787_vm1, %v785_v7  ;;  %8298 = vmatpush3.bf16.msra.mxu1 %v8933_v17 }
  0xc8   : > { %8299 = vmatprep.subr.bf16.mxu1 %v8937_v20  ;;  %1637 = vmatprep.mubr.bf16.mxu0 %v12672_v30 }
  0xc9   : > { %1618 = vmatpush1.bf16.msra.mxu0 %v8942_v25 }
  0xca   : > { %1619 = vmatprep.subr.bf16.mxu0 %v8948_v27 }
  0xcb   : > { %8300 = vmatpush3.bf16.msra.mxu1 %v8937_v20 }
  0xcc   : > { %8301 = vmatprep.subr.bf16.mxu1 %v8941_v23 }
  0xcd   : > { %1620 = vmatpush1.bf16.msra.mxu0 %v8946_v28 }
  0xcf   : > { %8302 = vmatpush3.bf16.msra.mxu1 %v8941_v23 }
  0xd0   : > { %8303 = vmatprep.subr.bf16.mxu1 %v8945_v26 }
  0xd3   : > { %8304 = vmatpush3.bf16.msra.mxu1 %v8945_v26 }
  0xd4   : > { %8305 = vmatprep.subr.bf16.mxu1 %v8949_v29 }
  0xd7   : > { %8306 = vmatpush3.bf16.msra.mxu1 %v8949_v29 }
 0x16b   : > { %v8262_v31 = vpop.f32.mrf.mxu0 }
 0x16d   : > { %v906_v32 = vpop.f32.mrf.mxu0 }
 0x16f   : > { %v8265_v33 = vpop.f32.mrf.mxu0 }
 0x171   : > { %v916_v34 = vpop.f32.mrf.mxu0 }
 0x173   : > { %v8268_v35 = vpop.f32.mrf.mxu0 }
 0x175   : > { %v926_v36 = vpop.f32.mrf.mxu0 }
 0x177   : > { %v8271_v40 = vpop.f32.mrf.mxu0 }
 0x179   : > { %v936_v45 = vpop.f32.mrf.mxu0 }
 0x17a   : > { %v8290_v37 = vpop.f32.mrf.mxu1 }
 0x17b   : > { %v1204_v44 = vadd.f32 %v8290_v37, %v7808_v38  ;;  %v8274_v54 = vpop.f32.mrf.mxu0 }
 0x17c   : > { %v1198_v39 = vpop.f32.mrf.mxu1 }
 0x17d   : > { %v1199_v41 = vadd.f32 %v7808_v38, %v1198_v39  ;;  %v1265_v53 = vrot.slane %v1204_v44, %v9943_v12  ;;  %v946_v1 = vpop.f32.mrf.mxu0  ;;  %v1258_v3 = vcombine.high %v1204_v44, %v1204_v44 }
 0x17f   : > { %v1209_v42 = vcombine.high %v1199_v41, %v1199_v41  ;;  %v1216_v43 = vrot.slane %v1199_v41, %v9943_v12  ;;  %v1273_v62 = vcombine.high %v1265_v53, %v1265_v53  ;;  %v1281_v9 = vrot.slane %v1265_v53, %v9943_v12  ;;  %v8277_v14 = vpop.f32.mrf.mxu0 }
 0x180   : > { %v1272_v17 = vrot.slane %v1258_v3, %v9943_v12 }
 0x181   : > { %v1223_v46 = vrot.slane %v1209_v42, %v9943_v12  ;;  %v1224_v47 = vcombine.high %v1216_v43, %v1216_v43  ;;  %v1232_v48 = vrot.slane %v1216_v43, %v9943_v12  ;;  %v1295_v13 = vrot.slane %v1273_v62, %v9943_v12  ;;  %v956_v23 = vpop.f32.mrf.mxu0 }
 0x182   : > { %v1342_v22 = vrot.slane %v1281_v9, %v10080_v49  ;;  %v1274_v38 = vcombine.high %v1272_v17, %v1272_v17  ;;  %v1303_v42 = vcombine.high %v1281_v9, %v1281_v9  ;;  %v1288_v43 = vrot.slane %v1272_v17, %v9943_v12 }
 0x183   : > { %v1225_v50 = vcombine.high %v1223_v46, %v1223_v46  ;;  %v1246_v51 = vrot.slane %v1224_v47, %v9943_v12  ;;  %v1310_v52 = vrot.slane %v1232_v48, %v10080_v49  ;;  %v1254_v57 = vcombine.high %v1232_v48, %v1232_v48  ;;  %v8280_v37 = vpop.f32.mrf.mxu0 }
 0x184   : > { %v1239_v63 = vrot.slane %v1223_v46, %v9943_v12  ;;  %v1346_v21 = vrot.slane %v1295_v13, %v10080_v49 }
 0x185   : > { %v1314_v55 = vrot.slane %v1246_v51, %v10080_v49  ;;  %v1387_v56 = vadd.f32 %v1310_v52, %v906_v32  ;;  %v1256_v58 = vcombine.high %v1246_v51, %v1246_v51  ;;  %v1253_v61 = vrot.slane %v1225_v50, %v9943_v12  ;;  %v966_v48 = vpop.f32.mrf.mxu0 }
 0x186   : > { %v1318_v6 = vrot.slane %v1254_v57, %v10080_v49  ;;  %v1326_v11 = vrot.slane %v1239_v63, %v10080_v49  ;;  %v1255_v16 = vcombine.high %v1239_v63, %v1239_v63  ;;  %v1350_v51 = vrot.slane %v1303_v42, %v10080_v49 }
 0x187   : > { %v1388_v59 = vadd.f32 %v8262_v31, %v1314_v55  ;;  %v10094_v5 = vadd.f32 %v10086_v60, %v1387_v56  ;;  %v1322_v7 = vrot.slane %v1256_v58, %v10080_v49  ;;  %v1257_v8 = vcombine.high %v1253_v61, %v1253_v61  ;;  %v8283_v58 = vpop.f32.mrf.mxu0 }
 0x188   : > { %v1330_v10 = vrot.slane %v1253_v61, %v10080_v49  ;;  %v1389_v19 = vadd.f32 %v1318_v6, %v916_v34  ;;  %v1391_v24 = vadd.f32 %v1326_v11, %v926_v36  ;;  %v1334_v26 = vrot.slane %v1255_v16, %v10080_v49 }
 0x189   : > { %v10091_v2 = vadd.f32 %v10086_v60, %v1388_v59  ;;  %12751 = vst [vmem:[#allocation34_spill] sm:$0xff] %v10094_v5  ;;  %v1338_v18 = vrot.slane %v1257_v8, %v10080_v49  ;;  %v1390_v20 = vadd.f32 %v8265_v33, %v1322_v7  ;;  %v1305_v33 = vcombine.high %v1295_v13, %v1295_v13  ;;  %v976_v6 = vpop.f32.mrf.mxu0 }
 0x18a   : > { %v1392_v25 = vadd.f32 %v8268_v35, %v1330_v10  ;;  %v10111_v27 = vadd.f32 %v10086_v60, %v1389_v19  ;;  %v10117_v29 = vadd.f32 %v10086_v60, %v1391_v24  ;;  %v1396_v35 = vadd.f32 %v8274_v54, %v1346_v21  ;;  %v1460_v19 = vld [vmem:[#allocation10] sm:$0x7] }
 0x18b   : > { %12750 = vst [vmem:[#allocation33_spill] sm:$0xff] %v10091_v2  ;;  %v1420_v15 = vpack.c.bf16 %v10091_v2, %v10094_v5  ;;  %v10114_v28 = vadd.f32 %v10086_v60, %v1390_v20  ;;  %v1394_v32 = vadd.f32 %v8271_v40, %v1338_v18  ;;  %v1395_v36 = vadd.f32 %v1342_v22, %v946_v1 }
 0x18c   : > { %12752 = vst [vmem:[#allocation35_spill] sm:$0xff] %v10111_v27  ;;  %12754 = vst [vmem:[#allocation37_spill] sm:$0xff] %v10117_v29  ;;  %v10120_v31 = vadd.f32 %v10086_v60, %v1392_v25  ;;  %v1393_v41 = vadd.f32 %v1334_v26, %v936_v45  ;;  %v1354_v44 = vrot.slane %v1305_v33, %v10080_v49  ;;  %v12674_v18 = vmov 0.0  }
 0x18d   : > { %1638 = vmatmul.mubr.bf16.vlgmr.msra.gmra.mxu0 %v1420_v15  ;;  %8307 = vmatprep.mubr.bf16.mxu1 %v1420_v15  ;;  %12753 = vst [vmem:[#allocation36_spill] sm:$0xff] %v10114_v28  ;;  %v1421_v34 = vpack.c.bf16 %v10114_v28, %v10111_v27  ;;  %v10128_v40 = vadd.f32 %v10086_v60, %v1394_v32 }
 0x18e   : > { %1647 = vmatprep.mubr.bf16.mxu0 %v12672_v30  ;;  %12755 = vst [vmem:[#allocation38_spill] sm:$0xff] %v10120_v31  ;;  %v1422_v39 = vpack.c.bf16 %v10120_v31, %v10117_v29  ;;  %v10133_v46 = vadd.f32 %v10086_v60, %v1396_v35  ;;  %v10136_v47 = vadd.f32 %v10086_v60, %v1395_v36 }
 0x18f   : > { %8308 = vmatmul.mubr.bf16.vlgmr.msra.gmra.mxu1 %v1421_v34  ;;  %12756 = vst [vmem:[#allocation39_spill] sm:$0xff] %v10128_v40  ;;  %v1302_v45 = vrot.slane %v1274_v38, %v9943_v12  ;;  %v10140_v50 = vadd.f32 %v10086_v60, %v1393_v41  ;;  %v1358_v52 = vrot.slane %v1288_v43, %v10080_v49 }
 0x190   : > { %8311 = vmatprep.mubr.bf16.mxu1 %v1422_v39  ;;  %12757 = vst [vmem:[#allocation40_spill] sm:$0xff] %v10133_v46  ;;  %12758 = vst [vmem:[#allocation41_spill] sm:$0xff] %v10136_v47  ;;  %v1398_v53 = vadd.f32 %v8277_v14, %v1354_v44  ;;  %v1397_v54 = vadd.f32 %v1350_v51, %v956_v23  ;;  %v1424_v12 = vpack.c.bf16 %v10133_v46, %v10136_v47 }
 0x191   : > { %12759 = vst [vmem:[#allocation42_spill] sm:$0xff] %v10140_v50  ;;  %v1423_v55 = vpack.c.bf16 %v10128_v40, %v10140_v50  ;;  %v1362_v56 = vrot.slane %v1302_v45, %v10080_v49  ;;  %v1399_v57 = vadd.f32 %v1358_v52, %v966_v48  ;;  %v1304_v59 = vcombine.high %v1288_v43, %v1288_v43 }
 0x192   : > { %v10150_v62 = vadd.f32 %v10086_v60, %v1398_v53  ;;  %v10153_v63 = vadd.f32 %v10086_v60, %v1397_v54  ;;  %v1306_v1 = vcombine.high %v1302_v45, %v1302_v45  ;;  %8323 = vmatprep.subr.bf16.mxu1 %v12674_v18  ;;  %8371 = vmatprep.subr.bf16.mxu0 %v12674_v18 }
 0x193   : > { %v1400_v61 = vadd.f32 %v8280_v37, %v1362_v56  ;;  %v10157_v3 = vadd.f32 %v10086_v60, %v1399_v57  ;;  %v1366_v7 = vrot.slane %v1304_v59, %v10080_v49  ;;  %v10188_v20 = vrot.slane %v1460_v19, %v10080_v49 }
 0x194   : > { %12760 = vst [vmem:[#allocation43_spill] sm:$0xff] %v10150_v62  ;;  %12761 = vst [vmem:[#allocation44_spill] sm:$0xff] %v10153_v63  ;;  %v1370_v9 = vrot.slane %v1306_v1, %v10080_v49  ;;  %v1425_v11 = vpack.c.bf16 %v10150_v62, %v10153_v63 }
 0x195   : > { %1648 = vmatmul.mubr.bf16.gmra.mxu0 %v1421_v34  ;;  %12762 = vst [vmem:[#allocation45_spill] sm:$0xff] %v10157_v3  ;;  %v10161_v8 = vadd.f32 %v10086_v60, %v1400_v61  ;;  %v1401_v10 = vadd.f32 %v1366_v7, %v976_v6  ;;  %v1472_v6 = vsub.s32 2, %v9922_v4 }
 0x196   : > { %1657 = vmatprep.mubr.bf16.mxu0 %v12672_v30  ;;  %v1402_v14 = vadd.f32 %v8283_v58, %v1370_v9 }
 0x197   : > { %8312 = vmatmul.mubr.bf16.gmra.mxu1 %v1423_v55  ;;  %12763 = vst [vmem:[#allocation46_spill] sm:$0xff] %v10161_v8  ;;  %v1426_v13 = vpack.c.bf16 %v10161_v8, %v10157_v3  ;;  %v10169_v15 = vadd.f32 %v10086_v60, %v1401_v10 }
 0x198   : > { %8315 = vmatprep.mubr.bf16.mxu1 %v1424_v12  ;;  %v10173_v16 = vadd.f32 %v10086_v60, %v1402_v14  ;;  %v12671_v60 = vsub.s32 1, %v9922_v4 }
 0x199   : > { %12764 = vst [vmem:[#allocation47_spill] sm:$0xff] %v10169_v15 }
 0x19a   : > { %12765 = vst [vmem:[#allocation48_spill] sm:$0xff] %v10173_v16  ;;  %v1427_v17 = vpack.c.bf16 %v10173_v16, %v10169_v15  ;;  %v10192_v21 = vrot.slane %v1460_v19, %v12671_v60 }
 0x19d   : > { %1658 = vmatmul.mubr.bf16.gmra.mxu0 %v1422_v39 }
 0x19e   : > { %1667 = vmatprep.mubr.bf16.mxu0 %v12672_v30 }
 0x19f   : > { %8316 = vmatmul.mubr.bf16.gmra.mxu1 %v1425_v11 }
 0x1a0   : > { %8319 = vmatprep.mubr.bf16.mxu1 %v1426_v13 }
 0x1a5   : > { %1668 = vmatmul.mubr.bf16.gmra.mxu0 %v1423_v55 }
 0x1a6   : > { %1677 = vmatprep.mubr.bf16.mxu0 %v12672_v30 }
 0x1a7   : > { %8320 = vmatmul.mubr.bf16.gmra.mxu1 %v1427_v17 }
 0x1a8   : > { %8325 = vmatprep.mubr.msk.bf16.mxu1 %vm9650_vm3, %v12674_v18 }
 0x1ad   : > { %1678 = vmatmul.mubr.bf16.gmra.mxu0 %v1424_v12 }
 0x1ae   : > { %1687 = vmatprep.mubr.bf16.mxu0 %v12672_v30 }
 0x1b5   : > { %1688 = vmatmul.mubr.bf16.gmra.mxu0 %v1425_v11 }
 0x1b6   : > { %1697 = vmatprep.mubr.bf16.mxu0 %v12672_v30 }
 0x1bd   : > { %1698 = vmatmul.mubr.bf16.gmra.mxu0 %v1426_v13 }
 0x1be   : > { %1707 = vmatprep.mubr.bf16.mxu0 %v12672_v30 }
 0x1c5   : > { %1708 = vmatmul.mubr.bf16.gmra.mxu0 %v1427_v17 }
 0x1c6   : > { %8373 = vmatprep.mubr.msk.bf16.mxu0 %vm9650_vm3, %v12674_v18 }
 0x24d   : > { %v1639_v22 = vpop.f32.mrf.mxu0 }
 0x24e   : > { %v1640_v24 = vadd.f32 %v1639_v22, %v10188_v20 }
 0x24f   : > { %v1641_v23 = vpop.f32.mrf.mxu0  ;;  %v10196_v34 = vpop.f32.mrf.mxu1 }
 0x250   : > { %v1642_v25 = vadd.f32 %v1641_v23, %v10192_v21  ;;  %v10237_v23 = vrot.slane %v1460_v19, %v1472_v6 }
 0x251   : > { %v1643_v26 = vpop.f32.mrf.mxu0  ;;  %v10201_v39 = vpop.f32.mrf.mxu1 }
 0x252   : > { %v7981_v32 = vpack.c.bf16 %v1642_v25, %v1640_v24  ;;  %v1644_v35 = vadd.f32 %v1643_v26, %v10188_v20 }
 0x253   : > { %v1645_v33 = vpop.f32.mrf.mxu0  ;;  %v10204_v44 = vpop.f32.mrf.mxu1 }
 0x254   : > { %v1646_v36 = vadd.f32 %v1645_v33, %v10192_v21  ;;  %1943 = vrot.lane.b32.xlu0 %v7981_v32, %s9651_s27  ;;  %v1975_v37 = vrot.slane %v7981_v32, 4 }
 0x255   : > { %v1649_v38 = vpop.f32.mrf.mxu0  ;;  %v10210_v52 = vpop.f32.mrf.mxu1 }
 0x256   : > { %v7983_v41 = vpack.c.bf16 %v1646_v36, %v1644_v35  ;;  %v2050_v42 = vsel %vm2045_vm4, %v1975_v37, 0  ;;  %v1650_v45 = vadd.f32 %v1649_v38, %v10188_v20 }
 0x257   : > { %v1651_v43 = vpop.f32.mrf.mxu0  ;;  %8324 = vmatpush3.bf16.xpose.msra.mxu1 %v2050_v42  ;;  %v10212_v56 = vpop.f32.mrf.mxu1 }
 0x258   : > { %v1652_v48 = vadd.f32 %v1651_v43, %v10192_v21  ;;  %1945 = vrot.lane.b32.xlu0 %v7983_v41, %s9651_s27  ;;  %8329 = vmatprep.subr.bf16.mxu1 %v12674_v18  ;;  %v1976_v54 = vrot.slane %v7983_v41, 4 }
 0x259   : > { %v1653_v51 = vpop.f32.mrf.mxu0  ;;  %v10217_v59 = vpop.f32.mrf.mxu1 }
 0x25a   : > { %v7985_v53 = vpack.c.bf16 %v1652_v48, %v1650_v45  ;;  %v1654_v57 = vadd.f32 %v1653_v51, %v10188_v20  ;;  %v2096_v1 = vsel %vm2045_vm4, %v1976_v54, 0 }
 0x25b   : > { %v1655_v55 = vpop.f32.mrf.mxu0  ;;  %v10226_v9 = vpop.f32.mrf.mxu1 }
 0x25c   : > { %v1656_v58 = vadd.f32 %v1655_v55, %v10192_v21  ;;  %1947 = vrot.lane.b32.xlu1 %v7985_v53, %s9651_s27  ;;  %v1977_v22 = vrot.slane %v7985_v53, 4 }
 0x25d   : > { %v1659_v12 = vpop.f32.mrf.mxu0  ;;  %v10233_v14 = vpop.f32.mrf.mxu1 }
 0x25e   : > { %v10219_v61 = vpack.c.bf16 %v1656_v58, %v1654_v57  ;;  %8326 = vmatmul.mubr.msk.bf16.vlgmr.msra.gmra.mxu1 %vm2045_vm4, %v7981_v32  ;;  %v1660_v10 = vadd.f32 %v1659_v12, %v10188_v20  ;;  %v2142_v19 = vsel %vm2045_vm4, %v1977_v22, 0 }
 0x25f   : > { %v1661_v7 = vpop.f32.mrf.mxu0  ;;  %8330 = vmatpush3.bf16.xpose.msra.mxu1 %v2096_v1  ;;  %8331 = vmatprep.mubr.msk.bf16.mxu1 %vm9650_vm3, %v12674_v18  ;;  %v8317_v25 = vpop.f32.mrf.mxu1 }
 0x260   : > { %v1662_v11 = vadd.f32 %v1661_v7, %v10192_v21  ;;  %1949 = vrot.lane.b32.xlu1 %v10219_v61, %s9651_s27  ;;  %8335 = vmatprep.subr.bf16.mxu1 %v12674_v18  ;;  %v10244_v33 = vadd.f32 %v8317_v25, %v10237_v23  ;;  %v1978_v55 = vrot.slane %v10219_v61, 4 }
 0x261   : > { %v1663_v13 = vpop.f32.mrf.mxu0  ;;  %v10246_v36 = vpop.f32.mrf.mxu1 }
 0x262   : > { %v10235_v17 = vpack.c.bf16 %v1662_v11, %v1660_v10  ;;  %v1664_v26 = vadd.f32 %v1663_v13, %v10188_v20  ;;  %v2188_v13 = vsel %vm2045_vm4, %v1978_v55, 0 }
 0x263   : > { %v1665_v24 = vpop.f32.mrf.mxu0  ;;  %v8318_v42 = vpop.f32.mrf.mxu1 }
 0x264   : > { %v1666_v32 = vadd.f32 %v1665_v24, %v10192_v21  ;;  %1951 = vrot.lane.b32.xlu0 %v10235_v17, %s9651_s27  ;;  %v10260_v48 = vadd.f32 %v8318_v42, %v10237_v23 }
 0x265   : > { %v1669_v35 = vpop.f32.mrf.mxu0  ;;  %v10262_v51 = vpop.f32.mrf.mxu1 }
 0x266   : > { %v10248_v37 = vpack.c.bf16 %v1666_v32, %v1664_v26  ;;  %8332 = vmatmul.mubr.msk.bf16.vlgmr.msra.gmra.mxu1 %vm2045_vm4, %v7983_v41  ;;  %v1670_v43 = vadd.f32 %v1669_v35, %v10188_v20 }
 0x267   : > { %v1671_v38 = vpop.f32.mrf.mxu0  ;;  %8336 = vmatpush3.bf16.xpose.msra.mxu1 %v2142_v19  ;;  %8337 = vmatprep.mubr.msk.bf16.mxu1 %vm9650_vm3, %v12674_v18  ;;  %v8321_v58 = vpop.f32.mrf.mxu1 }
 0x268   : > { %v1672_v45 = vadd.f32 %v1671_v38, %v10192_v21  ;;  %1953 = vrot.lane.b32.xlu1 %v10248_v37, %s9651_s27  ;;  %8341 = vmatprep.subr.bf16.mxu1 %v12674_v18  ;;  %v10272_v6 = vadd.f32 %v8321_v58, %v10237_v23  ;;  %v1979_v38 = vrot.slane %v10235_v17, 4 }
 0x269   : > { %v1673_v41 = vpop.f32.mrf.mxu0  ;;  %v1800_v10 = vpop.f32.mrf.mxu1 }
 0x26a   : > { %v10264_v54 = vpack.c.bf16 %v1672_v45, %v1670_v43  ;;  %v1674_v12 = vadd.f32 %v1673_v41, %v10188_v20  ;;  %v10279_v22 = vadd.f32 %v1800_v10, %v10237_v23  ;;  %v2234_v58 = vsel %vm2045_vm4, %v1979_v38, 0 }
 0x26b   : > { %v1675_v57 = vpop.f32.mrf.mxu0  ;;  %v8322_v25 = vpop.f32.mrf.mxu1 }
 0x26c   : > { %v1676_v1 = vadd.f32 %v1675_v57, %v10192_v21  ;;  %1955 = vrot.lane.b32.xlu0 %v10264_v54, %s9651_s27 }
 0x26d   : > { %v1679_v7 = vpop.f32.mrf.mxu0 }
 0x26e   : > { %v10274_v11 = vpack.c.bf16 %v1676_v1, %v1674_v12  ;;  %8338 = vmatmul.mubr.msk.bf16.vlgmr.msra.gmra.mxu1 %vm2045_vm4, %v7985_v53  ;;  %v1680_v26 = vadd.f32 %v1679_v7, %v10188_v20  ;;  %v10289_v53 = vadd.f32 %v8322_v25, %v10237_v23 }
 0x26f   : > { %v1681_v24 = vpop.f32.mrf.mxu0  ;;  %8342 = vmatpush3.bf16.xpose.msra.mxu1 %v2188_v13  ;;  %8343 = vmatprep.mubr.msk.bf16.mxu1 %vm9650_vm3, %v12674_v18 }
 0x270   : > { %v1682_v32 = vadd.f32 %v1681_v24, %v10192_v21  ;;  %1957 = vrot.lane.b32.xlu1 %v10274_v11, %s9651_s27  ;;  %8347 = vmatprep.subr.bf16.mxu1 %v12674_v18  ;;  %v1980_v24 = vrot.slane %v10248_v37, 4 }
 0x271   : > { %v1683_v35 = vpop.f32.mrf.mxu0 }
 0x272   : > { %v7997_v19 = vpack.c.bf16 %v1682_v32, %v1680_v26  ;;  %v1684_v43 = vadd.f32 %v1683_v35, %v10188_v20 }
 0x273   : > { %v1685_v42 = vpop.f32.mrf.mxu0 }
 0x274   : > { %v1686_v45 = vadd.f32 %v1685_v42, %v10192_v21  ;;  %1959 = vrot.lane.b32.xlu0 %v7997_v19, %s9651_s27  ;;  %v1983_v41 = vrot.slane %v7997_v19, 4 }
 0x275   : > { %v1689_v55 = vpop.f32.mrf.mxu0 }
 0x276   : > { %v10295_v57 = vpack.c.bf16 %v1686_v45, %v1684_v43  ;;  %8344 = vmatmul.mubr.msk.bf16.vlgmr.msra.gmra.mxu1 %vm2045_vm4, %v10219_v61  ;;  %v2418_v12 = vsel %vm2045_vm4, %v1983_v41, 0  ;;  %v1690_v7 = vadd.f32 %v1689_v55, %v10188_v20  ;;  %v2280_v43 = vsel %vm2045_vm4, %v1980_v24, 0 }
 0x277   : > { %v1691_v1 = vpop.f32.mrf.mxu0  ;;  %8348 = vmatpush3.bf16.xpose.msra.mxu1 %v2234_v58  ;;  %8372 = vmatpush3.bf16.xpose.msra.mxu0 %v2418_v12  ;;  %v1981_v12 = vrot.slane %v10264_v54, 4 }
 0x278   : > { %v1692_v10 = vadd.f32 %v1691_v1, %v10192_v21  ;;  %1961 = vrot.lane.b32.xlu1 %v10295_v57, %s9651_s27  ;;  %8349 = vmatprep.mubr.msk.bf16.mxu1 %vm9650_vm3, %v12674_v18 }
 0x279   : > { %v1693_v13 = vpop.f32.mrf.mxu0  ;;  %8353 = vmatprep.subr.bf16.mxu1 %v12674_v18  ;;  %8383 = vmatprep.subr.bf16.mxu0 %v12674_v18 }
 0x27a   : > { %v8001_v61 = vpack.c.bf16 %v1692_v10, %v1690_v7  ;;  %v1694_v26 = vadd.f32 %v1693_v13, %v10188_v20 }
 0x27b   : > { %v1695_v25 = vpop.f32.mrf.mxu0 }
 0x27c   : > { %v1696_v32 = vadd.f32 %v1695_v25, %v10192_v21  ;;  %1963 = vrot.lane.b32.xlu0 %v8001_v61, %s9651_s27  ;;  %v1985_v35 = vrot.slane %v8001_v61, 4 }
 0x27d   : > { %v1699_v38 = vpop.f32.mrf.mxu0 }
 0x27e   : > { %v10313_v42 = vpack.c.bf16 %v1696_v32, %v1694_v26  ;;  %8350 = vmatmul.mubr.msk.bf16.vlgmr.msra.gmra.mxu1 %vm2045_vm4, %v10235_v17  ;;  %8374 = vmatmul.mubr.msk.bf16.vlgmr.msra.gmra.mxu0 %vm2045_vm4, %v7997_v19  ;;  %v2510_v45 = vsel %vm2045_vm4, %v1985_v35, 0  ;;  %v1700_v55 = vadd.f32 %v1699_v38, %v10188_v20  ;;  %v2326_v26 = vsel %vm2045_vm4, %v1981_v12, 0 }
 0x27f   : > { %v1701_v41 = vpop.f32.mrf.mxu0  ;;  %8354 = vmatpush3.bf16.xpose.msra.mxu1 %v2280_v43  ;;  %8384 = vmatpush3.bf16.xpose.msra.mxu0 %v2510_v45 }
 0x280   : > { %v1702_v58 = vadd.f32 %v1701_v41, %v10192_v21  ;;  %1965 = vrot.lane.b32.xlu1 %v10313_v42, %s9651_s27  ;;  %8355 = vmatprep.mubr.msk.bf16.mxu1 %vm9650_vm3, %v12674_v18  ;;  %v1982_v41 = vrot.slane %v10274_v11, 4 }
 0x281   : > { %v1703_v17 = vpop.f32.mrf.mxu0  ;;  %8385 = vmatprep.mubr.msk.bf16.mxu0 %vm9650_vm3, %v12674_v18  ;;  %8359 = vmatprep.subr.bf16.mxu1 %v12674_v18 }
 0x282   : > { %v8005_v19 = vpack.c.bf16 %v1702_v58, %v1700_v55  ;;  %8395 = vmatprep.subr.bf16.mxu0 %v12674_v18  ;;  %v1704_v7 = vadd.f32 %v1703_v17, %v10188_v20 }
 0x283   : > { %v1705_v1 = vpop.f32.mrf.mxu0 }
 0x284   : > { %v1706_v10 = vadd.f32 %v1705_v1, %v10192_v21  ;;  %1967 = vrot.lane.b32.xlu0 %v8005_v19, %s9651_s27  ;;  %v1987_v13 = vrot.slane %v8005_v19, 4  ;;  %v1753_v1 = vadd.f32 %v10201_v39, %v10237_v23  ;;  %v1761_v39 = vadd.f32 %v10196_v34, %v10237_v23 }
 0x285   : > { %v1709_v24 = vpop.f32.mrf.mxu0 }
 0x286   : > { %v10334_v25 = vpack.c.bf16 %v1706_v10, %v1704_v7  ;;  %8356 = vmatmul.mubr.msk.bf16.vlgmr.msra.gmra.mxu1 %vm2045_vm4, %v10248_v37  ;;  %8386 = vmatmul.mubr.msk.bf16.vlgmr.msra.gmra.mxu0 %vm2045_vm4, %v8001_v61  ;;  %v2602_v32 = vsel %vm2045_vm4, %v1987_v13, 0  ;;  %v1710_v38 = vadd.f32 %v1709_v24, %v10188_v20  ;;  %v1756_v61 = vadd.f32 %v10210_v52, %v10237_v23 }
 0x287   : > { %v1711_v35 = vpop.f32.mrf.mxu0  ;;  %8360 = vmatpush3.bf16.xpose.msra.mxu1 %v2326_v26  ;;  %8396 = vmatpush3.bf16.xpose.msra.mxu0 %v2602_v32  ;;  %v1764_v7 = vadd.f32 %v10204_v44, %v10237_v23  ;;  %v10377_v44 = vpack.c.bf16 %v1753_v1, %v1753_v1  ;;  %v1984_v13 = vrot.slane %v10295_v57, 4  ;;  %v10390_v34 = vpack.c.bf16 %v1761_v39, %v1761_v39 }
 0x288   : > { %v1712_v43 = vadd.f32 %v1711_v35, %v10192_v21  ;;  %1969 = vrot.lane.b32.xlu1 %v10334_v25, %s9651_s27  ;;  %8361 = vmatprep.mubr.msk.bf16.mxu1 %vm9650_vm3, %v12674_v18  ;;  %v10361_v52 = vpack.c.bf16 %v1756_v61, %v1756_v61  ;;  %v1769_v24 = vadd.f32 %v10217_v59, %v10237_v23  ;;  %v1986_v35 = vrot.slane %v10313_v42, 4 }
 0x289   : > { %v1713_v37 = vpop.f32.mrf.mxu0  ;;  %8397 = vmatprep.mubr.msk.bf16.mxu0 %vm9650_vm3, %v12674_v18  ;;  %8365 = vmatprep.subr.bf16.mxu1 %v12674_v18  ;;  %v2464_v32 = vsel %vm2045_vm4, %v1984_v13, 0  ;;  %v1777_v59 = vadd.f32 %v10212_v56, %v10237_v23  ;;  %v1988_v61 = vrot.slane %v10334_v25, 4 }
 0x28a   : > { %v8009_v45 = vpack.c.bf16 %v1712_v43, %v1710_v38  ;;  %8407 = vmatprep.subr.bf16.mxu0 %v12674_v18  ;;  %v1714_v58 = vadd.f32 %v1713_v37, %v10188_v20  ;;  %v2372_v20 = vsel %vm2045_vm4, %v1982_v41, 0  ;;  %v1785_v43 = vadd.f32 %v10246_v36, %v10237_v23 }
 0x28b   : > { %v1715_v55 = vpop.f32.mrf.mxu0  ;;  %v10422_v38 = vpack.c.bf16 %v1777_v59, %v1777_v59  ;;  %v2556_v56 = vsel %vm2045_vm4, %v1986_v35, 0  ;;  %v2648_v36 = vsel %vm2045_vm4, %v1988_v61, 0 }
 0x28c   : > { %v1716_v17 = vadd.f32 %v1715_v55, %v10192_v21  ;;  %1971 = vrot.lane.b32.xlu0 %v8009_v45, %s9651_s27  ;;  %v1989_v12 = vrot.slane %v8009_v45, 4  ;;  %v10434_v37 = vpack.c.bf16 %v1785_v43, %v1785_v43 }
 0x28e   : > { %v8011_v10 = vpack.c.bf16 %v1716_v17, %v1714_v58  ;;  %8362 = vmatmul.mubr.msk.bf16.vlgmr.msra.gmra.mxu1 %vm2045_vm4, %v10264_v54  ;;  %8398 = vmatmul.mubr.msk.bf16.vlgmr.msra.gmra.mxu0 %vm2045_vm4, %v8005_v19  ;;  %v2694_v21 = vsel %vm2045_vm4, %v1989_v12, 0  ;;  %v10379_v54 = vpack.c.bf16 %v1764_v7, %v1764_v7  ;;  %v1772_v19 = vadd.f32 %v10233_v14, %v10237_v23 }
 0x28f   : > { %8366 = vmatpush3.bf16.xpose.msra.mxu1 %v2372_v20  ;;  %8408 = vmatpush3.bf16.xpose.msra.mxu0 %v2694_v21  ;;  %v1780_v14 = vadd.f32 %v10226_v9, %v10237_v23  ;;  %v10413_v9 = vpack.c.bf16 %v1769_v24, %v1769_v24 }
 0x290   : > { %1973 = vrot.lane.b32.xlu1 %v8011_v10, %s9651_s27  ;;  %2009 = vrot.lane.b32.xlu0 %v10361_v52, %s9651_s27  ;;  %v10396_v26 = vpack.c.bf16 %v1772_v19, %v1772_v19 }
 0x291   : > { %8367 = vmatprep.mubr.msk.bf16.mxu1 %vm9650_vm3, %v12674_v18  ;;  %8409 = vmatprep.mubr.msk.bf16.mxu0 %vm9650_vm3, %v12674_v18 }
 0x292   : > { %8377 = vmatprep.subr.bf16.mxu1 %v12674_v18  ;;  %8419 = vmatprep.subr.bf16.mxu0 %v12674_v18 }
 0x294   : > { %2007 = vrot.lane.b32.xlu1 %v10377_v44, %s9651_s27  ;;  %2013 = vrot.lane.b32.xlu0 %v10379_v54, %s9651_s27 }
 0x296   : > { %8368 = vmatmul.mubr.msk.bf16.vlgmr.msra.gmra.mxu1 %vm2045_vm4, %v10274_v11  ;;  %8410 = vmatmul.mubr.msk.bf16.vlgmr.msra.gmra.mxu0 %vm2045_vm4, %v8009_v45  ;;  %v10415_v11 = vpack.c.bf16 %v1780_v14, %v1780_v14 }
 0x297   : > { %8378 = vmatpush3.bf16.xpose.msra.mxu1 %v2464_v32  ;;  %8379 = vmatprep.mubr.msk.bf16.mxu1 %vm9650_vm3, %v12674_v18 }
 0x298   : > { %2011 = vrot.lane.b32.xlu1 %v10390_v34, %s9651_s27  ;;  %2017 = vrot.lane.b32.xlu0 %v10396_v26, %s9651_s27 }
 0x299   : > { %8389 = vmatprep.subr.bf16.mxu1 %v12674_v18  ;;  %8421 = vmatprep.mubr.msk.bf16.mxu0 %vm9650_vm3, %v12674_v18 }
 0x29c   : > { %2015 = vrot.lane.b32.xlu1 %v10413_v9, %s9651_s27  ;;  %2021 = vrot.lane.b32.xlu0 %v10415_v11, %s9651_s27 }
 0x29e   : > { %8380 = vmatmul.mubr.msk.bf16.vlgmr.msra.gmra.mxu1 %vm2045_vm4, %v10295_v57  ;;  %v1990_v57 = vrot.slane %v8011_v10, 4 }
 0x29f   : > { %8390 = vmatpush3.bf16.xpose.msra.mxu1 %v2556_v56  ;;  %8391 = vmatprep.mubr.msk.bf16.mxu1 %vm9650_vm3, %v12674_v18 }
 0x2a0   : > { %2019 = vrot.lane.b32.xlu1 %v10422_v38, %s9651_s27  ;;  %8401 = vmatprep.subr.bf16.mxu1 %v12674_v18  ;;  %v2740_v45 = vsel %vm2045_vm4, %v1990_v57, 0 }
 0x2a4   : > { %2023 = vrot.lane.b32.xlu1 %v10434_v37, %s9651_s27 }
 0x2a6   : > { %8392 = vmatmul.mubr.msk.bf16.vlgmr.msra.gmra.mxu1 %vm2045_vm4, %v10313_v42 }
 0x2a7   : > { %8402 = vmatpush3.bf16.xpose.msra.mxu1 %v2648_v36  ;;  %8403 = vmatprep.mubr.msk.bf16.mxu1 %vm9650_vm3, %v12674_v18 }
 0x2a8   : > { %8413 = vmatprep.subr.bf16.mxu1 %v12674_v18 }
 0x2ae   : > { %8404 = vmatmul.mubr.msk.bf16.vlgmr.msra.gmra.mxu1 %vm2045_vm4, %v10334_v25 }
 0x2af   : > { %8414 = vmatpush3.bf16.xpose.msra.mxu1 %v2740_v45  ;;  %8415 = vmatprep.mubr.msk.bf16.mxu1 %vm9650_vm3, %v12674_v18 }
 0x2b0   : > { %8425 = vmatprep.subr.bf16.mxu1 %v12674_v18 }
 0x2b6   : > { %8416 = vmatmul.mubr.msk.bf16.vlgmr.msra.gmra.mxu1 %vm2045_vm4, %v8011_v10 }
 0x2b7   : > { %8427 = vmatprep.mubr.msk.bf16.mxu1 %vm9650_vm3, %v12674_v18 }
 0x2c6   : > { %v1944_v42 = vpop.permute.xlu0 %1943 }
 0x2c7   : > { %v1991_v41 = vrot.slane %v1944_v42, 4 }
 0x2c9   : > { %v2786_v55 = vsel %vm2045_vm4, %v1991_v41, 0 }
 0x2ca   : > { %v1946_v58 = vpop.permute.xlu0 %1945  ;;  %8420 = vmatpush3.bf16.xpose.msra.mxu0 %v2786_v55 }
 0x2cb   : > { %v1992_v25 = vrot.slane %v1946_v58, 4  ;;  %8431 = vmatprep.subr.bf16.mxu0 %v12674_v18 }
 0x2cd   : > { %v2832_v17 = vsel %vm2045_vm4, %v1992_v25, 0 }
 0x2ce   : > { %v1948_v12 = vpop.permute.xlu1 %1947  ;;  %8426 = vmatpush3.bf16.xpose.msra.mxu1 %v2832_v17 }
 0x2cf   : > { %v1993_v1 = vrot.slane %v1948_v12, 4  ;;  %8437 = vmatprep.subr.bf16.mxu1 %v12674_v18 }
 0x2d1   : > { %8422 = vmatmul.mubr.msk.bf16.vlgmr.msra.gmra.mxu0 %vm2045_vm4, %v1944_v42  ;;  %v2878_v7 = vsel %vm2045_vm4, %v1993_v1, 0 }
 0x2d2   : > { %v1950_v10 = vpop.permute.xlu1 %1949  ;;  %8432 = vmatpush3.bf16.xpose.msra.mxu0 %v2878_v7  ;;  %8433 = vmatprep.mubr.msk.bf16.mxu0 %vm9650_vm3, %v12674_v18 }
 0x2d3   : > { %v1994_v20 = vrot.slane %v1950_v10, 4  ;;  %8443 = vmatprep.subr.bf16.mxu0 %v12674_v18 }
 0x2d5   : > { %8428 = vmatmul.mubr.msk.bf16.vlgmr.msra.gmra.mxu1 %vm2045_vm4, %v1946_v58  ;;  %v2924_v21 = vsel %vm2045_vm4, %v1994_v20, 0 }
 0x2d6   : > { %v1952_v39 = vpop.permute.xlu0 %1951  ;;  %8438 = vmatpush3.bf16.xpose.msra.mxu1 %v2924_v21  ;;  %8439 = vmatprep.mubr.msk.bf16.mxu1 %vm9650_vm3, %v12674_v18 }
 0x2d7   : > { %v1995_v19 = vrot.slane %v1952_v39, 4  ;;  %8449 = vmatprep.subr.bf16.mxu1 %v12674_v18 }
 0x2d9   : > { %8434 = vmatmul.mubr.msk.bf16.vlgmr.msra.gmra.mxu0 %vm2045_vm4, %v1948_v12  ;;  %v2970_v13 = vsel %vm2045_vm4, %v1995_v19, 0 }
 0x2da   : > { %v1954_v24 = vpop.permute.xlu1 %1953  ;;  %8444 = vmatpush3.bf16.xpose.msra.mxu0 %v2970_v13  ;;  %8445 = vmatprep.mubr.msk.bf16.mxu0 %vm9650_vm3, %v12674_v18 }
 0x2db   : > { %v1996_v14 = vrot.slane %v1954_v24, 4  ;;  %8455 = vmatprep.subr.bf16.mxu0 %v12674_v18 }
 0x2dd   : > { %8440 = vmatmul.mubr.msk.bf16.vlgmr.msra.gmra.mxu1 %vm2045_vm4, %v1950_v10  ;;  %v3016_v32 = vsel %vm2045_vm4, %v1996_v14, 0 }
 0x2de   : > { %v1956_v59 = vpop.permute.xlu0 %1955  ;;  %8450 = vmatpush3.bf16.xpose.msra.mxu1 %v3016_v32  ;;  %8451 = vmatprep.mubr.msk.bf16.mxu1 %vm9650_vm3, %v12674_v18 }
 0x2df   : > { %v1997_v35 = vrot.slane %v1956_v59, 4  ;;  %8461 = vmatprep.subr.bf16.mxu1 %v12674_v18 }
 0x2e1   : > { %8446 = vmatmul.mubr.msk.bf16.vlgmr.msra.gmra.mxu0 %vm2045_vm4, %v1952_v39  ;;  %v3062_v43 = vsel %vm2045_vm4, %v1997_v35, 0 }
 0x2e2   : > { %v1958_v56 = vpop.permute.xlu1 %1957  ;;  %8456 = vmatpush3.bf16.xpose.msra.mxu0 %v3062_v43  ;;  %8457 = vmatprep.mubr.msk.bf16.mxu0 %vm9650_vm3, %v12674_v18 }
 0x2e3   : > { %v1998_v61 = vrot.slane %v1958_v56, 4  ;;  %8467 = vmatprep.subr.bf16.mxu0 %v12674_v18 }
 0x2e5   : > { %8452 = vmatmul.mubr.msk.bf16.vlgmr.msra.gmra.mxu1 %vm2045_vm4, %v1954_v24  ;;  %v3108_v36 = vsel %vm2045_vm4, %v1998_v61, 0  ;;  %v3971_v61 = vsel %vm836_vm0, %v10377_v44, 0  ;;  %v2042_v44 = vand.u32 127, %v1033_v0 }
 0x2e6   : > { %v1960_v57 = vpop.permute.xlu0 %1959  ;;  %8462 = vmatpush3.bf16.xpose.msra.mxu1 %v3108_v36  ;;  %8463 = vmatprep.mubr.msk.bf16.mxu1 %vm9650_vm3, %v12674_v18  ;;  %v4017_v36 = vsel %vm836_vm0, %v10361_v52, 0 }
 0x2e7   : > { %v1999_v45 = vrot.slane %v1960_v57, 4  ;;  %8473 = vmatprep.subr.bf16.mxu1 %v12674_v18  ;;  %vm2043_vm5 = vcmp.gt.s32.totalorder %v2042_v44, %v9922_v4 }
 0x2e9   : > { %8458 = vmatmul.mubr.msk.bf16.vlgmr.msra.gmra.mxu0 %vm2045_vm4, %v1956_v59  ;;  %v3154_v42 = vsel %vm2045_vm4, %v1999_v45, 0 }
 0x2ea   : > { %v1962_v41 = vpop.permute.xlu1 %1961  ;;  %8468 = vmatpush3.bf16.xpose.msra.mxu0 %v3154_v42  ;;  %8469 = vmatprep.mubr.msk.bf16.mxu0 %vm9650_vm3, %v12674_v18  ;;  %v10545_v42 = vsel %vm2043_vm5, -1e+30, %v12674_v18 }
 0x2eb   : > { %v2000_v55 = vrot.slane %v1962_v41, 4  ;;  %8479 = vmatprep.subr.bf16.mxu0 %v12674_v18 }
 0x2ed   : > { %8464 = vmatmul.mubr.msk.bf16.vlgmr.msra.gmra.mxu1 %vm2045_vm4, %v1958_v56  ;;  %v3200_v58 = vsel %vm2045_vm4, %v2000_v55, 0 }
 0x2ee   : > { %v1964_v25 = vpop.permute.xlu0 %1963  ;;  %8474 = vmatpush3.bf16.xpose.msra.mxu1 %v3200_v58  ;;  %8475 = vmatprep.mubr.msk.bf16.mxu1 %vm9650_vm3, %v12674_v18 }
 0x2ef   : > { %v2001_v17 = vrot.slane %v1964_v25, 4  ;;  %8485 = vmatprep.subr.bf16.mxu1 %v12674_v18 }
 0x2f1   : > { %8470 = vmatmul.mubr.msk.bf16.vlgmr.msra.gmra.mxu0 %vm2045_vm4, %v1960_v57  ;;  %v3246_v12 = vsel %vm2045_vm4, %v2001_v17, 0  ;;  %v10542_v57 = vpop.f32.mrf.mxu1 }
 0x2f2   : > { %v1966_v1 = vpop.permute.xlu1 %1965  ;;  %8480 = vmatpush3.bf16.xpose.msra.mxu0 %v3246_v12  ;;  %8481 = vmatprep.mubr.msk.bf16.mxu0 %vm9650_vm3, %v12674_v18 }
 0x2f3   : > { %v2002_v7 = vrot.slane %v1966_v1, 4  ;;  %8491 = vmatprep.subr.bf16.mxu0 %v12674_v18 }
 0x2f5   : > { %8476 = vmatmul.mubr.msk.bf16.vlgmr.msra.gmra.mxu1 %vm2045_vm4, %v1962_v41  ;;  %v3292_v10 = vsel %vm2045_vm4, %v2002_v7, 0 }
 0x2f6   : > { %v1968_v20 = vpop.permute.xlu0 %1967  ;;  %8486 = vmatpush3.bf16.xpose.msra.mxu1 %v3292_v10  ;;  %8487 = vmatprep.mubr.msk.bf16.mxu1 %vm9650_vm3, %v12674_v18 }
 0x2f7   : > { %v2003_v21 = vrot.slane %v1968_v20, 4  ;;  %8497 = vmatprep.subr.bf16.mxu1 %v12674_v18 }
 0x2f9   : > { %8482 = vmatmul.mubr.msk.bf16.vlgmr.msra.gmra.mxu0 %vm2045_vm4, %v1964_v25  ;;  %v3338_v39 = vsel %vm2045_vm4, %v2003_v21, 0 }
 0x2fa   : > { %v1970_v19 = vpop.permute.xlu1 %1969  ;;  %8492 = vmatpush3.bf16.xpose.msra.mxu0 %v3338_v39  ;;  %8493 = vmatprep.mubr.msk.bf16.mxu0 %vm9650_vm3, %v12674_v18 }
 0x2fb   : > { %v2004_v13 = vrot.slane %v1970_v19, 4  ;;  %8503 = vmatprep.subr.bf16.mxu0 %v12674_v18 }
 0x2fd   : > { %8488 = vmatmul.mubr.msk.bf16.vlgmr.msra.gmra.mxu1 %vm2045_vm4, %v1966_v1  ;;  %v3384_v24 = vsel %vm2045_vm4, %v2004_v13, 0 }
 0x2fe   : > { %8498 = vmatpush3.bf16.xpose.msra.mxu1 %v3384_v24  ;;  %v1972_v14 = vpop.permute.xlu0 %1971  ;;  %8499 = vmatprep.mubr.msk.bf16.mxu1 %vm9650_vm3, %v12674_v18 }
 0x2ff   : > { %v2005_v32 = vrot.slane %v1972_v14, 4  ;;  %8509 = vmatprep.subr.bf16.mxu1 %v12674_v18 }
 0x301   : > { %8494 = vmatmul.mubr.msk.bf16.vlgmr.msra.gmra.mxu0 %vm2045_vm4, %v1968_v20  ;;  %v3430_v59 = vsel %vm2045_vm4, %v2005_v32, 0 }
 0x302   : > { %v1974_v35 = vpop.permute.xlu1 %1973  ;;  %8504 = vmatpush3.bf16.xpose.msra.mxu0 %v3430_v59  ;;  %8505 = vmatprep.mubr.msk.bf16.mxu0 %vm9650_vm3, %v12674_v18  ;;  %v10630_v30 = vpop.permute.xlu0 %2009 }
 0x303   : > { %v2006_v43 = vrot.slane %v1974_v35, 4  ;;  %8515 = vmatprep.subr.bf16.mxu0 %v12674_v18  ;;  %12766 = vst [vmem:[#allocation49_spill] sm:$0xff] %v10630_v30 }
 0x305   : > { %8500 = vmatmul.mubr.msk.bf16.vlgmr.msra.gmra.mxu1 %vm2045_vm4, %v1970_v19  ;;  %v3476_v56 = vsel %vm2045_vm4, %v2006_v43, 0 }
 0x306   : > { %8510 = vmatpush3.bf16.xpose.msra.mxu1 %v3476_v56  ;;  %8511 = vmatprep.mubr.msk.bf16.mxu1 %vm9650_vm3, %v12674_v18  ;;  %v10641_v4 = vpop.permute.xlu0 %2013 }
 0x307   : > { %8521 = vmatprep.subr.bf16.mxu1 %v12674_v18  ;;  %12768 = vst [vmem:[#allocation51_spill] sm:$0xff] %v10641_v4 }
 0x309   : > { %8506 = vmatmul.mubr.msk.bf16.vlgmr.msra.gmra.mxu0 %vm2045_vm4, %v1972_v14 }
 0x30a   : > { %8516 = vmatpush3.bf16.msra.mxu0 %v3971_v61  ;;  %8517 = vmatprep.mubr.msk.bf16.mxu0 %vm9650_vm3, %v12674_v18  ;;  %v10653_v8 = vpop.permute.xlu0 %2017 }
 0x30b   : > { %8527 = vmatprep.subr.bf16.mxu0 %v12674_v18  ;;  %12770 = vst [vmem:[#allocation53_spill] sm:$0xff] %v10653_v8 }
 0x30d   : > { %8512 = vmatmul.mubr.msk.bf16.vlgmr.msra.gmra.mxu1 %vm2045_vm4, %v1974_v35 }
 0x30e   : > { %8522 = vmatpush3.bf16.msra.mxu1 %v4017_v36  ;;  %8523 = vmatprep.mubr.msk.bf16.mxu1 %vm9650_vm3, %v12674_v18  ;;  %v10664_v46 = vpop.permute.xlu0 %2021 }
 0x30f   : > { %8533 = vmatprep.subr.bf16.mxu1 %v12674_v18  ;;  %v10634_v18 = vpop.permute.xlu1 %2007  ;;  %12772 = vst [vmem:[#allocation55_spill] sm:$0xff] %v10664_v46 }
 0x310   : > { %12767 = vst [vmem:[#allocation50_spill] sm:$0xff] %v10634_v18 }
 0x313   : > { %v10646_v49 = vpop.permute.xlu1 %2011 }
 0x314   : > { %12769 = vst [vmem:[#allocation52_spill] sm:$0xff] %v10646_v49 }
 0x317   : > { %v10657_v3 = vpop.permute.xlu1 %2015 }
 0x318   : > { %12771 = vst [vmem:[#allocation54_spill] sm:$0xff] %v10657_v3 }
 0x31b   : > { %v10669_v63 = vpop.permute.xlu1 %2019 }
 0x31c   : > { %12773 = vst [vmem:[#allocation56_spill] sm:$0xff] %v10669_v63 }
 0x31e   : > { %v2086_v45 = vpop.f32.mrf.mxu1 }
 0x31f   : > { %v3518_v41 = vmul.f32 0.125, %v2086_v45 }
 0x320   : > { %v8327_v55 = vpop.f32.mrf.mxu1 }
 0x321   : > { %v10548_v52 = vadd.f32 %v3518_v41, %v10545_v42 }
 0x322   : > { %v2089_v58 = vpop.f32.mrf.mxu1 }
 0x323   : > { %v3583_v25 = vsel %vm3582_vm6, %v10548_v52, -inf }
 0x324   : > { %v8328_v17 = vpop.f32.mrf.mxu1  ;;  %3584 = vmax.xlane.f32.xlu0 %v3583_v25 }
 0x326   : > { %v2132_v0 = vpop.f32.mrf.mxu1 }
 0x327   : > { %v3519_v12 = vmul.f32 0.125, %v2132_v0 }
 0x328   : > { %v8333_v1 = vpop.f32.mrf.mxu1 }
 0x329   : > { %v10553_v7 = vadd.f32 %v3519_v12, %v10545_v42 }
 0x32a   : > { %v2135_v10 = vpop.f32.mrf.mxu1 }
 0x32b   : > { %v3586_v20 = vsel %vm3582_vm6, %v10553_v7, -inf }
 0x32c   : > { %v8334_v21 = vpop.f32.mrf.mxu1  ;;  %3587 = vmax.xlane.f32.xlu1 %v3586_v20 }
 0x32e   : > { %v2178_v39 = vpop.f32.mrf.mxu1 }
 0x32f   : > { %v3520_v19 = vmul.f32 0.125, %v2178_v39 }
 0x330   : > { %v8339_v13 = vpop.f32.mrf.mxu1 }
 0x331   : > { %v10558_v24 = vadd.f32 %v3520_v19, %v10545_v42 }
 0x332   : > { %v2181_v14 = vpop.f32.mrf.mxu1 }
 0x333   : > { %v3589_v32 = vsel %vm3582_vm6, %v10558_v24, -inf }
 0x334   : > { %v8340_v59 = vpop.f32.mrf.mxu1  ;;  %3590 = vmax.xlane.f32.xlu0 %v3589_v32 }
 0x336   : > { %v2224_v35 = vpop.f32.mrf.mxu1 }
 0x337   : > { %v3521_v43 = vmul.f32 0.125, %v2224_v35 }
 0x338   : > { %v8345_v56 = vpop.f32.mrf.mxu1 }
 0x339   : > { %v10563_v61 = vadd.f32 %v3521_v43, %v10545_v42 }
 0x33a   : > { %v2227_v36 = vpop.f32.mrf.mxu1 }
 0x33b   : > { %v3592_v44 = vsel %vm3582_vm6, %v10563_v61, -inf }
 0x33c   : > { %v8346_v45 = vpop.f32.mrf.mxu1  ;;  %3593 = vmax.xlane.f32.xlu0 %v3592_v44 }
 0x33e   : > { %v2270_v41 = vpop.f32.mrf.mxu1  ;;  %v2454_v55 = vpop.f32.mrf.mxu0 }
 0x33f   : > { %v3522_v58 = vmul.f32 0.125, %v2270_v41  ;;  %v3526_v25 = vmul.f32 0.125, %v2454_v55 }
 0x340   : > { %v8351_v17 = vpop.f32.mrf.mxu1  ;;  %v8375_v0 = vpop.f32.mrf.mxu0 }
 0x341   : > { %v10568_v12 = vadd.f32 %v3522_v58, %v10545_v42  ;;  %v10573_v21 = vadd.f32 %v3526_v25, %v10545_v42 }
 0x342   : > { %v2273_v1 = vpop.f32.mrf.mxu1  ;;  %v2457_v10 = vpop.f32.mrf.mxu0 }
 0x343   : > { %v3595_v20 = vsel %vm3582_vm6, %v10568_v12, -inf  ;;  %v3607_v35 = vsel %vm3582_vm6, %v10573_v21, -inf }
 0x344   : > { %v8352_v39 = vpop.f32.mrf.mxu1  ;;  %v8376_v19 = vpop.f32.mrf.mxu0  ;;  %3596 = vmax.xlane.f32.xlu1 %v3595_v20 }
 0x346   : > { %v2316_v13 = vpop.f32.mrf.mxu1  ;;  %v2546_v14 = vpop.f32.mrf.mxu0 }
 0x347   : > { %v3523_v32 = vmul.f32 0.125, %v2316_v13  ;;  %v3528_v59 = vmul.f32 0.125, %v2546_v14 }
 0x348   : > { %v8357_v43 = vpop.f32.mrf.mxu1  ;;  %v8387_v56 = vpop.f32.mrf.mxu0  ;;  %3608 = vmax.xlane.f32.xlu1 %v3607_v35 }
 0x349   : > { %v10578_v36 = vadd.f32 %v3528_v59, %v10545_v42  ;;  %v10581_v44 = vadd.f32 %v3523_v32, %v10545_v42 }
 0x34a   : > { %v2319_v45 = vpop.f32.mrf.mxu1  ;;  %v2549_v41 = vpop.f32.mrf.mxu0 }
 0x34b   : > { %v3613_v55 = vsel %vm3582_vm6, %v10578_v36, -inf  ;;  %v3598_v58 = vsel %vm3582_vm6, %v10581_v44, -inf }
 0x34c   : > { %v8358_v25 = vpop.f32.mrf.mxu1  ;;  %v8388_v17 = vpop.f32.mrf.mxu0  ;;  %3614 = vmax.xlane.f32.xlu1 %v3613_v55  ;;  %3599 = vmax.xlane.f32.xlu0 %v3598_v58 }
 0x34e   : > { %v2362_v0 = vpop.f32.mrf.mxu1  ;;  %v2638_v1 = vpop.f32.mrf.mxu0 }
 0x34f   : > { %v3524_v10 = vmul.f32 0.125, %v2362_v0  ;;  %v3530_v20 = vmul.f32 0.125, %v2638_v1 }
 0x350   : > { %v8363_v39 = vpop.f32.mrf.mxu1  ;;  %v8399_v19 = vpop.f32.mrf.mxu0 }
 0x351   : > { %v10588_v13 = vadd.f32 %v3524_v10, %v10545_v42  ;;  %v10593_v35 = vadd.f32 %v3530_v20, %v10545_v42 }
 0x352   : > { %v2365_v14 = vpop.f32.mrf.mxu1  ;;  %v2641_v32 = vpop.f32.mrf.mxu0 }
 0x353   : > { %v3601_v59 = vsel %vm3582_vm6, %v10588_v13, -inf  ;;  %v3619_v25 = vsel %vm3582_vm6, %v10593_v35, -inf }
 0x354   : > { %v8364_v43 = vpop.f32.mrf.mxu1  ;;  %v8400_v56 = vpop.f32.mrf.mxu0  ;;  %3602 = vmax.xlane.f32.xlu1 %v3601_v59 }
 0x356   : > { %v2408_v45 = vpop.f32.mrf.mxu1  ;;  %v2730_v41 = vpop.f32.mrf.mxu0 }
 0x357   : > { %v3525_v55 = vmul.f32 0.125, %v2408_v45  ;;  %v3532_v58 = vmul.f32 0.125, %v2730_v41 }
 0x358   : > { %v8369_v17 = vpop.f32.mrf.mxu1  ;;  %3620 = vmax.xlane.f32.xlu1 %v3619_v25  ;;  %v8411_v0 = vpop.f32.mrf.mxu0 }
 0x359   : > { %v10598_v1 = vadd.f32 %v3525_v55, %v10545_v42  ;;  %v10601_v10 = vadd.f32 %v3532_v58, %v10545_v42 }
 0x35a   : > { %v2411_v20 = vpop.f32.mrf.mxu1  ;;  %v2733_v39 = vpop.f32.mrf.mxu0 }
 0x35b   : > { %v3604_v19 = vsel %vm3582_vm6, %v10598_v1, -inf  ;;  %v3625_v14 = vsel %vm3582_vm6, %v10601_v10, -inf }
 0x35c   : > { %v8370_v32 = vpop.f32.mrf.mxu1  ;;  %3605 = vmax.xlane.f32.xlu0 %v3604_v19  ;;  %3626 = vmax.xlane.f32.xlu1 %v3625_v14  ;;  %v8412_v59 = vpop.f32.mrf.mxu0 }
 0x35e   : > { %v2500_v43 = vpop.f32.mrf.mxu1 }
 0x35f   : > { %v3527_v56 = vmul.f32 0.125, %v2500_v43 }
 0x360   : > { %v8381_v45 = vpop.f32.mrf.mxu1 }
 0x361   : > { %v10608_v41 = vadd.f32 %v3527_v56, %v10545_v42 }
 0x362   : > { %v2503_v55 = vpop.f32.mrf.mxu1 }
 0x363   : > { %v3610_v58 = vsel %vm3582_vm6, %v10608_v41, -inf }
 0x364   : > { %v8382_v25 = vpop.f32.mrf.mxu1  ;;  %3611 = vmax.xlane.f32.xlu0 %v3610_v58 }
 0x366   : > { %v2592_v17 = vpop.f32.mrf.mxu1 }
 0x367   : > { %v3529_v0 = vmul.f32 0.125, %v2592_v17 }
 0x368   : > { %v8393_v20 = vpop.f32.mrf.mxu1 }
 0x369   : > { %v10613_v39 = vadd.f32 %v3529_v0, %v10545_v42 }
 0x36a   : > { %v2595_v19 = vpop.f32.mrf.mxu1 }
 0x36b   : > { %v3616_v14 = vsel %vm3582_vm6, %v10613_v39, -inf }
 0x36c   : > { %v8394_v32 = vpop.f32.mrf.mxu1  ;;  %3617 = vmax.xlane.f32.xlu0 %v3616_v14 }
 0x36e   : > { %v2684_v59 = vpop.f32.mrf.mxu1 }
 0x36f   : > { %v3531_v43 = vmul.f32 0.125, %v2684_v59 }
 0x370   : > { %v8405_v56 = vpop.f32.mrf.mxu1 }
 0x371   : > { %v10618_v45 = vadd.f32 %v3531_v43, %v10545_v42 }
 0x372   : > { %v2687_v55 = vpop.f32.mrf.mxu1 }
 0x373   : > { %v3622_v58 = vsel %vm3582_vm6, %v10618_v45, -inf }
 0x374   : > { %v8406_v25 = vpop.f32.mrf.mxu1  ;;  %3623 = vmax.xlane.f32.xlu0 %v3622_v58 }
 0x376   : > { %v2776_v17 = vpop.f32.mrf.mxu1 }
 0x377   : > { %v3533_v0 = vmul.f32 0.125, %v2776_v17 }
 0x378   : > { %v8417_v20 = vpop.f32.mrf.mxu1 }
 0x379   : > { %v10623_v19 = vadd.f32 %v3533_v0, %v10545_v42 }
 0x37a   : > { %v2779_v32 = vpop.f32.mrf.mxu1 }
 0x37b   : > { %v3628_v14 = vsel %vm3582_vm6, %v10623_v19, -inf }
 0x37c   : > { %v8418_v59 = vpop.f32.mrf.mxu1  ;;  %3629 = vmax.xlane.f32.xlu0 %v3628_v14 }
 0x391   : > { %v2822_v43 = vpop.f32.mrf.mxu0 }
 0x392   : > { %v3534_v56 = vmul.f32 0.125, %v2822_v43 }
 0x393   : > { %v8423_v55 = vpop.f32.mrf.mxu0 }
 0x394   : > { %v10628_v60 = vadd.f32 %v3534_v56, %v10545_v42 }
 0x395   : > { %v2825_v25 = vpop.f32.mrf.mxu0  ;;  %v2868_v58 = vpop.f32.mrf.mxu1 }
 0x396   : > { %v3535_v17 = vmul.f32 0.125, %v2868_v58  ;;  %v3631_v0 = vsel %vm3582_vm6, %v10628_v60, -inf }
 0x397   : > { %v8429_v20 = vpop.f32.mrf.mxu1  ;;  %3632 = vmax.xlane.f32.xlu1 %v3631_v0  ;;  %v8424_v32 = vpop.f32.mrf.mxu0 }
 0x398   : > { %v10637_v14 = vadd.f32 %v3535_v17, %v10545_v42 }
 0x399   : > { %v2871_v59 = vpop.f32.mrf.mxu1  ;;  %v2914_v43 = vpop.f32.mrf.mxu0 }
 0x39a   : > { %v3536_v56 = vmul.f32 0.125, %v2914_v43  ;;  %v3634_v55 = vsel %vm3582_vm6, %v10637_v14, -inf }
 0x39b   : > { %v8430_v25 = vpop.f32.mrf.mxu1  ;;  %3635 = vmax.xlane.f32.xlu0 %v3634_v55  ;;  %v8435_v58 = vpop.f32.mrf.mxu0 }
 0x39c   : > { %v10644_v20 = vadd.f32 %v3536_v56, %v10545_v42 }
 0x39d   : > { %v2917_v0 = vpop.f32.mrf.mxu0  ;;  %v2960_v32 = vpop.f32.mrf.mxu1 }
 0x39e   : > { %v3537_v17 = vmul.f32 0.125, %v2960_v32  ;;  %v3637_v59 = vsel %vm3582_vm6, %v10644_v20, -inf }
 0x39f   : > { %v8441_v43 = vpop.f32.mrf.mxu1  ;;  %3638 = vmax.xlane.f32.xlu1 %v3637_v59  ;;  %v8436_v16 = vpop.f32.mrf.mxu0 }
 0x3a0   : > { %v10651_v25 = vadd.f32 %v3537_v17, %v10545_v42 }
 0x3a1   : > { %v2963_v55 = vpop.f32.mrf.mxu1  ;;  %v3006_v58 = vpop.f32.mrf.mxu0 }
 0x3a2   : > { %v3538_v56 = vmul.f32 0.125, %v3006_v58  ;;  %v3640_v0 = vsel %vm3582_vm6, %v10651_v25, -inf }
 0x3a3   : > { %v8442_v15 = vpop.f32.mrf.mxu1  ;;  %3641 = vmax.xlane.f32.xlu0 %v3640_v0  ;;  %v8447_v32 = vpop.f32.mrf.mxu0 }
 0x3a4   : > { %v10660_v43 = vadd.f32 %v3538_v56, %v10545_v42 }
 0x3a5   : > { %v3009_v16 = vpop.f32.mrf.mxu0  ;;  %v3052_v59 = vpop.f32.mrf.mxu1 }
 0x3a6   : > { %v3539_v17 = vmul.f32 0.125, %v3052_v59  ;;  %v3643_v55 = vsel %vm3582_vm6, %v10660_v43, -inf }
 0x3a7   : > { %v8453_v62 = vpop.f32.mrf.mxu1  ;;  %3644 = vmax.xlane.f32.xlu1 %v3643_v55  ;;  %v8448_v58 = vpop.f32.mrf.mxu0 }
 0x3a8   : > { %v10667_v15 = vadd.f32 %v3539_v17, %v10545_v42 }
 0x3a9   : > { %v3055_v0 = vpop.f32.mrf.mxu1  ;;  %v3098_v32 = vpop.f32.mrf.mxu0 }
 0x3aa   : > { %v3540_v56 = vmul.f32 0.125, %v3098_v32  ;;  %v3646_v16 = vsel %vm3582_vm6, %v10667_v15, -inf }
 0x3ab   : > { %v8454_v59 = vpop.f32.mrf.mxu1  ;;  %3647 = vmax.xlane.f32.xlu0 %v3646_v16  ;;  %v8459_v47 = vpop.f32.mrf.mxu0 }
 0x3ac   : > { %v10674_v62 = vadd.f32 %v3540_v56, %v10545_v42  ;;  %v10682_v47 = vpop.permute.xlu1 %2023 }
 0x3ad   : > { %v3144_v55 = vpop.f32.mrf.mxu1  ;;  %v3585_v58 = vpop.xlane.xlu0 %3584  ;;  %12774 = vst [vmem:[#allocation57_spill] sm:$0xff] %v10682_v47 }
 0x3ae   : > { %v3541_v40 = vmul.f32 0.125, %v3144_v55  ;;  %v3679_v17 = vsub.f32 %v10548_v52, %v3585_v58  ;;  %v3101_v31 = vpop.f32.mrf.mxu0  ;;  %v3649_v0 = vsel %vm3582_vm6, %v10674_v62, -inf }
 0x3af   : > { %v8465_v50 = vpop.f32.mrf.mxu1  ;;  %3650 = vmax.xlane.f32.xlu1 %v3649_v0 }
 0x3b0   : > { %v3711_v32 = vmul.f32 1.442695, %v3679_v17  ;;  %v8460_v29 = vpop.f32.mrf.mxu0  ;;  %v10680_v59 = vadd.f32 %v3541_v40, %v10545_v42 }
 0x3b1   : > { %v3147_v56 = vpop.f32.mrf.mxu1 }
 0x3b2   : > { %v3190_v16 = vpop.f32.mrf.mxu0  ;;  %v3652_v55 = vsel %vm3582_vm6, %v10680_v59, -inf  ;;  %8998 = vpow2.f32 %v3711_v32 }
 0x3b3   : > { %v3542_v52 = vmul.f32 0.125, %v3190_v16  ;;  %v8466_v31 = vpop.f32.mrf.mxu1  ;;  %3653 = vmax.xlane.f32.xlu0 %v3652_v55 }
 0x3b4   : > { %v8471_v58 = vpop.f32.mrf.mxu0 }
 0x3b5   : > { %v3588_v28 = vpop.xlane.xlu1 %3587  ;;  %v3236_v50 = vpop.f32.mrf.mxu1  ;;  %v10687_v17 = vadd.f32 %v3542_v52, %v10545_v42 }
 0x3b6   : > { %v3680_v29 = vsub.f32 %v10553_v7, %v3588_v28  ;;  %v3193_v40 = vpop.f32.mrf.mxu0  ;;  %v3543_v0 = vmul.f32 0.125, %v3236_v50 }
 0x3b7   : > { %v8477_v2 = vpop.f32.mrf.mxu1  ;;  %v3655_v56 = vsel %vm3582_vm6, %v10687_v17, -inf }
 0x3b8   : > { %v3713_v27 = vmul.f32 1.442695, %v3680_v29  ;;  %3656 = vmax.xlane.f32.xlu1 %v3655_v56  ;;  %v8472_v32 = vpop.f32.mrf.mxu0  ;;  %v10693_v16 = vadd.f32 %v3543_v0, %v10545_v42 }
 0x3b9   : > { %v3239_v55 = vpop.f32.mrf.mxu1 }
 0x3ba   : > { %9000 = vpow2.f32 %v3713_v27  ;;  %v3282_v31 = vpop.f32.mrf.mxu0  ;;  %v3658_v52 = vsel %vm3582_vm6, %v10693_v16, -inf }
 0x3bb   : > { %v3544_v58 = vmul.f32 0.125, %v3282_v31  ;;  %v8478_v28 = vpop.f32.mrf.mxu1  ;;  %3659 = vmax.xlane.f32.xlu0 %v3658_v52 }
 0x3bc   : > { %v8483_v7 = vpop.f32.mrf.mxu0 }
 0x3bd   : > { %v3328_v2 = vpop.f32.mrf.mxu1  ;;  %v3591_v50 = vpop.xlane.xlu0 %3590  ;;  %v10698_v40 = vadd.f32 %v3544_v58, %v10545_v42 }
 0x3be   : > { %v3545_v29 = vmul.f32 0.125, %v3328_v2  ;;  %v3681_v56 = vsub.f32 %v10558_v24, %v3591_v50  ;;  %v3285_v0 = vpop.f32.mrf.mxu0 }
 0x3bf   : > { %v8489_v32 = vpop.f32.mrf.mxu1  ;;  %v3661_v27 = vsel %vm3582_vm6, %v10698_v40, -inf  ;;  %v10703_v55 = vpop.eup %8998 }
 0x3c0   : > { %v3715_v5 = vmul.f32 1.442695, %v3681_v56  ;;  %3662 = vmax.xlane.f32.xlu1 %v3661_v27  ;;  %v8484_v31 = vpop.f32.mrf.mxu0  ;;  %v10706_v52 = vadd.f32 %v3545_v29, %v10545_v42  ;;  %v3775_v50 = vsel %vm3582_vm6, %v10703_v55, 0.0 }
 0x3c1   : > { %v3331_v28 = vpop.f32.mrf.mxu1 }
 0x3c2   : > { %v3374_v7 = vpop.f32.mrf.mxu0  ;;  %v3664_v58 = vsel %vm3582_vm6, %v10706_v52, -inf  ;;  %9002 = vpow2.f32 %v3715_v5 }
 0x3c3   : > { %v3546_v24 = vmul.f32 0.125, %v3374_v7  ;;  %v8490_v2 = vpop.f32.mrf.mxu1  ;;  %3665 = vmax.xlane.f32.xlu0 %v3664_v58 }
 0x3c4   : > { %3776 = vadd.xlane.f32.xlu1 %v3775_v50  ;;  %v8495_v0 = vpop.f32.mrf.mxu0 }
 0x3c5   : > { %v3420_v56 = vpop.f32.mrf.mxu1  ;;  %v3594_v32 = vpop.xlane.xlu0 %3593  ;;  %v10713_v27 = vadd.f32 %v3546_v24, %v10545_v42 }
 0x3c6   : > { %v3547_v29 = vmul.f32 0.125, %v3420_v56  ;;  %v3682_v31 = vsub.f32 %v10563_v61, %v3594_v32  ;;  %v3377_v28 = vpop.f32.mrf.mxu0 }
 0x3c7   : > { %v10716_v47 = vpop.eup %9000  ;;  %v8501_v5 = vpop.f32.mrf.mxu1  ;;  %v3667_v7 = vsel %vm3582_vm6, %v10713_v27, -inf }
 0x3c8   : > { %v3717_v58 = vmul.f32 1.442695, %v3682_v31  ;;  %3668 = vmax.xlane.f32.xlu1 %v3667_v7  ;;  %v8496_v2 = vpop.f32.mrf.mxu0  ;;  %v3778_v50 = vsel %vm3582_vm6, %v10716_v47, 0.0  ;;  %v10723_v0 = vadd.f32 %v3547_v29, %v10545_v42 }
 0x3c9   : > { %v3423_v24 = vpop.f32.mrf.mxu1  ;;  %3779 = vadd.xlane.f32.xlu0 %v3778_v50 }
 0x3ca   : > { %9004 = vpow2.f32 %v3717_v58  ;;  %v3466_v61 = vpop.f32.mrf.mxu0  ;;  %v3670_v5 = vsel %vm3582_vm6, %v10723_v0, -inf }
 0x3cb   : > { %v3548_v56 = vmul.f32 0.125, %v3466_v61  ;;  %v8502_v32 = vpop.f32.mrf.mxu1 }
 0x3cc   : > { %v8507_v28 = vpop.f32.mrf.mxu0 }
 0x3cd   : > { %v3512_v63 = vpop.f32.mrf.mxu1  ;;  %3671 = vmax.xlane.f32.xlu0 %v3670_v5  ;;  %v10728_v31 = vadd.f32 %v3548_v56, %v10545_v42  ;;  %v10753_v5 = vpack.c.bf16 %v10260_v48, %v10260_v48 }
 0x3ce   : > { %v3549_v7 = vmul.f32 0.125, %v3512_v63  ;;  %v3469_v2 = vpop.f32.mrf.mxu0 }
 0x3cf   : > { %v8513_v46 = vpop.f32.mrf.mxu1  ;;  %v3673_v29 = vsel %vm3582_vm6, %v10728_v31, -inf  ;;  %v10732_v50 = vpop.eup %9002 }
 0x3d0   : > { %3674 = vmax.xlane.f32.xlu1 %v3673_v29  ;;  %v8508_v58 = vpop.f32.mrf.mxu0  ;;  %v10735_v24 = vadd.f32 %v3549_v7, %v10545_v42  ;;  %v3781_v63 = vsel %vm3582_vm6, %v10732_v50, 0.0  ;;  %v10747_v42 = vpack.c.bf16 %v10244_v33, %v10244_v33  ;;  %v1788_v7 = vadd.f32 %v10262_v51, %v10237_v23  ;;  %v3597_v2 = vpop.xlane.xlu1 %3596 }
 0x3d1   : > { %v3515_v61 = vpop.f32.mrf.mxu1 }
 0x3d2   : > { %v3676_v32 = vsel %vm3582_vm6, %v10735_v24, -inf  ;;  %v10759_v29 = vpack.c.bf16 %v1788_v7, %v1788_v7  ;;  %v3683_v61 = vsub.f32 %v10568_v12, %v3597_v2 }
 0x3d3   : > { %v8514_v28 = vpop.f32.mrf.mxu1  ;;  %3677 = vmax.xlane.f32.xlu0 %v3676_v32 }
 0x3d4   : > { %3782 = vadd.xlane.f32.xlu1 %v3781_v63  ;;  %v3609_v58 = vpop.xlane.xlu1 %3608  ;;  %v3719_v63 = vmul.f32 1.442695, %v3683_v61 }
 0x3d5   : > { %v3600_v33 = vpop.xlane.xlu0 %3599  ;;  %v3687_v51 = vsub.f32 %v10573_v21, %v3609_v58 }
 0x3d6   : > { %v3684_v48 = vsub.f32 %v10581_v44, %v3600_v33  ;;  %9006 = vpow2.f32 %v3719_v63 }
 0x3d7   : > { %v10741_v46 = vpop.eup %9004  ;;  %v3727_v49 = vmul.f32 1.442695, %v3687_v51 }
 0x3d8   : > { %v3784_v56 = vsel %vm3582_vm6, %v10741_v46, 0.0  ;;  %v3615_v32 = vpop.xlane.xlu1 %3614 }
 0x3d9   : > { %3785 = vadd.xlane.f32.xlu0 %v3784_v56  ;;  %v3721_v56 = vmul.f32 1.442695, %v3684_v48  ;;  %v3689_v4 = vsub.f32 %v10578_v36, %v3615_v32 }
 0x3db   : > { %9008 = vpow2.f32 %v3721_v56  ;;  %v3731_v44 = vmul.f32 1.442695, %v3689_v4 }
 0x3dc   : > { %9010 = vpow2.f32 %v3727_v49 }
 0x3dd   : > { %v3603_v3 = vpop.xlane.xlu1 %3602 }
 0x3de   : > { %v3685_v33 = vsub.f32 %v10588_v13, %v3603_v3 }
 0x3e0   : > { %v3723_v61 = vmul.f32 1.442695, %v3685_v33 }
 0x3e1   : > { %v3621_v30 = vpop.xlane.xlu1 %3620 }
 0x3e2   : > { %v3691_v48 = vsub.f32 %v10593_v35, %v3621_v30 }
 0x3e3   : > { %v10774_v3 = vpop.eup %9006 }
 0x3e4   : > { %v3735_v49 = vmul.f32 1.442695, %v3691_v48  ;;  %v3787_v35 = vsel %vm3582_vm6, %v10774_v3, 0.0 }
 0x3e5   : > { %2027 = vrot.lane.b32.xlu1 %v10747_v42, %s9651_s27  ;;  %v3606_v28 = vpop.xlane.xlu0 %3605  ;;  %v3627_v36 = vpop.xlane.xlu1 %3626 }
 0x3e6   : > { %v3686_v8 = vsub.f32 %v10598_v1, %v3606_v28  ;;  %v3693_v4 = vsub.f32 %v10601_v10, %v3627_v36 }
 0x3e8   : > { %v3725_v18 = vmul.f32 1.442695, %v3686_v8  ;;  %v3739_v30 = vmul.f32 1.442695, %v3693_v4 }
 0x3e9   : > { %2029 = vrot.lane.b32.xlu1 %v10753_v5, %s9651_s27 }
 0x3ea   : > { %9012 = vpow2.f32 %v3725_v18 }
 0x3eb   : > { %9014 = vpow2.f32 %v3731_v44 }
 0x3ed   : > { %v3612_v7 = vpop.xlane.xlu0 %3611 }
 0x3ee   : > { %v3688_v12 = vsub.f32 %v10608_v41, %v3612_v7 }
 0x3ef   : > { %2025 = vrot.lane.b32.xlu0 %v10759_v29, %s9651_s27 }
 0x3f0   : > { %v3729_v21 = vmul.f32 1.442695, %v3688_v12 }
 0x3f2   : > { %9016 = vpow2.f32 %v3729_v21 }
 0x3f3   : > { %9018 = vpow2.f32 %v3723_v61 }
 0x3f5   : > { %v3618_v2 = vpop.xlane.xlu0 %3617 }
 0x3f6   : > { %v3690_v58 = vsub.f32 %v10613_v39, %v3618_v2  ;;  %v10777_v39 = vpop.eup %9008 }
 0x3f7   : > { %v10781_v28 = vpop.eup %9010  ;;  %v3790_v10 = vsel %vm3582_vm6, %v10777_v39, 0.0 }
 0x3f8   : > { %v3733_v8 = vmul.f32 1.442695, %v3690_v58  ;;  %v10785_v63 = vpop.eup %9012 }
 0x3f9   : > { %v10789_v51 = vpop.eup %9014  ;;  %v3796_v56 = vsel %vm3582_vm6, %v10785_v63, 0.0 }
 0x3fa   : > { %9020 = vpow2.f32 %v3733_v8  ;;  %v3805_v12 = vsel %vm3582_vm6, %v10789_v51, 0.0 }
 0x3fb   : > { %9022 = vpow2.f32 %v3735_v49 }
 0x3fd   : > { %v3624_v1 = vpop.xlane.xlu0 %3623 }
 0x3fe   : > { %v3692_v41 = vsub.f32 %v10618_v45, %v3624_v1 }
 0x3ff   : > { %v10793_v7 = vpop.eup %9016 }
 0x400   : > { %v3737_v18 = vmul.f32 1.442695, %v3692_v41  ;;  %v10797_v2 = vpop.eup %9018  ;;  %v3802_v44 = vsel %vm3582_vm6, %v10793_v7, 0.0 }
 0x401   : > { %v3793_v21 = vsel %vm3582_vm6, %v10797_v2, 0.0 }
 0x402   : > { %9024 = vpow2.f32 %v3737_v18 }
 0x403   : > { %9026 = vpow2.f32 %v3739_v30 }
 0x405   : > { %v3630_v32 = vpop.xlane.xlu0 %3629 }
 0x406   : > { %v3694_v13 = vsub.f32 %v10623_v19, %v3630_v32  ;;  %v3799_v19 = vsel %vm3582_vm6, %v10781_v28, 0.0 }
 0x407   : > { %v10801_v33 = vpop.eup %9020 }
 0x408   : > { %v3741_v45 = vmul.f32 1.442695, %v3694_v13  ;;  %v10805_v58 = vpop.eup %9022  ;;  %v3808_v1 = vsel %vm3582_vm6, %v10801_v33, 0.0 }
 0x409   : > { %v3811_v48 = vsel %vm3582_vm6, %v10805_v58, 0.0 }
 0x40a   : > { %9028 = vpow2.f32 %v3741_v45 }
 0x40d   : > { %3788 = vadd.xlane.f32.xlu1 %v3787_v35 }
 0x40e   : > { %3791 = vadd.xlane.f32.xlu0 %v3790_v10 }
 0x40f   : > { %v10809_v61 = vpop.eup %9024 }
 0x410   : > { %v10813_v36 = vpop.eup %9026  ;;  %v3814_v8 = vsel %vm3582_vm6, %v10809_v61, 0.0 }
 0x411   : > { %3800 = vadd.xlane.f32.xlu1 %v3799_v19  ;;  %v3817_v49 = vsel %vm3582_vm6, %v10813_v36, 0.0 }
 0x412   : > { %3797 = vadd.xlane.f32.xlu0 %v3796_v56 }
 0x415   : > { %3806 = vadd.xlane.f32.xlu1 %v3805_v12 }
 0x416   : > { %3803 = vadd.xlane.f32.xlu0 %v3802_v44 }
 0x417   : > { %v10817_v41 = vpop.eup %9028 }
 0x418   : > { %v3820_v18 = vsel %vm3582_vm6, %v10817_v41, 0.0 }
 0x419   : > { %3794 = vadd.xlane.f32.xlu1 %v3793_v21 }
 0x41a   : > { %3809 = vadd.xlane.f32.xlu0 %v3808_v1 }
 0x41d   : > { %3812 = vadd.xlane.f32.xlu1 %v3811_v48 }
 0x41e   : > { %3815 = vadd.xlane.f32.xlu0 %v3814_v8 }
 0x420   : > { %v3633_v32 = vpop.xlane.xlu1 %3632 }
 0x421   : > { %v3695_v4 = vsub.f32 %v10628_v60, %v3633_v32  ;;  %3818 = vadd.xlane.f32.xlu1 %v3817_v49 }
 0x422   : > { %3821 = vadd.xlane.f32.xlu0 %v3820_v18 }
 0x423   : > { %v3743_v13 = vmul.f32 1.442695, %v3695_v4 }
 0x424   : > { %v3636_v30 = vpop.xlane.xlu0 %3635 }
 0x425   : > { %9030 = vpow2.f32 %v3743_v13  ;;  %v3696_v35 = vsub.f32 %v10637_v14, %v3636_v30 }
 0x427   : > { %v3745_v45 = vmul.f32 1.442695, %v3696_v35 }
 0x428   : > { %v3639_v10 = vpop.xlane.xlu1 %3638 }
 0x429   : > { %9032 = vpow2.f32 %v3745_v45  ;;  %v3697_v19 = vsub.f32 %v10644_v20, %v3639_v10 }
 0x42b   : > { %v3747_v56 = vmul.f32 1.442695, %v3697_v19 }
 0x42c   : > { %v3642_v12 = vpop.xlane.xlu0 %3641 }
 0x42d   : > { %9034 = vpow2.f32 %v3747_v56  ;;  %v3698_v60 = vsub.f32 %v10651_v25, %v3642_v12 }
 0x42f   : > { %v3749_v44 = vmul.f32 1.442695, %v3698_v60 }
 0x430   : > { %v3645_v21 = vpop.xlane.xlu1 %3644 }
 0x431   : > { %9036 = vpow2.f32 %v3749_v44  ;;  %v3699_v1 = vsub.f32 %v10660_v43, %v3645_v21 }
 0x432   : > { %v10828_v48 = vpop.eup %9030 }
 0x433   : > { %v3751_v8 = vmul.f32 1.442695, %v3699_v1  ;;  %v3823_v14 = vsel %vm3582_vm6, %v10828_v48, 0.0 }
 0x434   : > { %v3648_v32 = vpop.xlane.xlu0 %3647  ;;  %3824 = vadd.xlane.f32.xlu1 %v3823_v14 }
 0x435   : > { %9038 = vpow2.f32 %v3751_v8  ;;  %v3700_v20 = vsub.f32 %v10667_v15, %v3648_v32 }
 0x436   : > { %v10833_v49 = vpop.eup %9032 }
 0x437   : > { %v3753_v4 = vmul.f32 1.442695, %v3700_v20  ;;  %v3826_v25 = vsel %vm3582_vm6, %v10833_v49, 0.0 }
 0x438   : > { %3827 = vadd.xlane.f32.xlu0 %v3826_v25  ;;  %v3651_v18 = vpop.xlane.xlu1 %3650 }
 0x439   : > { %9040 = vpow2.f32 %v3753_v4  ;;  %v3701_v43 = vsub.f32 %v10674_v62, %v3651_v18 }
 0x43a   : > { %v10838_v13 = vpop.eup %9034 }
 0x43b   : > { %v3755_v30 = vmul.f32 1.442695, %v3701_v43  ;;  %v3829_v35 = vsel %vm3582_vm6, %v10838_v13, 0.0 }
 0x43c   : > { %v3654_v45 = vpop.xlane.xlu0 %3653  ;;  %3830 = vadd.xlane.f32.xlu1 %v3829_v35 }
 0x43d   : > { %9042 = vpow2.f32 %v3755_v30  ;;  %v3702_v15 = vsub.f32 %v10680_v59, %v3654_v45 }
 0x43e   : > { %v10843_v10 = vpop.eup %9036 }
 0x43f   : > { %v3757_v19 = vmul.f32 1.442695, %v3702_v15  ;;  %v3832_v56 = vsel %vm3582_vm6, %v10843_v10, 0.0 }
 0x440   : > { %3833 = vadd.xlane.f32.xlu0 %v3832_v56 }
 0x441   : > { %9044 = vpow2.f32 %v3757_v19  ;;  %v3657_v62 = vpop.xlane.xlu1 %3656 }
 0x442   : > { %v10847_v12 = vpop.eup %9038  ;;  %v3703_v60 = vsub.f32 %v10687_v17, %v3657_v62 }
 0x443   : > { %v3835_v44 = vsel %vm3582_vm6, %v10847_v12, 0.0 }
 0x444   : > { %v3759_v21 = vmul.f32 1.442695, %v3703_v60  ;;  %v3660_v1 = vpop.xlane.xlu0 %3659  ;;  %3836 = vadd.xlane.f32.xlu1 %v3835_v44 }
 0x445   : > { %v3704_v59 = vsub.f32 %v10693_v16, %v3660_v1 }
 0x446   : > { %v10853_v8 = vpop.eup %9040  ;;  %9046 = vpow2.f32 %v3759_v21 }
 0x447   : > { %v3761_v14 = vmul.f32 1.442695, %v3704_v59  ;;  %v3838_v32 = vsel %vm3582_vm6, %v10853_v8, 0.0 }
 0x448   : > { %3839 = vadd.xlane.f32.xlu0 %v3838_v32 }
 0x449   : > { %9048 = vpow2.f32 %v3761_v14  ;;  %v3663_v20 = vpop.xlane.xlu1 %3662 }
 0x44a   : > { %v10857_v4 = vpop.eup %9042  ;;  %v3705_v17 = vsub.f32 %v10698_v40, %v3663_v20 }
 0x44b   : > { %v3841_v25 = vsel %vm3582_vm6, %v10857_v4, 0.0 }
 0x44c   : > { %v3763_v18 = vmul.f32 1.442695, %v3705_v17  ;;  %v3666_v43 = vpop.xlane.xlu0 %3665  ;;  %3842 = vadd.xlane.f32.xlu1 %v3841_v25 }
 0x44d   : > { %v3706_v16 = vsub.f32 %v10706_v52, %v3666_v43  ;;  %v3777_v30 = vpop.xlane.xlu1 %3776 }
 0x44e   : > { %v10863_v35 = vpop.eup %9044  ;;  %9050 = vpow2.f32 %v3763_v18 }
 0x44f   : > { %v3765_v45 = vmul.f32 1.442695, %v3706_v16  ;;  %9052 = vrcp.f32 %v3777_v30  ;;  %v3844_v15 = vsel %vm3582_vm6, %v10863_v35, 0.0  ;;  %v4063_v30 = vsel %vm836_vm0, %v10390_v34, 0 }
 0x450   : > { %3845 = vadd.xlane.f32.xlu0 %v3844_v15  ;;  %v1804_v34 = vadd.f32 %v10542_v57, %v10237_v23  ;;  %v10913_v57 = vpack.c.bf16 %v10279_v22, %v10279_v22 }
 0x451   : > { %9054 = vpow2.f32 %v3765_v45  ;;  %v3669_v62 = vpop.xlane.xlu1 %3668 }
 0x452   : > { %v3780_v40 = vpop.xlane.xlu0 %3779 }
 0x453   : > { %v10867_v19 = vpop.eup %9046  ;;  %9056 = vrcp.f32 %v3780_v40 }
 0x454   : > { %v3847_v56 = vsel %vm3582_vm6, %v10867_v19, 0.0 }
 0x455   : > { %3848 = vadd.xlane.f32.xlu1 %v3847_v56  ;;  %v4109_v56 = vsel %vm836_vm0, %v10379_v54, 0 }
 0x456   : > { %v10871_v52 = vpop.eup %9048  ;;  %v3672_v21 = vpop.xlane.xlu0 %3671 }
 0x457   : > { %v3850_v60 = vsel %vm3582_vm6, %v10871_v52, 0.0 }
 0x458   : > { %3851 = vadd.xlane.f32.xlu0 %v3850_v60  ;;  %v10899_v60 = vpack.c.bf16 %v1804_v34, %v1804_v34 }
 0x459   : > { %v3675_v44 = vpop.xlane.xlu1 %3674 }
 0x45b   : > { %v10875_v1 = vpop.eup %9050 }
 0x45c   : > { %v9053_v59 = vpop.eup %9052  ;;  %v3853_v14 = vsel %vm3582_vm6, %v10875_v1, 0.0  ;;  %v3678_v25 = vpop.xlane.xlu0 %3677 }
 0x45d   : > { %3854 = vadd.xlane.f32.xlu1 %v3853_v14  ;;  %v3783_v32 = vpop.xlane.xlu1 %3782  ;;  %v3903_v20 = vmul.f32 %v9053_v59, %v10703_v55  ;;  %v12775_v55 = vmov 0.0  }
 0x45e   : > { %v10880_v17 = vpop.eup %9054  ;;  %9058 = vrcp.f32 %v3783_v32  ;;  %v4155_v32 = vsel %vm836_vm0, %v10413_v9, 0  ;;  %v4201_v9 = vsel %vm836_vm0, %v10396_v26, 0 }
 0x45f   : > { %v3935_v18 = vpack.c.bf16 %v3903_v20, %v3903_v20  ;;  %v3856_v43 = vsel %vm3582_vm6, %v10880_v17, 0.0 }
 0x460   : > { %v9057_v16 = vpop.eup %9056  ;;  %3857 = vadd.xlane.f32.xlu0 %v3856_v43 }
 0x461   : > { %8518 = vmatmul.mubr.msk.bf16.vlgmr.msra.gmra.mxu0 %vm3582_vm6, %v3935_v18  ;;  %v3904_v45 = vmul.f32 %v9057_v16, %v10716_v47  ;;  %v3709_v18 = vsub.f32 %v10728_v31, %v3675_v44  ;;  %v3710_v16 = vsub.f32 %v10735_v24, %v3678_v25 }
 0x462   : > { %8528 = vmatpush3.bf16.msra.mxu0 %v4063_v30  ;;  %v3786_v15 = vpop.xlane.xlu0 %3785  ;;  %8529 = vmatprep.mubr.msk.bf16.mxu0 %vm9650_vm3, %v12775_v55 }
 0x463   : > { %9060 = vrcp.f32 %v3786_v15  ;;  %v3936_v40 = vpack.c.bf16 %v3904_v45, %v3904_v45  ;;  %8539 = vmatprep.subr.bf16.mxu0 %v12775_v55  ;;  %v3771_v26 = vmul.f32 1.442695, %v3709_v18  ;;  %v3773_v30 = vmul.f32 1.442695, %v3710_v16  ;;  %v10927_v45 = vpop.permute.xlu1 %2027 }
 0x464   : > { %v4247_v16 = vsel %vm836_vm0, %v10422_v38, 0  ;;  %v10971_v38 = vpack.c.bf16 %v10272_v6, %v10272_v6 }
 0x465   : > { %8524 = vmatmul.mubr.msk.bf16.vlgmr.msra.gmra.mxu1 %vm3582_vm6, %v3936_v40 }
 0x466   : > { %8534 = vmatpush3.bf16.msra.mxu1 %v4109_v56  ;;  %8535 = vmatprep.mubr.msk.bf16.mxu1 %vm9650_vm3, %v12775_v55  ;;  %v10939_v24 = vpop.permute.xlu0 %2025 }
 0x467   : > { %8545 = vmatprep.subr.bf16.mxu1 %v12775_v55  ;;  %v10937_v31 = vpop.permute.xlu1 %2029 }
 0x46b   : > { %v9059_v47 = vpop.eup %9058 }
 0x46c   : > { %v3905_v59 = vmul.f32 %v9059_v47, %v10732_v50  ;;  %v3707_v50 = vsub.f32 %v10713_v27, %v3669_v62 }
 0x46e   : > { %2033 = vrot.lane.b32.xlu1 %v10899_v60, %s9651_s27  ;;  %v3937_v54 = vpack.c.bf16 %v3905_v59, %v3905_v59  ;;  %v3767_v22 = vmul.f32 1.442695, %v3707_v50 }
 0x470   : > { %v9061_v14 = vpop.eup %9060  ;;  %8530 = vmatmul.mubr.msk.bf16.vlgmr.msra.gmra.mxu0 %vm3582_vm6, %v3937_v54  ;;  %9062 = vpow2.f32 %v3767_v22 }
 0x471   : > { %v3906_v20 = vmul.f32 %v9061_v14, %v10741_v46  ;;  %8540 = vmatpush3.bf16.msra.mxu0 %v4155_v32  ;;  %8541 = vmatprep.mubr.msk.bf16.mxu0 %vm9650_vm3, %v12775_v55  ;;  %v3708_v46 = vsub.f32 %v10723_v0, %v3672_v21 }
 0x472   : > { %8551 = vmatprep.subr.bf16.mxu0 %v12775_v55 }
 0x473   : > { %v3938_v23 = vpack.c.bf16 %v3906_v20, %v3906_v20  ;;  %v3769_v43 = vmul.f32 1.442695, %v3708_v46 }
 0x475   : > { %8536 = vmatmul.mubr.msk.bf16.vlgmr.msra.gmra.mxu1 %vm3582_vm6, %v3938_v23  ;;  %9064 = vpow2.f32 %v3769_v43 }
 0x476   : > { %8546 = vmatpush3.bf16.msra.mxu1 %v4201_v9  ;;  %2031 = vrot.lane.b32.xlu0 %v10913_v57, %s9651_s27  ;;  %9066 = vpow2.f32 %v3771_v26  ;;  %v10951_v9 = vpack.c.bf16 %v10289_v53, %v10289_v53  ;;  %v4293_v53 = vsel %vm836_vm0, %v10415_v11, 0 }
 0x477   : > { %8547 = vmatprep.mubr.msk.bf16.mxu1 %vm9650_vm3, %v12775_v55  ;;  %8557 = vmatprep.subr.bf16.mxu1 %v12775_v55  ;;  %9068 = vpow2.f32 %v3773_v30 }
 0x47d   : > { %v10929_v15 = vpop.eup %9062 }
 0x47e   : > { %v3859_v27 = vsel %vm3582_vm6, %v10929_v15, 0.0 }
 0x482   : > { %v10931_v40 = vpop.eup %9064 }
 0x483   : > { %v10935_v0 = vpop.eup %9066  ;;  %v3862_v62 = vsel %vm3582_vm6, %v10931_v40, 0.0 }
 0x484   : > { %v10943_v44 = vpop.eup %9068  ;;  %v3865_v21 = vsel %vm3582_vm6, %v10935_v0, 0.0 }
 0x485   : > { %v3868_v34 = vsel %vm3582_vm6, %v10943_v44, 0.0 }
 0x492   : > { %3860 = vadd.xlane.f32.xlu1 %v3859_v27 }
 0x495   : > { %3863 = vadd.xlane.f32.xlu0 %v3862_v62  ;;  %v4385_v62 = vsel %vm836_vm0, %v10759_v29, 0 }
 0x496   : > { %3866 = vadd.xlane.f32.xlu1 %v3865_v21  ;;  %v3789_v25 = vpop.xlane.xlu1 %3788 }
 0x497   : > { %9070 = vrcp.f32 %v3789_v25  ;;  %v3792_v56 = vpop.xlane.xlu0 %3791 }
 0x498   : > { %9072 = vrcp.f32 %v3792_v56 }
 0x499   : > { %3869 = vadd.xlane.f32.xlu0 %v3868_v34 }
 0x49a   : > { %v3801_v47 = vpop.xlane.xlu1 %3800 }
 0x49b   : > { %v3798_v59 = vpop.xlane.xlu0 %3797 }
 0x49c   : > { %9074 = vrcp.f32 %v3798_v59  ;;  %v4477_v59 = vsel %vm836_vm0, %v10753_v5, 0 }
 0x49e   : > { %v3807_v54 = vpop.xlane.xlu1 %3806 }
 0x49f   : > { %v3804_v14 = vpop.xlane.xlu0 %3803 }
 0x4a2   : > { %v3795_v32 = vpop.xlane.xlu1 %3794 }
 0x4a3   : > { %9076 = vrcp.f32 %v3795_v32  ;;  %v3810_v26 = vpop.xlane.xlu0 %3809  ;;  %v4431_v32 = vsel %vm836_vm0, %v10747_v42, 0 }
 0x4a4   : > { %v9071_v20 = vpop.eup %9070  ;;  %9078 = vrcp.f32 %v3804_v14 }
 0x4a5   : > { %v9073_v23 = vpop.eup %9072  ;;  %v3907_v50 = vmul.f32 %v9071_v20, %v10774_v3  ;;  %9080 = vrcp.f32 %v3801_v47 }
 0x4a6   : > { %v3908_v46 = vmul.f32 %v9073_v23, %v10777_v39  ;;  %9082 = vrcp.f32 %v3810_v26  ;;  %v3813_v56 = vpop.xlane.xlu1 %3812  ;;  %v4661_v26 = vsel %vm836_vm0, %v10951_v9, 0 }
 0x4a7   : > { %2037 = vrot.lane.b32.xlu1 %v10951_v9, %s9651_s27  ;;  %v3939_v22 = vpack.c.bf16 %v3907_v50, %v3907_v50  ;;  %9084 = vrcp.f32 %v3807_v54  ;;  %v4569_v50 = vsel %vm836_vm0, %v10899_v60, 0 }
 0x4a8   : > { %v3940_v18 = vpack.c.bf16 %v3908_v46, %v3908_v46 }
 0x4a9   : > { %v9075_v43 = vpop.eup %9074  ;;  %8542 = vmatmul.mubr.msk.bf16.vlgmr.msra.gmra.mxu0 %vm3582_vm6, %v3939_v22 }
 0x4aa   : > { %8552 = vmatpush3.bf16.msra.mxu0 %v4247_v16  ;;  %8548 = vmatmul.mubr.msk.bf16.vlgmr.msra.gmra.mxu1 %vm3582_vm6, %v3940_v18  ;;  %v3910_v3 = vmul.f32 %v9075_v43, %v10785_v63  ;;  %v3816_v63 = vpop.xlane.xlu0 %3815  ;;  %v4523_v18 = vsel %vm836_vm0, %v10913_v57, 0 }
 0x4ab   : > { %8558 = vmatpush3.bf16.msra.mxu1 %v4293_v53  ;;  %8559 = vmatprep.mubr.msk.bf16.mxu1 %vm9650_vm3, %v12775_v55  ;;  %9086 = vrcp.f32 %v3816_v63  ;;  %v12776_v63 = vld [vmem:[#allocation49_spill] sm:$0xff] }
 0x4ac   : > { %8569 = vmatprep.subr.bf16.mxu1 %v12775_v55  ;;  %8553 = vmatprep.mubr.msk.bf16.mxu0 %vm9650_vm3, %v12775_v55  ;;  %v3942_v39 = vpack.c.bf16 %v3910_v3, %v3910_v3  ;;  %9088 = vrcp.f32 %v3813_v56 }
 0x4ad   : > { %8563 = vmatprep.subr.bf16.mxu0 %v12775_v55 }
 0x4ae   : > { %v3822_v47 = vpop.xlane.xlu0 %3821 }
 0x4af   : > { %2035 = vrot.lane.b32.xlu0 %v10971_v38, %s9651_s27  ;;  %9090 = vrcp.f32 %v3822_v47 }
 0x4b0   : > { %v9077_v11 = vpop.eup %9076 }
 0x4b1   : > { %v9079_v30 = vpop.eup %9078  ;;  %v3909_v27 = vmul.f32 %v9077_v11, %v10797_v2  ;;  %v4339_v2 = vsel %vm836_vm0, %v10434_v37, 0  ;;  %v4615_v11 = vsel %vm836_vm0, %v10971_v38, 0 }
 0x4b2   : > { %8560 = vmatmul.mubr.msk.bf16.vlgmr.msra.gmra.mxu1 %vm3582_vm6, %v3942_v39  ;;  %v9081_v21 = vpop.eup %9080  ;;  %v3912_v25 = vmul.f32 %v9079_v30, %v10793_v7 }
 0x4b3   : > { %8570 = vmatpush3.bf16.msra.mxu1 %v4385_v62  ;;  %v3941_v6 = vpack.c.bf16 %v3909_v27, %v3909_v27  ;;  %8571 = vmatprep.mubr.msk.bf16.mxu1 %vm9650_vm3, %v12775_v55  ;;  %v3911_v29 = vmul.f32 %v9081_v21, %v10781_v28  ;;  %v9083_v7 = vpop.eup %9082  ;;  %v3819_v28 = vpop.xlane.xlu1 %3818  ;;  %v4753_v27 = vsel %vm836_vm0, %v12776_v63, 0  ;;  %v12777_v21 = vld [vmem:[#allocation50_spill] sm:$0xff] }
 0x4b4   : > { %8581 = vmatprep.subr.bf16.mxu1 %v12775_v55  ;;  %v3944_v34 = vpack.c.bf16 %v3912_v25, %v3912_v25  ;;  %v9085_v54 = vpop.eup %9084  ;;  %v3914_v14 = vmul.f32 %v9083_v7, %v10801_v33  ;;  %9092 = vrcp.f32 %v3819_v28  ;;  %v4707_v25 = vsel %vm836_vm0, %v12777_v21, 0 }
 0x4b5   : > { %8554 = vmatmul.mubr.msk.bf16.vlgmr.msra.gmra.mxu0 %vm3582_vm6, %v3941_v6  ;;  %v3943_v37 = vpack.c.bf16 %v3911_v29, %v3911_v29  ;;  %v3913_v5 = vmul.f32 %v9085_v54, %v10789_v51  ;;  %v12779_v54 = vld [vmem:[#allocation52_spill] sm:$0xff] }
 0x4b6   : > { %8564 = vmatpush3.bf16.msra.mxu0 %v4339_v2  ;;  %8565 = vmatprep.mubr.msk.bf16.mxu0 %vm9650_vm3, %v12775_v55  ;;  %v3946_v20 = vpack.c.bf16 %v3914_v14, %v3914_v14  ;;  %v4799_v14 = vsel %vm836_vm0, %v12779_v54, 0 }
 0x4b7   : > { %8575 = vmatprep.subr.bf16.mxu0 %v12775_v55  ;;  %v3945_v42 = vpack.c.bf16 %v3913_v5, %v3913_v5 }
 0x4b8   : > { %v9087_v33 = vpop.eup %9086 }
 0x4b9   : > { %v9089_v46 = vpop.eup %9088  ;;  %v3916_v22 = vmul.f32 %v9087_v33, %v10809_v61 }
 0x4ba   : > { %8572 = vmatmul.mubr.msk.bf16.vlgmr.msra.gmra.mxu1 %vm3582_vm6, %v3944_v34  ;;  %v3915_v60 = vmul.f32 %v9089_v46, %v10805_v58  ;;  %v12778_v34 = vld [vmem:[#allocation51_spill] sm:$0xff]  ;;  %v12781_v46 = vld [vmem:[#allocation54_spill] sm:$0xff] }
 0x4bb   : > { %8582 = vmatpush3.bf16.msra.mxu1 %v4477_v59  ;;  %8583 = vmatprep.mubr.msk.bf16.mxu1 %vm9650_vm3, %v12775_v55  ;;  %v3948_v43 = vpack.c.bf16 %v3916_v22, %v3916_v22  ;;  %v4845_v7 = vsel %vm836_vm0, %v12778_v34, 0  ;;  %v4891_v22 = vsel %vm836_vm0, %v12781_v46, 0 }
 0x4bc   : > { %8593 = vmatprep.subr.bf16.mxu1 %v12775_v55  ;;  %v9091_v61 = vpop.eup %9090  ;;  %v3947_v57 = vpack.c.bf16 %v3915_v60, %v3915_v60 }
 0x4bd   : > { %8566 = vmatmul.mubr.msk.bf16.vlgmr.msra.gmra.mxu0 %vm3582_vm6, %v3943_v37  ;;  %v3825_v51 = vpop.xlane.xlu1 %3824  ;;  %v3918_v3 = vmul.f32 %v9091_v61, %v10817_v41 }
 0x4be   : > { %8576 = vmatpush3.bf16.msra.mxu0 %v4431_v32  ;;  %8577 = vmatprep.mubr.msk.bf16.mxu0 %vm9650_vm3, %v12775_v55 }
 0x4bf   : > { %8587 = vmatprep.subr.bf16.mxu0 %v12775_v55  ;;  %v3950_v39 = vpack.c.bf16 %v3918_v3, %v3918_v3 }
 0x4c1   : > { %v3828_v23 = vpop.xlane.xlu0 %3827  ;;  %v9093_v53 = vpop.eup %9092 }
 0x4c2   : > { %8584 = vmatmul.mubr.msk.bf16.vlgmr.msra.gmra.mxu1 %vm3582_vm6, %v3946_v20  ;;  %9094 = vrcp.f32 %v3828_v23  ;;  %v3917_v9 = vmul.f32 %v9093_v53, %v10813_v36  ;;  %v12780_v20 = vld [vmem:[#allocation53_spill] sm:$0xff]  ;;  %v12783_v53 = vld [vmem:[#allocation56_spill] sm:$0xff] }
 0x4c3   : > { %8594 = vmatpush3.bf16.msra.mxu1 %v4569_v50  ;;  %8595 = vmatprep.mubr.msk.bf16.mxu1 %vm9650_vm3, %v12775_v55  ;;  %9096 = vrcp.f32 %v3825_v51  ;;  %v4937_v33 = vsel %vm836_vm0, %v12780_v20, 0  ;;  %v4983_v3 = vsel %vm836_vm0, %v12783_v53, 0 }
 0x4c4   : > { %8605 = vmatprep.subr.bf16.mxu1 %v12775_v55  ;;  %v3949_v38 = vpack.c.bf16 %v3917_v9, %v3917_v9  ;;  %v5121_v9 = vsel %vm836_vm0, %v10939_v24, 0 }
 0x4c5   : > { %8578 = vmatmul.mubr.msk.bf16.vlgmr.msra.gmra.mxu0 %vm3582_vm6, %v3945_v42  ;;  %v3831_v58 = vpop.xlane.xlu1 %3830 }
 0x4c6   : > { %8588 = vmatpush3.bf16.msra.mxu0 %v4523_v18  ;;  %8589 = vmatprep.mubr.msk.bf16.mxu0 %vm9650_vm3, %v12775_v55 }
 0x4c7   : > { %8599 = vmatprep.subr.bf16.mxu0 %v12775_v55 }
 0x4c9   : > { %v3834_v16 = vpop.xlane.xlu0 %3833 }
 0x4ca   : > { %8596 = vmatmul.mubr.msk.bf16.vlgmr.msra.gmra.mxu1 %vm3582_vm6, %v3948_v43  ;;  %9098 = vrcp.f32 %v3834_v16  ;;  %v12782_v43 = vld [vmem:[#allocation55_spill] sm:$0xff] }
 0x4cb   : > { %8606 = vmatpush3.bf16.msra.mxu1 %v4661_v26  ;;  %8607 = vmatprep.mubr.msk.bf16.mxu1 %vm9650_vm3, %v12775_v55  ;;  %9100 = vrcp.f32 %v3831_v58  ;;  %v5029_v61 = vsel %vm836_vm0, %v12782_v43, 0 }
 0x4cc   : > { %8617 = vmatprep.subr.bf16.mxu1 %v12775_v55 }
 0x4cd   : > { %8590 = vmatmul.mubr.msk.bf16.vlgmr.msra.gmra.mxu0 %vm3582_vm6, %v3947_v57  ;;  %v3837_v36 = vpop.xlane.xlu1 %3836 }
 0x4ce   : > { %8600 = vmatpush3.bf16.msra.mxu0 %v4615_v11  ;;  %8601 = vmatprep.mubr.msk.bf16.mxu0 %vm9650_vm3, %v12775_v55 }
 0x4cf   : > { %8611 = vmatprep.subr.bf16.mxu0 %v12775_v55  ;;  %v9095_v41 = vpop.eup %9094 }
 0x4d0   : > { %v9097_v62 = vpop.eup %9096  ;;  %v3920_v6 = vmul.f32 %v9095_v41, %v10833_v49 }
 0x4d1   : > { %v3840_v30 = vpop.xlane.xlu0 %3839  ;;  %v3919_v56 = vmul.f32 %v9097_v62, %v10828_v48 }
 0x4d2   : > { %8608 = vmatmul.mubr.msk.bf16.vlgmr.msra.gmra.mxu1 %vm3582_vm6, %v3950_v39  ;;  %9102 = vrcp.f32 %v3840_v30  ;;  %v3952_v2 = vpack.c.bf16 %v3920_v6, %v3920_v6 }
 0x4d3   : > { %8618 = vmatpush3.bf16.msra.mxu1 %v4753_v27  ;;  %8619 = vmatprep.mubr.msk.bf16.mxu1 %vm9650_vm3, %v12775_v55  ;;  %9104 = vrcp.f32 %v3837_v36  ;;  %v3951_v47 = vpack.c.bf16 %v3919_v56, %v3919_v56 }
 0x4d4   : > { %8629 = vmatprep.subr.bf16.mxu1 %v12775_v55 }
 0x4d5   : > { %8602 = vmatmul.mubr.msk.bf16.vlgmr.msra.gmra.mxu0 %vm3582_vm6, %v3949_v38  ;;  %v3843_v48 = vpop.xlane.xlu1 %3842 }
 0x4d6   : > { %8612 = vmatpush3.bf16.msra.mxu0 %v4707_v25  ;;  %8613 = vmatprep.mubr.msk.bf16.mxu0 %vm9650_vm3, %v12775_v55 }
 0x4d7   : > { %8623 = vmatprep.subr.bf16.mxu0 %v12775_v55  ;;  %v9099_v49 = vpop.eup %9098 }
 0x4d8   : > { %v9101_v59 = vpop.eup %9100  ;;  %v3922_v37 = vmul.f32 %v9099_v49, %v10843_v10 }
 0x4d9   : > { %v3846_v29 = vpop.xlane.xlu0 %3845  ;;  %v3921_v28 = vmul.f32 %v9101_v59, %v10838_v13 }
 0x4da   : > { %8620 = vmatmul.mubr.msk.bf16.vlgmr.msra.gmra.mxu1 %vm3582_vm6, %v3952_v2  ;;  %9106 = vrcp.f32 %v3846_v29  ;;  %v3954_v32 = vpack.c.bf16 %v3922_v37, %v3922_v37 }
 0x4db   : > { %8630 = vmatpush3.bf16.msra.mxu1 %v4845_v7  ;;  %8631 = vmatprep.mubr.msk.bf16.mxu1 %vm9650_vm3, %v12775_v55  ;;  %9108 = vrcp.f32 %v3843_v48  ;;  %v3953_v23 = vpack.c.bf16 %v3921_v28, %v3921_v28 }
 0x4dc   : > { %8641 = vmatprep.subr.bf16.mxu1 %v12775_v55 }
 0x4dd   : > { %8614 = vmatmul.mubr.msk.bf16.vlgmr.msra.gmra.mxu0 %vm3582_vm6, %v3951_v47 }
 0x4de   : > { %8624 = vmatpush3.bf16.msra.mxu0 %v4799_v14  ;;  %8625 = vmatprep.mubr.msk.bf16.mxu0 %vm9650_vm3, %v12775_v55  ;;  %v3849_v13 = vpop.xlane.xlu1 %3848 }
 0x4df   : > { %8635 = vmatprep.subr.bf16.mxu0 %v12775_v55  ;;  %v9103_v10 = vpop.eup %9102 }
 0x4e0   : > { %v9105_v50 = vpop.eup %9104  ;;  %v3924_v42 = vmul.f32 %v9103_v10, %v10853_v8 }
 0x4e1   : > { %v3852_v5 = vpop.xlane.xlu0 %3851  ;;  %v3923_v51 = vmul.f32 %v9105_v50, %v10847_v12 }
 0x4e2   : > { %8632 = vmatmul.mubr.msk.bf16.vlgmr.msra.gmra.mxu1 %vm3582_vm6, %v3954_v32  ;;  %9110 = vrcp.f32 %v3852_v5  ;;  %v3956_v18 = vpack.c.bf16 %v3924_v42, %v3924_v42 }
 0x4e3   : > { %8642 = vmatpush3.bf16.msra.mxu1 %v4937_v33  ;;  %8643 = vmatprep.mubr.msk.bf16.mxu1 %vm9650_vm3, %v12775_v55  ;;  %9112 = vrcp.f32 %v3849_v13  ;;  %v3955_v16 = vpack.c.bf16 %v3923_v51, %v3923_v51 }
 0x4e4   : > { %8653 = vmatprep.subr.bf16.mxu1 %v12775_v55 }
 0x4e5   : > { %8626 = vmatmul.mubr.msk.bf16.vlgmr.msra.gmra.mxu0 %vm3582_vm6, %v3953_v23 }
 0x4e6   : > { %8636 = vmatpush3.bf16.msra.mxu0 %v4891_v22  ;;  %8637 = vmatprep.mubr.msk.bf16.mxu0 %vm9650_vm3, %v12775_v55  ;;  %v3855_v12 = vpop.xlane.xlu1 %3854 }
 0x4e7   : > { %8647 = vmatprep.subr.bf16.mxu0 %v12775_v55  ;;  %v9107_v8 = vpop.eup %9106 }
 0x4e8   : > { %v9109_v26 = vpop.eup %9108  ;;  %v3926_v57 = vmul.f32 %v9107_v8, %v10863_v35 }
 0x4e9   : > { %v3858_v60 = vpop.xlane.xlu0 %3857  ;;  %v3925_v58 = vmul.f32 %v9109_v26, %v10857_v4  ;;  %v12784_v4 = vld [vmem:[#allocation57_spill] sm:$0xff] }
 0x4ea   : > { %8644 = vmatmul.mubr.msk.bf16.vlgmr.msra.gmra.mxu1 %vm3582_vm6, %v3956_v18  ;;  %9114 = vrcp.f32 %v3858_v60  ;;  %v3958_v11 = vpack.c.bf16 %v3926_v57, %v3926_v57  ;;  %v5075_v63 = vsel %vm836_vm0, %v12784_v4, 0  ;;  %v2034_v21 = vpop.permute.xlu1 %2033 }
 0x4eb   : > { %8654 = vmatpush3.bf16.msra.mxu1 %v5029_v61  ;;  %8655 = vmatprep.mubr.msk.bf16.mxu1 %vm9650_vm3, %v12775_v55  ;;  %9116 = vrcp.f32 %v3855_v12  ;;  %v3957_v39 = vpack.c.bf16 %v3925_v58, %v3925_v58  ;;  %v5305_v56 = vsel %vm836_vm0, %v2034_v21, 0  ;;  %v12785_v12 = vmov 0   ;;  %v8950_v21 = vld [vmem:[#allocation11 + $0x38] sm:$0xff]  }
 0x4ec   : > { %8665 = vmatprep.subr.bf16.mxu1 %v12775_v55 }
 0x4ed   : > { %8638 = vmatmul.mubr.msk.bf16.vlgmr.msra.gmra.mxu0 %vm3582_vm6, %v3955_v16 }
 0x4ee   : > { %8648 = vmatpush3.bf16.msra.mxu0 %v4983_v3  ;;  %8649 = vmatprep.mubr.msk.bf16.mxu0 %vm9650_vm3, %v12775_v55 }
 0x4ef   : > { %8659 = vmatprep.subr.bf16.mxu0 %v12775_v55  ;;  %v9111_v35 = vpop.eup %9110 }
 0x4f0   : > { %v9113_v41 = vpop.eup %9112  ;;  %v3928_v30 = vmul.f32 %v9111_v35, %v10871_v52  ;;  %v5213_v52 = vsel %vm836_vm0, %v10937_v31, 0 }
 0x4f1   : > { %v3927_v24 = vmul.f32 %v9113_v41, %v10867_v19  ;;  %v5167_v19 = vsel %vm836_vm0, %v10927_v45, 0 }
 0x4f2   : > { %8656 = vmatmul.mubr.msk.bf16.vlgmr.msra.gmra.mxu1 %vm3582_vm6, %v3958_v11  ;;  %v3960_v27 = vpack.c.bf16 %v3928_v30, %v3928_v30 }
 0x4f3   : > { %8666 = vmatpush3.bf16.msra.mxu1 %v5121_v9  ;;  %8667 = vmatprep.mubr.msk.bf16.mxu1 %vm9650_vm3, %v12775_v55  ;;  %v3959_v62 = vpack.c.bf16 %v3927_v24, %v3927_v24 }
 0x4f4   : > { %8677 = vmatprep.subr.bf16.mxu1 %v12775_v55 }
 0x4f5   : > { %8650 = vmatmul.mubr.msk.bf16.vlgmr.msra.gmra.mxu0 %vm3582_vm6, %v3957_v39 }
 0x4f6   : > { %8660 = vmatpush3.bf16.msra.mxu0 %v5075_v63  ;;  %8661 = vmatprep.mubr.msk.bf16.mxu0 %vm9650_vm3, %v12775_v55 }
 0x4f7   : > { %8671 = vmatprep.subr.bf16.mxu0 %v12775_v55  ;;  %v9115_v38 = vpop.eup %9114 }
 0x4f8   : > { %v9117_v6 = vpop.eup %9116  ;;  %v3930_v36 = vmul.f32 %v9115_v38, %v10880_v17  ;;  %v2032_v17 = vpop.permute.xlu0 %2031 }
 0x4f9   : > { %v3929_v31 = vmul.f32 %v9117_v6, %v10875_v1  ;;  %v5259_v45 = vsel %vm836_vm0, %v2032_v17, 0 }
 0x4fa   : > { %8668 = vmatmul.mubr.msk.bf16.vlgmr.msra.gmra.mxu1 %vm3582_vm6, %v3960_v27  ;;  %v3962_v25 = vpack.c.bf16 %v3930_v36, %v3930_v36 }
 0x4fb   : > { %8678 = vmatpush3.bf16.msra.mxu1 %v5213_v52  ;;  %8679 = vmatprep.mubr.msk.bf16.mxu1 %vm9650_vm3, %v12775_v55  ;;  %v3961_v2 = vpack.c.bf16 %v3929_v31, %v3929_v31 }
 0x4fc   : > { %8689 = vmatprep.subr.bf16.mxu1 %v12775_v55 }
 0x4fd   : > { %8662 = vmatmul.mubr.msk.bf16.vlgmr.msra.gmra.mxu0 %vm3582_vm6, %v3959_v62 }
 0x4fe   : > { %8672 = vmatpush3.bf16.msra.mxu0 %v5167_v19  ;;  %8673 = vmatprep.mubr.msk.bf16.mxu0 %vm9650_vm3, %v12775_v55 }
 0x4ff   : > { %8683 = vmatprep.subr.bf16.mxu0 %v12775_v55 }
 0x502   : > { %8680 = vmatmul.mubr.msk.bf16.vlgmr.msra.gmra.mxu1 %vm3582_vm6, %v3962_v25  ;;  %v8951_v25 = vld [vmem:[#allocation11 + $0x30] sm:$0xff]  }
 0x503   : > { %8690 = vmatpush3.bf16.msra.mxu1 %v5305_v56  ;;  %8691 = vmatprep.mubr.msk.bf16.mxu1 %vm9650_vm3, %v12775_v55 }
 0x504   : > { %8701 = vmatprep.subr.bf16.mxu1 %v12775_v55 }
 0x505   : > { %8674 = vmatmul.mubr.msk.bf16.vlgmr.msra.gmra.mxu0 %vm3582_vm6, %v3961_v2 }
 0x506   : > { %8684 = vmatpush3.bf16.msra.mxu0 %v5259_v45  ;;  %8685 = vmatprep.mubr.msk.bf16.mxu0 %vm9650_vm3, %v12775_v55 }
 0x507   : > { %8695 = vmatprep.subr.bf16.mxu0 %v12775_v55 }
 0x51b   : > { %v3861_v1 = vpop.xlane.xlu1 %3860 }
 0x51c   : > { %9118 = vrcp.f32 %v3861_v1  ;;  %v8952_v1 = vld [vmem:[#allocation11 + $0x28] sm:$0xff]  }
 0x51e   : > { %v3864_v49 = vpop.xlane.xlu0 %3863 }
 0x51f   : > { %9120 = vrcp.f32 %v3864_v49  ;;  %v3867_v29 = vpop.xlane.xlu1 %3866 }
 0x520   : > { %9122 = vrcp.f32 %v3867_v29 }
 0x521   : > { %v11127_v34 = vpop.f32.mrf.mxu0 }
 0x522   : > { %v3870_v7 = vpop.xlane.xlu0 %3869 }
 0x523   : > { %v8519_v47 = vpop.f32.mrf.mxu0  ;;  %9124 = vrcp.f32 %v3870_v7  ;;  %v2038_v42 = vpop.permute.xlu1 %2037 }
 0x524   : > { %v5397_v51 = vsel %vm836_vm0, %v2038_v42, 0 }
 0x525   : > { %v4010_v59 = vpop.f32.mrf.mxu0  ;;  %v11129_v37 = vpop.f32.mrf.mxu1 }
 0x526   : > { %v2036_v10 = vpop.permute.xlu0 %2035  ;;  %v8953_v59 = vld [vmem:[#allocation11 + $0x20] sm:$0xff]  }
 0x527   : > { %v8520_v48 = vpop.f32.mrf.mxu0  ;;  %v8525_v54 = vpop.f32.mrf.mxu1  ;;  %v5351_v13 = vsel %vm836_vm0, %v2036_v10, 0 }
 0x529   : > { %v9119_v14 = vpop.eup %9118  ;;  %v4056_v28 = vpop.f32.mrf.mxu1 }
 0x52a   : > { %v3931_v32 = vmul.f32 %v9119_v14, %v10929_v15 }
 0x52b   : > { %v8526_v5 = vpop.f32.mrf.mxu1 }
 0x52c   : > { %v9121_v20 = vpop.eup %9120  ;;  %v3963_v33 = vpack.c.bf16 %v3931_v32, %v3931_v32  ;;  %v8954_v32 = vld [vmem:[#allocation11 + $0x18] sm:$0xff]  }
 0x52d   : > { %v9123_v23 = vpop.eup %9122  ;;  %v3932_v50 = vmul.f32 %v9121_v20, %v10931_v40 }
 0x52e   : > { %8686 = vmatmul.mubr.msk.bf16.vlgmr.msra.gmra.mxu0 %vm3582_vm6, %v3963_v33  ;;  %v3933_v15 = vmul.f32 %v9123_v23, %v10935_v0 }
 0x52f   : > { %v3964_v46 = vpack.c.bf16 %v3932_v50, %v3932_v50  ;;  %8696 = vmatpush3.bf16.msra.mxu0 %v5351_v13  ;;  %8697 = vmatprep.mubr.msk.bf16.mxu0 %vm9650_vm3, %v12775_v55 }
 0x530   : > { %v9125_v22 = vpop.eup %9124  ;;  %v11139_v18 = vpop.f32.mrf.mxu0  ;;  %v3965_v60 = vpack.c.bf16 %v3933_v15, %v3933_v15  ;;  %8707 = vmatprep.subr.bf16.mxu0 %v8950_v21 }
 0x531   : > { %8692 = vmatmul.mubr.msk.bf16.vlgmr.msra.gmra.mxu1 %vm3582_vm6, %v3964_v46  ;;  %v3934_v40 = vmul.f32 %v9125_v22, %v10943_v44  ;;  %v8955_v46 = vld [vmem:[#allocation11 + $0x10] sm:$0xff]   ;;  %v8956_v22 = vld [vmem:[#allocation11 + $0x8] sm:$0xff]  }
 0x532   : > { %8702 = vmatpush3.bf16.msra.mxu1 %v5397_v51  ;;  %8703 = vmatprep.mubr.msk.bf16.mxu1 %vm9650_vm3, %v12775_v55  ;;  %v8531_v8 = vpop.f32.mrf.mxu0 }
 0x533   : > { %v3966_v0 = vpack.c.bf16 %v3934_v40, %v3934_v40 }
 0x534   : > { %v4102_v43 = vpop.f32.mrf.mxu0 }
 0x535   : > { %v11145_v61 = vpop.f32.mrf.mxu1 }
 0x536   : > { %8698 = vmatmul.mubr.msk.bf16.vlgmr.msra.gmra.mxu0 %vm3582_vm6, %v3965_v60  ;;  %v8532_v16 = vpop.f32.mrf.mxu0 }
 0x537   : > { %v8537_v26 = vpop.f32.mrf.mxu1  ;;  %8708 = vmatpush3.bf16.msra.mxu0 %v8950_v21 }
 0x538   : > { %8709 = vmatprep.subr.bf16.mxu0 %v8951_v25 }
 0x539   : > { %v4148_v57 = vpop.f32.mrf.mxu1  ;;  %8704 = vmatmul.mubr.msk.bf16.vlgmr.msra.gmra.mxu1 %vm3582_vm6, %v3966_v0 }
 0x53a   : > { %6082 = vmatprep.mubr.bf16.mxu1 %v12785_v12 }
 0x53b   : > { %v8538_v53 = vpop.f32.mrf.mxu1  ;;  %8710 = vmatpush3.bf16.msra.mxu0 %v8951_v25 }
 0x53c   : > { %8711 = vmatprep.subr.bf16.mxu0 %v8952_v1 }
 0x53f   : > { %8712 = vmatpush3.bf16.msra.mxu0 %v8952_v1 }
 0x540   : > { %8713 = vmatprep.subr.bf16.mxu0 %v8953_v59 }
 0x543   : > { %8714 = vmatpush3.bf16.msra.mxu0 %v8953_v59 }
 0x544   : > { %8715 = vmatprep.subr.bf16.mxu0 %v8954_v32 }
 0x547   : > { %8716 = vmatpush3.bf16.msra.mxu0 %v8954_v32 }
 0x548   : > { %8717 = vmatprep.subr.bf16.mxu0 %v8955_v46 }
 0x54b   : > { %8718 = vmatpush3.bf16.msra.mxu0 %v8955_v46 }
 0x54c   : > { %8719 = vmatprep.subr.bf16.mxu0 %v8956_v22 }
 0x54f   : > { %8720 = vmatpush3.bf16.msra.mxu0 %v8956_v22 }
 0x569   : > { %v11150_v3 = vpop.f32.mrf.mxu0 }
 0x56a   : > { %v11152_v55 = vpop.f32.mrf.mxu1 }
 0x56b   : > { %v8543_v44 = vpop.f32.mrf.mxu0 }
 0x56c   : > { %v8549_v58 = vpop.f32.mrf.mxu1 }
 0x56d   : > { %v4194_v11 = vpop.f32.mrf.mxu0  ;;  %v8957_v58 = vld [vmem:[#allocation11] sm:$0xff]  }
 0x56e   : > { %v4240_v35 = vpop.f32.mrf.mxu1  ;;  %8721 = vmatprep.subr.bf16.mxu0 %v8957_v58 }
 0x56f   : > { %v8544_v9 = vpop.f32.mrf.mxu0  ;;  %8722 = vmatpush3.bf16.msra.mxu0 %v8957_v58 }
 0x570   : > { %v8550_v39 = vpop.f32.mrf.mxu1 }
 0x572   : > { %v11154_v41 = vpop.f32.mrf.mxu1 }
 0x574   : > { %v8561_v30 = vpop.f32.mrf.mxu1 }
 0x575   : > { %v11156_v4 = vpop.f32.mrf.mxu0 }
 0x576   : > { %v4332_v63 = vpop.f32.mrf.mxu1 }
 0x577   : > { %v8555_v24 = vpop.f32.mrf.mxu0 }
 0x578   : > { %v8562_v27 = vpop.f32.mrf.mxu1 }
 0x579   : > { %v4286_v38 = vpop.f32.mrf.mxu0 }
 0x57a   : > { %v11158_v52 = vpop.f32.mrf.mxu1 }
 0x57b   : > { %v8556_v62 = vpop.f32.mrf.mxu0 }
 0x57c   : > { %v8573_v6 = vpop.f32.mrf.mxu1 }
 0x57d   : > { %v11160_v36 = vpop.f32.mrf.mxu0 }
 0x57e   : > { %v4424_v19 = vpop.f32.mrf.mxu1 }
 0x57f   : > { %v8567_v31 = vpop.f32.mrf.mxu0 }
 0x580   : > { %v8574_v56 = vpop.f32.mrf.mxu1 }
 0x581   : > { %v4378_v17 = vpop.f32.mrf.mxu0 }
 0x582   : > { %v11162_v2 = vpop.f32.mrf.mxu1 }
 0x583   : > { %v8568_v45 = vpop.f32.mrf.mxu0 }
 0x584   : > { %v8585_v49 = vpop.f32.mrf.mxu1 }
 0x585   : > { %v11164_v29 = vpop.f32.mrf.mxu0 }
 0x586   : > { %v4516_v7 = vpop.f32.mrf.mxu1 }
 0x587   : > { %v8579_v47 = vpop.f32.mrf.mxu0 }
 0x588   : > { %v8586_v48 = vpop.f32.mrf.mxu1 }
 0x589   : > { %v4470_v54 = vpop.f32.mrf.mxu0 }
 0x58a   : > { %v11166_v14 = vpop.f32.mrf.mxu1 }
 0x58b   : > { %v8580_v28 = vpop.f32.mrf.mxu0 }
 0x58c   : > { %v8597_v10 = vpop.f32.mrf.mxu1 }
 0x58d   : > { %v11168_v5 = vpop.f32.mrf.mxu0 }
 0x58e   : > { %v4608_v20 = vpop.f32.mrf.mxu1 }
 0x58f   : > { %v8591_v33 = vpop.f32.mrf.mxu0 }
 0x590   : > { %v8598_v23 = vpop.f32.mrf.mxu1 }
 0x591   : > { %v4562_v50 = vpop.f32.mrf.mxu0 }
 0x592   : > { %v11170_v42 = vpop.f32.mrf.mxu1 }
 0x593   : > { %v8592_v13 = vpop.f32.mrf.mxu0 }
 0x594   : > { %v8609_v15 = vpop.f32.mrf.mxu1 }
 0x595   : > { %v11172_v51 = vpop.f32.mrf.mxu0 }
 0x596   : > { %v4700_v40 = vpop.f32.mrf.mxu1 }
 0x597   : > { %v8603_v8 = vpop.f32.mrf.mxu0 }
 0x598   : > { %v8610_v60 = vpop.f32.mrf.mxu1 }
 0x599   : > { %v4654_v43 = vpop.f32.mrf.mxu0 }
 0x59a   : > { %v4789_v0 = vpop.f32.mrf.mxu1 }
 0x59b   : > { %v8604_v16 = vpop.f32.mrf.mxu0 }
 0x59c   : > { %v8621_v26 = vpop.f32.mrf.mxu1 }
 0x59d   : > { %v4743_v57 = vpop.f32.mrf.mxu0 }
 0x59e   : > { %v8878_v53 = vpack.i.bf16 %v4789_v0, %v4743_v57  ;;  %v4792_v44 = vpop.f32.mrf.mxu1 }
 0x59f   : > { %v8615_v11 = vpop.f32.mrf.mxu0 }
 0x5a0   : > { %8879 = vrot.lane.b32.xlu0 %v8878_v53, %s9651_s27  ;;  %v8622_v35 = vpop.f32.mrf.mxu1 }
 0x5a1   : > { %v4746_v9 = vpop.f32.mrf.mxu0 }
 0x5a2   : > { %v4881_v39 = vpop.f32.mrf.mxu1 }
 0x5a3   : > { %v8616_v30 = vpop.f32.mrf.mxu0 }
 0x5a4   : > { %v8633_v63 = vpop.f32.mrf.mxu1 }
 0x5a5   : > { %v4835_v24 = vpop.f32.mrf.mxu0 }
 0x5a6   : > { %v8883_v27 = vpack.i.bf16 %v4881_v39, %v4835_v24  ;;  %v4884_v38 = vpop.f32.mrf.mxu1 }
 0x5a7   : > { %v8627_v62 = vpop.f32.mrf.mxu0 }
 0x5a8   : > { %8884 = vrot.lane.b32.xlu1 %v8883_v27, %s9651_s27  ;;  %v8634_v6 = vpop.f32.mrf.mxu1 }
 0x5a9   : > { %v4838_v19 = vpop.f32.mrf.mxu0 }
 0x5aa   : > { %v4973_v31 = vpop.f32.mrf.mxu1 }
 0x5ab   : > { %v8628_v21 = vpop.f32.mrf.mxu0 }
 0x5ac   : > { %v8645_v25 = vpop.f32.mrf.mxu1 }
 0x5ad   : > { %v4927_v56 = vpop.f32.mrf.mxu0 }
 0x5ae   : > { %v8888_v17 = vpack.i.bf16 %v4973_v31, %v4927_v56  ;;  %v4976_v45 = vpop.f32.mrf.mxu1 }
 0x5af   : > { %v8639_v1 = vpop.f32.mrf.mxu0 }
 0x5b0   : > { %8889 = vrot.lane.b32.xlu0 %v8888_v17, %s9651_s27  ;;  %v8646_v49 = vpop.f32.mrf.mxu1 }
 0x5b1   : > { %v4930_v7 = vpop.f32.mrf.mxu0 }
 0x5b2   : > { %v5065_v47 = vpop.f32.mrf.mxu1 }
 0x5b3   : > { %v8640_v59 = vpop.f32.mrf.mxu0 }
 0x5b4   : > { %v8657_v48 = vpop.f32.mrf.mxu1 }
 0x5b5   : > { %v5019_v54 = vpop.f32.mrf.mxu0 }
 0x5b6   : > { %v8893_v28 = vpack.i.bf16 %v5065_v47, %v5019_v54  ;;  %v5068_v32 = vpop.f32.mrf.mxu1 }
 0x5b7   : > { %v8651_v10 = vpop.f32.mrf.mxu0 }
 0x5b8   : > { %8894 = vrot.lane.b32.xlu1 %v8893_v28, %s9651_s27  ;;  %v8658_v20 = vpop.f32.mrf.mxu1 }
 0x5b9   : > { %v5022_v33 = vpop.f32.mrf.mxu0 }
 0x5ba   : > { %v5157_v23 = vpop.f32.mrf.mxu1 }
 0x5bb   : > { %v8652_v50 = vpop.f32.mrf.mxu0 }
 0x5bc   : > { %v8669_v13 = vpop.f32.mrf.mxu1 }
 0x5bd   : > { %v5111_v46 = vpop.f32.mrf.mxu0 }
 0x5be   : > { %v8898_v22 = vpack.i.bf16 %v5157_v23, %v5111_v46  ;;  %v5160_v15 = vpop.f32.mrf.mxu1 }
 0x5bf   : > { %v8663_v40 = vpop.f32.mrf.mxu0 }
 0x5c0   : > { %8899 = vrot.lane.b32.xlu0 %v8898_v22, %s9651_s27  ;;  %v8670_v8 = vpop.f32.mrf.mxu1 }
 0x5c1   : > { %v5114_v60 = vpop.f32.mrf.mxu0 }
 0x5c2   : > { %v5249_v43 = vpop.f32.mrf.mxu1 }
 0x5c3   : > { %v8664_v0 = vpop.f32.mrf.mxu0 }
 0x5c4   : > { %v8681_v16 = vpop.f32.mrf.mxu1 }
 0x5c5   : > { %v5203_v26 = vpop.f32.mrf.mxu0 }
 0x5c6   : > { %v8903_v57 = vpack.i.bf16 %v5249_v43, %v5203_v26  ;;  %v5252_v53 = vpop.f32.mrf.mxu1 }
 0x5c7   : > { %v8675_v44 = vpop.f32.mrf.mxu0 }
 0x5c8   : > { %8904 = vrot.lane.b32.xlu1 %v8903_v57, %s9651_s27  ;;  %v8682_v58 = vpop.f32.mrf.mxu1 }
 0x5c9   : > { %v5206_v11 = vpop.f32.mrf.mxu0 }
 0x5cb   : > { %v8676_v35 = vpop.f32.mrf.mxu0 }
 0x5ee   : > { %v5295_v9 = vpop.f32.mrf.mxu0 }
 0x5f0   : > { %v8687_v39 = vpop.f32.mrf.mxu0 }
 0x5f1   : > { %v5341_v30 = vpop.f32.mrf.mxu1 }
 0x5f2   : > { %v5298_v63 = vpop.f32.mrf.mxu0  ;;  %v8908_v24 = vpack.i.bf16 %v5341_v30, %v5295_v9 }
 0x5f3   : > { %v8693_v27 = vpop.f32.mrf.mxu1 }
 0x5f4   : > { %v8688_v38 = vpop.f32.mrf.mxu0  ;;  %8909 = vrot.lane.b32.xlu0 %v8908_v24, %s9651_s27 }
 0x5f5   : > { %v5344_v62 = vpop.f32.mrf.mxu1 }
 0x5f6   : > { %v5387_v6 = vpop.f32.mrf.mxu0 }
 0x5f7   : > { %v8694_v19 = vpop.f32.mrf.mxu1 }
 0x5f8   : > { %v8699_v31 = vpop.f32.mrf.mxu0 }
 0x5f9   : > { %v5433_v21 = vpop.f32.mrf.mxu1 }
 0x5fa   : > { %v5390_v25 = vpop.f32.mrf.mxu0  ;;  %v8913_v56 = vpack.i.bf16 %v5433_v21, %v5387_v6  ;;  %v7932_v6 = vld [vmem:[#allocation13] ss:$0 sm:$0xff] }
 0x5fb   : > { %v8705_v17 = vpop.f32.mrf.mxu1 }
 0x5fc   : > { %v8700_v45 = vpop.f32.mrf.mxu0  ;;  %8914 = vrot.lane.b32.xlu1 %v8913_v56, %s9651_s27  ;;  %s12843_s27 = sld [smem:[#allocation29_spill]] }
 0x5fd   : > { %v5436_v1 = vpop.f32.mrf.mxu1  ;;  %v12787_v45 = vld [vmem:[#allocation35_spill] sm:$0xff] }
 0x5ff   : > { %v8706_v49 = vpop.f32.mrf.mxu1 }
 0x602   : > { %p12846_p2 = scmp.ne.s32.totalorder %s12843_s27, 0 }
 0x604   : > { %p9554_p3 = pnand %p9553_p1, %p12846_p2 }
 0x606   : > { %p9555_p13 = pneg %p9554_p3 }
 0x608   : > { %p9562_p11 = pnand %p9561_p8, %p9555_p13 }
 0x612   : > { %v8880_v7 = vpop.permute.xlu0 %8879 }
 0x613   : > { %v8882_v47 = vunpack.i.h.bf16 %v8880_v7  ;;  %v8881_v59 = vunpack.i.l.bf16 %v8880_v7  ;;  %v12789_v7 = vld [vmem:[#allocation36_spill] sm:$0xff] }
 0x615   : > { %v5503_v48 = vsel %vm2045_vm4, %v11127_v34, %v8881_v59  ;;  %v5504_v54 = vsel %vm2045_vm4, %v11129_v37, %v8882_v47 }
 0x616   : > { %v5519_v28 = vpack.c.bf16 %v5504_v54, %v5503_v48 }
 0x618   : > { %8723 = vmatprep.mubr.bf16.mxu0 %v5519_v28 }
 0x61a   : > { %v8885_v32 = vpop.permute.xlu1 %8884 }
 0x61b   : > { %v8887_v10 = vunpack.i.h.bf16 %v8885_v32  ;;  %v8886_v20 = vunpack.i.l.bf16 %v8885_v32 }
 0x61d   : > { %v5506_v33 = vsel %vm2045_vm4, %v11145_v61, %v8887_v10  ;;  %v5505_v23 = vsel %vm2045_vm4, %v11139_v18, %v8886_v20  ;;  %v12790_v10 = vld [vmem:[#allocation37_spill] sm:$0xff] }
 0x61e   : > { %v5520_v50 = vpack.c.bf16 %v5506_v33, %v5505_v23 }
 0x620   : > { %8724 = vmatmul.mubr.bf16.vlgmr.msra.gmra.mxu0 %v5520_v50  ;;  %v12791_v50 = vld [vmem:[#allocation42_spill] sm:$0xff] }
 0x622   : > { %v8890_v13 = vpop.permute.xlu0 %8889 }
 0x623   : > { %v8892_v46 = vunpack.i.h.bf16 %v8890_v13  ;;  %v8891_v22 = vunpack.i.l.bf16 %v8890_v13 }
 0x625   : > { %v5507_v34 = vsel %vm2045_vm4, %v11150_v3, %v8891_v22  ;;  %v5508_v37 = vsel %vm2045_vm4, %v11152_v55, %v8892_v46  ;;  %v12792_v22 = vld [vmem:[#allocation38_spill] sm:$0xff] }
 0x626   : > { %v5521_v15 = vpack.c.bf16 %v5508_v37, %v5507_v34  ;;  %v12793_v37 = vld [vmem:[#allocation39_spill] sm:$0xff] }
 0x628   : > { %8727 = vmatprep.mubr.bf16.mxu0 %v5521_v15 }
 0x62a   : > { %v8895_v40 = vpop.permute.xlu1 %8894 }
 0x62b   : > { %v8897_v8 = vunpack.i.h.bf16 %v8895_v40  ;;  %v8896_v60 = vunpack.i.l.bf16 %v8895_v40 }
 0x62d   : > { %v5510_v61 = vsel %vm2045_vm4, %v11154_v41, %v8897_v8  ;;  %v5509_v18 = vsel %vm2045_vm4, %v11156_v4, %v8896_v60 }
 0x62e   : > { %v5522_v43 = vpack.c.bf16 %v5510_v61, %v5509_v18 }
 0x630   : > { %8728 = vmatmul.mubr.bf16.gmra.mxu0 %v5522_v43  ;;  %v12794_v43 = vld [vmem:[#allocation41_spill] sm:$0xff] }
 0x632   : > { %v8900_v0 = vpop.permute.xlu0 %8899 }
 0x633   : > { %v8902_v16 = vunpack.i.h.bf16 %v8900_v0  ;;  %v8901_v26 = vunpack.i.l.bf16 %v8900_v0 }
 0x635   : > { %v5511_v3 = vsel %vm2045_vm4, %v11160_v36, %v8901_v26  ;;  %v5512_v55 = vsel %vm2045_vm4, %v11158_v52, %v8902_v16 }
 0x636   : > { %v5523_v57 = vpack.c.bf16 %v5512_v55, %v5511_v3  ;;  %v12795_v3 = vld [vmem:[#allocation44_spill] sm:$0xff] }
 0x638   : > { %8731 = vmatprep.mubr.bf16.mxu0 %v5523_v57 }
 0x63a   : > { %v8905_v53 = vpop.permute.xlu1 %8904 }
 0x63b   : > { %v8907_v44 = vunpack.i.h.bf16 %v8905_v53  ;;  %v8906_v58 = vunpack.i.l.bf16 %v8905_v53  ;;  %v12796_v53 = vld [vmem:[#allocation40_spill] sm:$0xff] }
 0x63d   : > { %v5514_v41 = vsel %vm2045_vm4, %v11162_v2, %v8907_v44  ;;  %v5513_v4 = vsel %vm2045_vm4, %v11164_v29, %v8906_v58  ;;  %v12797_v58 = vld [vmem:[#allocation43_spill] sm:$0xff] }
 0x63e   : > { %v5524_v11 = vpack.c.bf16 %v5514_v41, %v5513_v4 }
 0x640   : > { %8732 = vmatmul.mubr.bf16.gmra.mxu0 %v5524_v11 }
 0x666   : > { %v8910_v35 = vpop.permute.xlu0 %8909 }
 0x667   : > { %v8912_v9 = vunpack.i.h.bf16 %v8910_v35  ;;  %v8911_v39 = vunpack.i.l.bf16 %v8910_v35 }
 0x669   : > { %v5515_v36 = vsel %vm2045_vm4, %v11168_v5, %v8911_v39  ;;  %v5516_v52 = vsel %vm2045_vm4, %v11166_v14, %v8912_v9  ;;  %v12786_v14 = vld [vmem:[#allocation34_spill] sm:$0xff] }
 0x66a   : > { %v5525_v30 = vpack.c.bf16 %v5516_v52, %v5515_v36  ;;  %v12798_v36 = vld [vmem:[#allocation45_spill] sm:$0xff] }
 0x66c   : > { %8735 = vmatprep.mubr.bf16.mxu0 %v5525_v30 }
 0x66e   : > { %v8915_v63 = vpop.permute.xlu1 %8914 }
 0x66f   : > { %v8917_v24 = vunpack.i.h.bf16 %v8915_v63  ;;  %v8916_v27 = vunpack.i.l.bf16 %v8915_v63 }
 0x671   : > { %v5518_v2 = vsel %vm2045_vm4, %v11170_v42, %v8917_v24  ;;  %v5517_v29 = vsel %vm2045_vm4, %v11172_v51, %v8916_v27  ;;  %v12788_v51 = vld [vmem:[#allocation33_spill] sm:$0xff]  ;;  %v12799_v24 = vld [vmem:[#allocation47_spill] sm:$0xff] }
 0x672   : > { %v5526_v38 = vpack.c.bf16 %v5518_v2, %v5517_v29  ;;  %v12800_v29 = vld [vmem:[#allocation46_spill] sm:$0xff] }
 0x674   : > { %8736 = vmatmul.mubr.bf16.gmra.mxu0 %v5526_v38 }
 0x6e0   : > { %v8725_v62 = vpop.f32.mrf.mxu0 }
 0x6e1   : > { %v5641_v21 = vadd.f32 %v8725_v62, %v7932_v6  ;;  %v12801_v62 = vld [vmem:[#allocation48_spill] sm:$0xff] }
 0x6e2   : > { %v5632_v19 = vpop.f32.mrf.mxu0 }
 0x6e3   : > { %v5633_v5 = vadd.f32 %v7932_v6, %v5632_v19  ;;  %v11219_v42 = vadd.f32 %v5641_v21, %v12787_v45 }
 0x6e4   : > { %v8726_v31 = vpop.f32.mrf.mxu0 }
 0x6e5   : > { %v11215_v25 = vadd.f32 %v5633_v5, %v12786_v14  ;;  %v5644_v1 = vadd.f32 %v8726_v31, %v7932_v6  ;;  %v8958_v5 = vld [vmem:[%s12651_s14 + $0x70] ss:$8 sps:$4 sm:$0xff]  }
 0x6e6   : > { %v5635_v56 = vpop.f32.mrf.mxu0 }
 0x6e7   : > { %v5636_v17 = vadd.f32 %v7932_v6, %v5635_v56  ;;  %5711 = vadd.xlane.f32.xlu0 %v11215_v25  ;;  %v11227_v47 = vadd.f32 %v5644_v1, %v12789_v7 }
 0x6e9   : > { %v11222_v49 = vadd.f32 %v5636_v17, %v12788_v51 }
 0x6eb   : > { %5713 = vadd.xlane.f32.xlu1 %v11222_v49  ;;  %5715 = vadd.xlane.f32.xlu0 %v11219_v42 }
 0x6ef   : > { %5717 = vadd.xlane.f32.xlu0 %v11227_v47 }
 0x6f0   : > { %v8729_v59 = vpop.f32.mrf.mxu0 }
 0x6f1   : > { %v5657_v32 = vadd.f32 %v8729_v59, %v7932_v6 }
 0x6f2   : > { %v5648_v48 = vpop.f32.mrf.mxu0 }
 0x6f3   : > { %v5649_v54 = vadd.f32 %v7932_v6, %v5648_v48  ;;  %v11235_v13 = vadd.f32 %v5657_v32, %v12791_v50 }
 0x6f4   : > { %v8730_v28 = vpop.f32.mrf.mxu0 }
 0x6f5   : > { %v11231_v20 = vadd.f32 %v5649_v54, %v12790_v10  ;;  %v5660_v46 = vadd.f32 %v8730_v28, %v7932_v6 }
 0x6f6   : > { %v5651_v33 = vpop.f32.mrf.mxu0 }
 0x6f7   : > { %v5652_v23 = vadd.f32 %v7932_v6, %v5651_v33  ;;  %5719 = vadd.xlane.f32.xlu1 %v11231_v20  ;;  %v11243_v15 = vadd.f32 %v5660_v46, %v12793_v37 }
 0x6f9   : > { %v11238_v34 = vadd.f32 %v5652_v23, %v12792_v22 }
 0x6fb   : > { %5723 = vadd.xlane.f32.xlu1 %v11235_v13  ;;  %5721 = vadd.xlane.f32.xlu0 %v11238_v34 }
 0x6ff   : > { %5725 = vadd.xlane.f32.xlu0 %v11243_v15 }
 0x700   : > { %v8733_v40 = vpop.f32.mrf.mxu0 }
 0x701   : > { %v5673_v18 = vadd.f32 %v8733_v40, %v7932_v6 }
 0x702   : > { %v5664_v8 = vpop.f32.mrf.mxu0 }
 0x703   : > { %v5665_v60 = vadd.f32 %v7932_v6, %v5664_v8  ;;  %v11251_v55 = vadd.f32 %v5673_v18, %v12795_v3 }
 0x704   : > { %v8734_v61 = vpop.f32.mrf.mxu0 }
 0x705   : > { %v11247_v0 = vadd.f32 %v5665_v60, %v12794_v43  ;;  %v5676_v57 = vadd.f32 %v8734_v61, %v7932_v6  ;;  %v8966_v43 = vld [vmem:[%s12651_s14 + $0x54] ss:$8 sps:$4 sm:$0xff]  }
 0x706   : > { %v5667_v16 = vpop.f32.mrf.mxu0 }
 0x707   : > { %v5668_v26 = vadd.f32 %v7932_v6, %v5667_v16  ;;  %5727 = vadd.xlane.f32.xlu1 %v11247_v0  ;;  %v11259_v41 = vadd.f32 %v5676_v57, %v12797_v58 }
 0x709   : > { %v11254_v44 = vadd.f32 %v5668_v26, %v12796_v53  ;;  %v8964_v26 = vld [vmem:[%s12651_s14 + $0x50] ss:$8 sps:$4 sm:$0xff]   ;;  %v8967_v53 = vld [vmem:[%s12651_s14 + $0x40] ss:$8 sps:$4 sm:$0xff]  }
 0x70b   : > { %5731 = vadd.xlane.f32.xlu1 %v11251_v55  ;;  %5729 = vadd.xlane.f32.xlu0 %v11254_v44 }
 0x70f   : > { %5733 = vadd.xlane.f32.xlu0 %v11259_v41 }
 0x734   : > { %v8737_v4 = vpop.f32.mrf.mxu0 }
 0x735   : > { %v5689_v39 = vadd.f32 %v8737_v4, %v7932_v6 }
 0x736   : > { %v5680_v11 = vpop.f32.mrf.mxu0 }
 0x737   : > { %v5681_v35 = vadd.f32 %v7932_v6, %v5680_v11  ;;  %v11267_v27 = vadd.f32 %v5689_v39, %v12799_v24 }
 0x738   : > { %v8738_v9 = vpop.f32.mrf.mxu0 }
 0x739   : > { %v11263_v52 = vadd.f32 %v5681_v35, %v12798_v36  ;;  %v5692_v2 = vadd.f32 %v8738_v9, %v7932_v6  ;;  %v8972_v35 = vld [vmem:[%s12651_s14 + $0x34] ss:$8 sps:$4 sm:$0xff]  }
 0x73a   : > { %v5683_v30 = vpop.f32.mrf.mxu0 }
 0x73b   : > { %v5684_v63 = vadd.f32 %v7932_v6, %v5683_v30  ;;  %5735 = vadd.xlane.f32.xlu1 %v11263_v52  ;;  %v11275_v19 = vadd.f32 %v5692_v2, %v12801_v62  ;;  %v8960_v6 = vld [vmem:[%s12651_s14 + $0x74] ss:$8 sps:$4 sm:$0xff]   ;;  %v8970_v30 = vld [vmem:[%s12651_s14 + $0x30] ss:$8 sps:$4 sm:$0xff]   ;;  %v8973_v2 = vld [vmem:[%s12651_s14 + $0x20] ss:$8 sps:$4 sm:$0xff]  }
 0x73c   : > { %6050 = vmatprep.subr.bf16.mxu1 %v8960_v6 }
 0x73d   : > { %v11270_v38 = vadd.f32 %v5684_v63, %v12800_v29  ;;  %6051 = vmatpush1.bf16.msra.mxu1 %v8958_v5  ;;  %v8975_v29 = vld [vmem:[%s12651_s14 + $0x24] ss:$8 sps:$4 sm:$0xff]  }
 0x73f   : > { %5739 = vadd.xlane.f32.xlu1 %v11267_v27  ;;  %5737 = vadd.xlane.f32.xlu0 %v11270_v38 }
 0x743   : > { %5741 = vadd.xlane.f32.xlu0 %v11275_v19 }
 0x770   : > { %v5712_v31 = vpop.xlane.xlu0 %5711 }
 0x771   : > { %v5744_v21 = vmul.f32 0.0078125, %v5712_v31  ;;  %v8976_v31 = vld [vmem:[%s12651_s14 + $0x10] ss:$8 sps:$4 sm:$0xff]  }
 0x773   : > { %v11285_v14 = vsub.f32 %v11215_v25, %v5744_v21 }
 0x774   : > { %v5714_v56 = vpop.xlane.xlu1 %5713  ;;  %v5716_v17 = vpop.xlane.xlu0 %5715 }
 0x775   : > { %v5745_v45 = vmul.f32 0.0078125, %v5714_v56  ;;  %v5746_v1 = vmul.f32 0.0078125, %v5716_v17  ;;  %v5776_v51 = vmul.f32 %v11285_v14, %v11285_v14  ;;  %v8981_v56 = vld [vmem:[%s12651_s14 + $0x4] ss:$8 sps:$4 sm:$0xff]  }
 0x777   : > { %v11290_v7 = vsub.f32 %v11222_v49, %v5745_v45  ;;  %v11293_v59 = vsub.f32 %v11219_v42, %v5746_v1  ;;  %5792 = vadd.xlane.f32.xlu1 %v5776_v51 }
 0x778   : > { %v5718_v48 = vpop.xlane.xlu0 %5717 }
 0x779   : > { %v5747_v54 = vmul.f32 0.0078125, %v5718_v48  ;;  %v5777_v25 = vmul.f32 %v11290_v7, %v11290_v7  ;;  %v5778_v28 = vmul.f32 %v11293_v59, %v11293_v59 }
 0x77b   : > { %v11300_v32 = vsub.f32 %v11227_v47, %v5747_v54  ;;  %5794 = vadd.xlane.f32.xlu0 %v5777_v25  ;;  %5796 = vadd.xlane.f32.xlu1 %v5778_v28 }
 0x77d   : > { %v5779_v49 = vmul.f32 %v11300_v32, %v11300_v32 }
 0x77f   : > { %5798 = vadd.xlane.f32.xlu0 %v5779_v49 }
 0x780   : > { %v5720_v42 = vpop.xlane.xlu1 %5719 }
 0x781   : > { %v5748_v10 = vmul.f32 0.0078125, %v5720_v42 }
 0x783   : > { %v11305_v33 = vsub.f32 %v11231_v20, %v5748_v10  ;;  %v8963_v20 = vld [vmem:[%s12651_s14 + $0x64] ss:$8 sps:$4 sm:$0xff]  }
 0x784   : > { %v5724_v23 = vpop.xlane.xlu1 %5723  ;;  %v5722_v50 = vpop.xlane.xlu0 %5721  ;;  %6052 = vmatprep.subr.bf16.mxu1 %v8963_v20 }
 0x785   : > { %v5750_v46 = vmul.f32 0.0078125, %v5724_v23  ;;  %v5749_v22 = vmul.f32 0.0078125, %v5722_v50  ;;  %v5780_v37 = vmul.f32 %v11305_v33, %v11305_v33 }
 0x787   : > { %v11310_v47 = vsub.f32 %v11235_v13, %v5750_v46  ;;  %v11313_v40 = vsub.f32 %v11238_v34, %v5749_v22  ;;  %5800 = vadd.xlane.f32.xlu1 %v5780_v37  ;;  %v8961_v13 = vld [vmem:[%s12651_s14 + $0x60] ss:$8 sps:$4 sm:$0xff]  }
 0x788   : > { %v5726_v8 = vpop.xlane.xlu0 %5725  ;;  %6053 = vmatpush1.bf16.msra.mxu1 %v8961_v13 }
 0x789   : > { %v5751_v60 = vmul.f32 0.0078125, %v5726_v8  ;;  %v5782_v61 = vmul.f32 %v11310_v47, %v11310_v47  ;;  %v5781_v18 = vmul.f32 %v11313_v40, %v11313_v40  ;;  %6054 = vmatprep.subr.bf16.mxu1 %v8966_v43 }
 0x78b   : > { %v11326_v34 = vsub.f32 %v11243_v15, %v5751_v60  ;;  %5804 = vadd.xlane.f32.xlu1 %v5782_v61  ;;  %5802 = vadd.xlane.f32.xlu0 %v5781_v18  ;;  %v8969_v15 = vld [vmem:[%s12651_s14 + $0x44] ss:$8 sps:$4 sm:$0xff]  }
 0x78c   : > { %6055 = vmatpush1.bf16.msra.mxu1 %v8964_v26 }
 0x78d   : > { %v5783_v16 = vmul.f32 %v11326_v34, %v11326_v34  ;;  %6056 = vmatprep.subr.bf16.mxu1 %v8969_v15 }
 0x78f   : > { %5806 = vadd.xlane.f32.xlu0 %v5783_v16 }
 0x790   : > { %v5728_v3 = vpop.xlane.xlu1 %5727  ;;  %6057 = vmatpush1.bf16.msra.mxu1 %v8967_v53 }
 0x791   : > { %v5752_v57 = vmul.f32 0.0078125, %v5728_v3  ;;  %6058 = vmatprep.subr.bf16.mxu1 %v8972_v35 }
 0x793   : > { %v11343_v58 = vsub.f32 %v11247_v0, %v5752_v57 }
 0x794   : > { %v5732_v4 = vpop.xlane.xlu1 %5731  ;;  %v5730_v11 = vpop.xlane.xlu0 %5729  ;;  %6059 = vmatpush1.bf16.msra.mxu1 %v8970_v30 }
 0x795   : > { %v5754_v9 = vmul.f32 0.0078125, %v5732_v4  ;;  %v5753_v39 = vmul.f32 0.0078125, %v5730_v11  ;;  %v5784_v36 = vmul.f32 %v11343_v58, %v11343_v58  ;;  %6060 = vmatprep.subr.bf16.mxu1 %v8975_v29 }
 0x797   : > { %v11354_v0 = vsub.f32 %v11251_v55, %v5754_v9  ;;  %v11357_v63 = vsub.f32 %v11254_v44, %v5753_v39  ;;  %5808 = vadd.xlane.f32.xlu1 %v5784_v36  ;;  %v8978_v44 = vld [vmem:[%s12651_s14 + $0x14] ss:$8 sps:$4 sm:$0xff]   ;;  %v11410_v39 = vld [vmem:[%s12647_s10] ss:$0 sm:$0xff] }
 0x798   : > { %v5734_v24 = vpop.xlane.xlu0 %5733  ;;  %6061 = vmatpush1.bf16.msra.mxu1 %v8973_v2 }
 0x799   : > { %v5755_v62 = vmul.f32 0.0078125, %v5734_v24  ;;  %v5786_v5 = vmul.f32 %v11354_v0, %v11354_v0  ;;  %v5785_v55 = vmul.f32 %v11357_v63, %v11357_v63  ;;  %6062 = vmatprep.subr.bf16.mxu1 %v8978_v44 }
 0x79b   : > { %v11373_v6 = vsub.f32 %v11259_v41, %v5755_v62  ;;  %5812 = vadd.xlane.f32.xlu1 %v5786_v5  ;;  %5810 = vadd.xlane.f32.xlu0 %v5785_v55  ;;  %v8979_v41 = vld [vmem:[%s12651_s14] ss:$8 sps:$4 sm:$0xff]  }
 0x79c   : > { %6063 = vmatpush1.bf16.msra.mxu1 %v8976_v31  ;;  %v11417_v55 = vld [vmem:[%s12648_s11] ss:$0 sm:$0xff] }
 0x79d   : > { %v5787_v21 = vmul.f32 %v11373_v6, %v11373_v6  ;;  %6064 = vmatprep.subr.bf16.mxu1 %v8981_v56 }
 0x79f   : > { %5814 = vadd.xlane.f32.xlu0 %v5787_v21 }
 0x7a0   : > { %6065 = vmatpush1.bf16.msra.mxu1 %v8979_v41 }
 0x7c4   : > { %v5736_v17 = vpop.xlane.xlu1 %5735 }
 0x7c5   : > { %v5756_v45 = vmul.f32 0.0078125, %v5736_v17 }
 0x7c7   : > { %v11387_v1 = vsub.f32 %v11263_v52, %v5756_v45 }
 0x7c8   : > { %v5740_v51 = vpop.xlane.xlu1 %5739  ;;  %v5738_v48 = vpop.xlane.xlu0 %5737 }
 0x7c9   : > { %v5758_v54 = vmul.f32 0.0078125, %v5740_v51  ;;  %v5757_v25 = vmul.f32 0.0078125, %v5738_v48  ;;  %v5788_v28 = vmul.f32 %v11387_v1, %v11387_v1 }
 0x7cb   : > { %v11392_v49 = vsub.f32 %v11267_v27, %v5758_v54  ;;  %v11395_v42 = vsub.f32 %v11270_v38, %v5757_v25  ;;  %5816 = vadd.xlane.f32.xlu1 %v5788_v28 }
 0x7cc   : > { %v5742_v10 = vpop.xlane.xlu0 %5741 }
 0x7cd   : > { %v5759_v23 = vmul.f32 0.0078125, %v5742_v10  ;;  %v5790_v52 = vmul.f32 %v11392_v49, %v11392_v49  ;;  %v5789_v50 = vmul.f32 %v11395_v42, %v11395_v42 }
 0x7cf   : > { %v11402_v46 = vsub.f32 %v11275_v19, %v5759_v23  ;;  %5820 = vadd.xlane.f32.xlu1 %v5790_v52  ;;  %5818 = vadd.xlane.f32.xlu0 %v5789_v50 }
 0x7d1   : > { %v5791_v27 = vmul.f32 %v11402_v46, %v11402_v46 }
 0x7d3   : > { %5822 = vadd.xlane.f32.xlu0 %v5791_v27 }
 0x800   : > { %v5793_v38 = vpop.xlane.xlu1 %5792 }
 0x801   : > { %v5824_v22 = vmul.f32 0.0078125, %v5793_v38 }
 0x803   : > { %v5840_v37 = vadd.f32 1e-05, %v5824_v22 }
 0x804   : > { %v5797_v8 = vpop.xlane.xlu1 %5796  ;;  %v5795_v20 = vpop.xlane.xlu0 %5794 }
 0x805   : > { %9126 = vrsqrt.f32 %v5840_v37  ;;  %v5826_v60 = vmul.f32 0.0078125, %v5797_v8  ;;  %v5825_v61 = vmul.f32 0.0078125, %v5795_v20 }
 0x807   : > { %v5841_v18 = vadd.f32 1e-05, %v5825_v61  ;;  %v5842_v13 = vadd.f32 1e-05, %v5826_v60 }
 0x808   : > { %v5799_v43 = vpop.xlane.xlu0 %5798 }
 0x809   : > { %v5827_v16 = vmul.f32 0.0078125, %v5799_v43  ;;  %9128 = vrsqrt.f32 %v5841_v18 }
 0x80a   : > { %9130 = vrsqrt.f32 %v5842_v13 }
 0x80b   : > { %v5843_v19 = vadd.f32 1e-05, %v5827_v16 }
 0x80d   : > { %9132 = vrsqrt.f32 %v5843_v19 }
 0x810   : > { %v5801_v26 = vpop.xlane.xlu1 %5800 }
 0x811   : > { %v5828_v3 = vmul.f32 0.0078125, %v5801_v26 }
 0x812   : > { %v9127_v15 = vpop.eup %9126 }
 0x813   : > { %v5844_v57 = vadd.f32 1e-05, %v5828_v3  ;;  %v5872_v53 = vmul.f32 %v9127_v15, %v11285_v14 }
 0x814   : > { %v5805_v4 = vpop.xlane.xlu1 %5804  ;;  %v5803_v11 = vpop.xlane.xlu0 %5802 }
 0x815   : > { %9134 = vrsqrt.f32 %v5844_v57  ;;  %v5830_v35 = vmul.f32 0.0078125, %v5805_v4  ;;  %v5829_v9 = vmul.f32 0.0078125, %v5803_v11  ;;  %v5895_v62 = vmul.f32 %v11410_v39, %v5872_v53 }
 0x816   : > { %v9129_v36 = vpop.eup %9128 }
 0x817   : > { %v5845_v30 = vadd.f32 1e-05, %v5829_v9  ;;  %v5873_v24 = vmul.f32 %v9129_v36, %v11290_v7  ;;  %v5846_v2 = vadd.f32 1e-05, %v5830_v35  ;;  %v9131_v5 = vpop.eup %9130  ;;  %v11422_v7 = vadd.f32 %v11417_v55, %v5895_v62 }
 0x818   : > { %v5807_v29 = vpop.xlane.xlu0 %5806  ;;  %v5874_v17 = vmul.f32 %v9131_v5, %v11293_v59 }
 0x819   : > { %v5831_v14 = vmul.f32 0.0078125, %v5807_v29  ;;  %9136 = vrsqrt.f32 %v5845_v30  ;;  %v5896_v31 = vmul.f32 %v11410_v39, %v5873_v24  ;;  %12802 = vst [vmem:[#allocation49_spill] sm:$0xff] %v11422_v7 }
 0x81a   : > { %v9133_v44 = vpop.eup %9132  ;;  %9138 = vrsqrt.f32 %v5846_v2  ;;  %v5897_v54 = vmul.f32 %v11410_v39, %v5874_v17 }
 0x81b   : > { %v5847_v21 = vadd.f32 1e-05, %v5831_v14  ;;  %v5875_v56 = vmul.f32 %v9133_v44, %v11300_v32  ;;  %v11425_v41 = vadd.f32 %v11417_v55, %v5896_v31 }
 0x81c   : > { %v11437_v52 = vadd.f32 %v11417_v55, %v5897_v54 }
 0x81d   : > { %12803 = vst [vmem:[#allocation50_spill] sm:$0xff] %v11425_v41  ;;  %9140 = vrsqrt.f32 %v5847_v21  ;;  %v5934_v45 = vpack.c.bf16 %v11425_v41, %v11422_v7  ;;  %v5898_v51 = vmul.f32 %v11410_v39, %v5875_v56 }
 0x81e   : > { %12805 = vst [vmem:[#allocation52_spill] sm:$0xff] %v11437_v52 }
 0x81f   : > { %6083 = vmatmul.mubr.bf16.vlgmr.msra.gmra.mxu1 %v5934_v45  ;;  %v11434_v28 = vadd.f32 %v11417_v55, %v5898_v51 }
 0x820   : > { %v5809_v48 = vpop.xlane.xlu1 %5808  ;;  %6092 = vmatprep.mubr.bf16.mxu1 %v12785_v12 }
 0x821   : > { %v5832_v32 = vmul.f32 0.0078125, %v5809_v48  ;;  %12804 = vst [vmem:[#allocation51_spill] sm:$0xff] %v11434_v28  ;;  %v5935_v22 = vpack.c.bf16 %v11434_v28, %v11437_v52 }
 0x822   : > { %v9135_v25 = vpop.eup %9134 }
 0x823   : > { %v5848_v10 = vadd.f32 1e-05, %v5832_v32  ;;  %v5876_v50 = vmul.f32 %v9135_v25, %v11305_v33 }
 0x824   : > { %v5813_v23 = vpop.xlane.xlu1 %5812  ;;  %v5811_v59 = vpop.xlane.xlu0 %5810 }
 0x825   : > { %9142 = vrsqrt.f32 %v5848_v10  ;;  %v5834_v27 = vmul.f32 0.0078125, %v5813_v23  ;;  %v5833_v38 = vmul.f32 0.0078125, %v5811_v59  ;;  %v5899_v18 = vmul.f32 %v11410_v39, %v5876_v50 }
 0x826   : > { %v9137_v37 = vpop.eup %9136 }
 0x827   : > { %v5849_v8 = vadd.f32 1e-05, %v5833_v38  ;;  %v5850_v20 = vadd.f32 1e-05, %v5834_v27  ;;  %6093 = vmatmul.mubr.bf16.gmra.mxu1 %v5935_v22  ;;  %v5877_v61 = vmul.f32 %v9137_v37, %v11313_v40  ;;  %v9139_v13 = vpop.eup %9138  ;;  %v11448_v3 = vadd.f32 %v11417_v55, %v5899_v18 }
 0x828   : > { %v5815_v60 = vpop.xlane.xlu0 %5814  ;;  %6102 = vmatprep.mubr.bf16.mxu1 %v12785_v12  ;;  %v5878_v40 = vmul.f32 %v9139_v13, %v11310_v47 }
 0x829   : > { %v5835_v43 = vmul.f32 0.0078125, %v5815_v60  ;;  %9144 = vrsqrt.f32 %v5849_v8  ;;  %v5900_v16 = vmul.f32 %v11410_v39, %v5877_v61  ;;  %12806 = vst [vmem:[#allocation53_spill] sm:$0xff] %v11448_v3 }
 0x82a   : > { %v9141_v33 = vpop.eup %9140  ;;  %9146 = vrsqrt.f32 %v5850_v20  ;;  %v5901_v4 = vmul.f32 %v11410_v39, %v5878_v40 }
 0x82b   : > { %v5851_v19 = vadd.f32 1e-05, %v5835_v43  ;;  %v5879_v26 = vmul.f32 %v9141_v33, %v11326_v34  ;;  %v11451_v15 = vadd.f32 %v11417_v55, %v5900_v16 }
 0x82c   : > { %v11463_v35 = vadd.f32 %v11417_v55, %v5901_v4  ;;  %v8985_v4 = vld [vmem:[#allocation14 + $0x30] sm:$0xff]  }
 0x82d   : > { %12807 = vst [vmem:[#allocation54_spill] sm:$0xff] %v11451_v15  ;;  %9148 = vrsqrt.f32 %v5851_v19  ;;  %v5936_v57 = vpack.c.bf16 %v11451_v15, %v11448_v3  ;;  %v5902_v53 = vmul.f32 %v11410_v39, %v5879_v26 }
 0x82e   : > { %12809 = vst [vmem:[#allocation56_spill] sm:$0xff] %v11463_v35 }
 0x82f   : > { %6103 = vmatmul.mubr.bf16.gmra.mxu1 %v5936_v57  ;;  %v11460_v11 = vadd.f32 %v11417_v55, %v5902_v53  ;;  %v8983_v57 = vld [vmem:[#allocation14 + $0x38] sm:$0xff]   ;;  %v8984_v53 = vld [vmem:[#allocation14 + $0x70] sm:$0xff]  }
 0x830   : > { %6112 = vmatprep.mubr.bf16.mxu1 %v12785_v12 }
 0x831   : > { %12808 = vst [vmem:[#allocation55_spill] sm:$0xff] %v11460_v11  ;;  %v5937_v9 = vpack.c.bf16 %v11460_v11, %v11463_v35 }
 0x832   : > { %v9143_v34 = vpop.eup %9142 }
 0x833   : > { %v5880_v47 = vmul.f32 %v9143_v34, %v11343_v58 }
 0x835   : > { %v5903_v24 = vmul.f32 %v11410_v39, %v5880_v47  ;;  %v12819_v47 = vld [vmem:[#allocation31_spill] sm:$0xff] }
 0x836   : > { %v9145_v36 = vpop.eup %9144 }
 0x837   : > { %6113 = vmatmul.mubr.bf16.gmra.mxu1 %v5937_v9  ;;  %v5881_v30 = vmul.f32 %v9145_v36, %v11357_v63  ;;  %v9147_v2 = vpop.eup %9146  ;;  %v11474_v14 = vadd.f32 %v11417_v55, %v5903_v24  ;;  %v12820_v9 = vsub.s32 1, %v12819_v47  ;;  %v8987_v24 = vld [vmem:[#allocation14 + $0x28] sm:$0xff]  }
 0x838   : > { %6122 = vmatprep.mubr.bf16.mxu1 %v12785_v12  ;;  %v5882_v44 = vmul.f32 %v9147_v2, %v11354_v0 }
 0x839   : > { %v5904_v62 = vmul.f32 %v11410_v39, %v5881_v30  ;;  %12810 = vst [vmem:[#allocation57_spill] sm:$0xff] %v11474_v14 }
 0x83a   : > { %v9149_v29 = vpop.eup %9148  ;;  %v5905_v21 = vmul.f32 %v11410_v39, %v5882_v44 }
 0x83b   : > { %v5883_v5 = vmul.f32 %v9149_v29, %v11373_v6  ;;  %v11477_v58 = vadd.f32 %v11417_v55, %v5904_v62 }
 0x83c   : > { %v11489_v56 = vadd.f32 %v11417_v55, %v5905_v21 }
 0x83d   : > { %12811 = vst [vmem:[#allocation34_spill] sm:$0xff] %v11477_v58  ;;  %v5938_v63 = vpack.c.bf16 %v11477_v58, %v11474_v14  ;;  %v5906_v31 = vmul.f32 %v11410_v39, %v5883_v5 }
 0x83e   : > { %12813 = vst [vmem:[#allocation33_spill] sm:$0xff] %v11489_v56 }
 0x83f   : > { %6123 = vmatmul.mubr.bf16.gmra.mxu1 %v5938_v63  ;;  %v11486_v6 = vadd.f32 %v11417_v55, %v5906_v31  ;;  %v8988_v63 = vld [vmem:[#allocation14 + $0x60] sm:$0xff]  }
 0x840   : > { %6132 = vmatprep.mubr.bf16.mxu1 %v12785_v12 }
 0x841   : > { %12812 = vst [vmem:[#allocation35_spill] sm:$0xff] %v11486_v6  ;;  %v5939_v17 = vpack.c.bf16 %v11486_v6, %v11489_v56 }
 0x847   : > { %6133 = vmatmul.mubr.bf16.gmra.mxu1 %v5939_v17 }
 0x848   : > { %6142 = vmatprep.mubr.bf16.mxu1 %v12785_v12 }
 0x854   : > { %v5817_v0 = vpop.xlane.xlu1 %5816 }
 0x855   : > { %v5836_v45 = vmul.f32 0.0078125, %v5817_v0 }
 0x857   : > { %v5852_v51 = vadd.f32 1e-05, %v5836_v45 }
 0x858   : > { %v5821_v48 = vpop.xlane.xlu1 %5820  ;;  %v5819_v54 = vpop.xlane.xlu0 %5818 }
 0x859   : > { %9150 = vrsqrt.f32 %v5852_v51  ;;  %v5838_v32 = vmul.f32 0.0078125, %v5821_v48  ;;  %v5837_v25 = vmul.f32 0.0078125, %v5819_v54 }
 0x85b   : > { %v5853_v10 = vadd.f32 1e-05, %v5837_v25  ;;  %v5854_v23 = vadd.f32 1e-05, %v5838_v32  ;;  %v8989_v25 = vld [vmem:[#allocation14 + $0x20] sm:$0xff]  }
 0x85c   : > { %v5823_v59 = vpop.xlane.xlu0 %5822 }
 0x85d   : > { %v5839_v50 = vmul.f32 0.0078125, %v5823_v59  ;;  %9152 = vrsqrt.f32 %v5853_v10 }
 0x85e   : > { %9154 = vrsqrt.f32 %v5854_v23 }
 0x85f   : > { %v5855_v27 = vadd.f32 1e-05, %v5839_v50 }
 0x861   : > { %9156 = vrsqrt.f32 %v5855_v27 }
 0x866   : > { %v9151_v38 = vpop.eup %9150 }
 0x867   : > { %v5884_v22 = vmul.f32 %v9151_v38, %v11387_v1 }
 0x869   : > { %v5907_v20 = vmul.f32 %v11410_v39, %v5884_v22  ;;  %v8990_v22 = vld [vmem:[#allocation14 + $0x58] sm:$0xff]  }
 0x86a   : > { %v9153_v37 = vpop.eup %9152 }
 0x86b   : > { %v5885_v8 = vmul.f32 %v9153_v37, %v11395_v42  ;;  %v9155_v60 = vpop.eup %9154  ;;  %v11500_v43 = vadd.f32 %v11417_v55, %v5907_v20 }
 0x86c   : > { %v5886_v16 = vmul.f32 %v9155_v60, %v11392_v49  ;;  %v8982_v49 = vld [vmem:[#allocation14 + $0x78] sm:$0xff]  }
 0x86d   : > { %v5908_v18 = vmul.f32 %v11410_v39, %v5885_v8  ;;  %12814 = vst [vmem:[#allocation36_spill] sm:$0xff] %v11500_v43  ;;  %8194 = vmatprep.subr.bf16.mxu0 %v8982_v49  ;;  %v8993_v49 = vld [vmem:[#allocation14 + $0x10] sm:$0xff]  }
 0x86e   : > { %v9157_v61 = vpop.eup %9156  ;;  %v5909_v19 = vmul.f32 %v11410_v39, %v5886_v16  ;;  %8195 = vmatpush3.bf16.msra.mxu0 %v8983_v57 }
 0x86f   : > { %v5887_v13 = vmul.f32 %v9157_v61, %v11402_v46  ;;  %v11503_v33 = vadd.f32 %v11417_v55, %v5908_v18  ;;  %8196 = vmatprep.subr.bf16.mxu0 %v8984_v53  ;;  %v8991_v18 = vld [vmem:[#allocation14 + $0x18] sm:$0xff]  }
 0x870   : > { %v11515_v26 = vadd.f32 %v11417_v55, %v5909_v19 }
 0x871   : > { %12815 = vst [vmem:[#allocation37_spill] sm:$0xff] %v11503_v33  ;;  %v5940_v1 = vpack.c.bf16 %v11503_v33, %v11500_v43  ;;  %v5910_v42 = vmul.f32 %v11410_v39, %v5887_v13  ;;  %v8986_v39 = vld [vmem:[#allocation14 + $0x68] sm:$0xff]  }
 0x872   : > { %12817 = vst [vmem:[#allocation38_spill] sm:$0xff] %v11515_v26  ;;  %8197 = vmatpush3.bf16.msra.mxu0 %v8985_v4 }
 0x873   : > { %6143 = vmatmul.mubr.bf16.gmra.mxu1 %v5940_v1  ;;  %v11512_v46 = vadd.f32 %v11417_v55, %v5910_v42  ;;  %8198 = vmatprep.subr.bf16.mxu0 %v8986_v39  ;;  %v12818_v55 = vld [vmem:[#allocation32_spill] sm:$0xff] }
 0x874   : > { %6152 = vmatprep.mubr.bf16.mxu1 %v12785_v12  ;;  %v5958_v12 = vld [vmem:[%s12652_s15] sm:$0x3]  ;;  %v8992_v42 = vld [vmem:[#allocation14 + $0x50] sm:$0xff]  }
 0x875   : > { %12816 = vst [vmem:[#allocation42_spill] sm:$0xff] %v11512_v46  ;;  %v5941_v40 = vpack.c.bf16 %v11512_v46, %v11515_v26  ;;  %v11523_v34 = vrot.slane %v5958_v12, %v12818_v55  ;;  %v11527_v36 = vrot.slane %v5958_v12, %v12820_v9  ;;  %v8994_v55 = vld [vmem:[#allocation14 + $0x48] sm:$0xff]  }
 0x876   : > { %8199 = vmatpush3.bf16.msra.mxu0 %v8987_v24 }
 0x877   : > { %8200 = vmatprep.subr.bf16.mxu0 %v8988_v63 }
 0x87a   : > { %8201 = vmatpush3.bf16.msra.mxu0 %v8989_v25 }
 0x87b   : > { %6153 = vmatmul.mubr.bf16.gmra.mxu1 %v5941_v40  ;;  %8202 = vmatprep.subr.bf16.mxu0 %v8990_v22 }
 0x87e   : > { %8203 = vmatpush3.bf16.msra.mxu0 %v8991_v18 }
 0x87f   : > { %8204 = vmatprep.subr.bf16.mxu0 %v8992_v42 }
 0x882   : > { %8205 = vmatpush3.bf16.msra.mxu0 %v8993_v49 }
 0x883   : > { %8206 = vmatprep.subr.bf16.mxu0 %v8994_v55 }
 0x8df   : > { %v6084_v30 = vpop.f32.mrf.mxu1 }
 0x8e0   : > { %v11530_v2 = vadd.f32 %v6084_v30, %v11523_v34 }
 0x8e1   : > { %v6086_v29 = vpop.f32.mrf.mxu1 }
 0x8e2   : > { %v11533_v62 = vmul.f32 0.70710677, %v11530_v2  ;;  %v11536_v5 = vadd.f32 %v6086_v29, %v11527_v36  ;;  %v8995_v29 = vld [vmem:[#allocation14 + $0x8] sm:$0xff]  }
 0x8e3   : > { %v6088_v44 = vpop.f32.mrf.mxu1  ;;  %8207 = vmatpush3.bf16.msra.mxu0 %v8995_v29 }
 0x8e4   : > { %v11539_v31 = vand.u32 2147483647, %v11533_v62  ;;  %v11542_v21 = vmul.f32 0.70710677, %v11536_v5  ;;  %v11545_v17 = vadd.f32 %v6088_v44, %v11523_v34  ;;  %vm6867_vm7 = vcmp.ge.f32.partialorder %v11533_v62, 0.0 }
 0x8e5   : > { %v6090_v0 = vpop.f32.mrf.mxu1 }
 0x8e6   : > { %v6259_v45 = vmul.f32 0.3275911, %v11539_v31  ;;  %v11549_v51 = vand.u32 2147483647, %v11542_v21  ;;  %v11552_v48 = vmul.f32 0.70710677, %v11545_v17  ;;  %v11555_v54 = vadd.f32 %v6090_v0, %v11527_v36 }
 0x8e7   : > { %v6094_v32 = vpop.f32.mrf.mxu1  ;;  %v6675_v25 = vsub.f32 0.0, %v11539_v31  ;;  %vm6868_vm9 = vcmp.ge.f32.partialorder %v11542_v21, 0.0 }
 0x8e8   : > { %v6291_v10 = vadd.f32 1.0, %v6259_v45  ;;  %v6260_v23 = vmul.f32 0.3275911, %v11549_v51  ;;  %v11559_v59 = vand.u32 2147483647, %v11552_v48  ;;  %v11569_v60 = vadd.f32 %v6094_v32, %v11523_v34  ;;  %v8996_v45 = vld [vmem:[#allocation14 + $0x40] sm:$0xff]  }
 0x8e9   : > { %v11562_v50 = vmul.f32 0.70710677, %v11555_v54  ;;  %v6096_v27 = vpop.f32.mrf.mxu1  ;;  %8208 = vmatprep.subr.bf16.mxu0 %v8996_v45  ;;  %vm6869_vm8 = vcmp.ge.f32.partialorder %v11552_v48, 0.0 }
 0x8ea   : > { %9158 = vrcp.f32 %v6291_v10  ;;  %v6292_v38 = vadd.f32 1.0, %v6260_v23  ;;  %v6261_v37 = vmul.f32 0.3275911, %v11559_v59  ;;  %v11572_v61 = vadd.f32 %v6096_v27, %v11527_v36 }
 0x8eb   : > { %v11566_v8 = vand.u32 2147483647, %v11562_v50  ;;  %v6098_v20 = vpop.f32.mrf.mxu1  ;;  %v11576_v1 = vmul.f32 0.70710677, %v11569_v60  ;;  %v6677_v42 = vsub.f32 0.0, %v11559_v59  ;;  %vm6870_vm10 = vcmp.ge.f32.partialorder %v11562_v50, 0.0 }
 0x8ec   : > { %9160 = vrcp.f32 %v6292_v38  ;;  %v6293_v13 = vadd.f32 1.0, %v6261_v37  ;;  %v11582_v53 = vmul.f32 0.70710677, %v11572_v61  ;;  %v11585_v4 = vadd.f32 %v6098_v20, %v11523_v34  ;;  %v8997_v38 = vld [vmem:[#allocation14] sm:$0xff]  }
 0x8ed   : > { %v6262_v16 = vmul.f32 0.3275911, %v11566_v8  ;;  %v6100_v40 = vpop.f32.mrf.mxu1  ;;  %v11579_v57 = vand.u32 2147483647, %v11576_v1  ;;  %v6676_v37 = vsub.f32 0.0, %v11549_v51  ;;  %8209 = vmatpush3.bf16.msra.mxu0 %v8997_v38  ;;  %vm6871_vm11 = vcmp.ge.f32.partialorder %v11576_v1, 0.0 }
 0x8ee   : > { %9162 = vrcp.f32 %v6293_v13  ;;  %v11589_v12 = vadd.f32 %v6100_v40, %v11527_v36  ;;  %v11592_v47 = vand.u32 2147483647, %v11582_v53  ;;  %v11595_v9 = vmul.f32 0.70710677, %v11585_v4 }
 0x8ef   : > { %v6294_v19 = vadd.f32 1.0, %v6262_v16  ;;  %v6263_v39 = vmul.f32 0.3275911, %v11579_v57  ;;  %v6104_v24 = vpop.f32.mrf.mxu1  ;;  %v6707_v40 = vmul.f32 %v6675_v25, %v11539_v31  ;;  %v6708_v29 = vmul.f32 %v6676_v37, %v11549_v51 }
 0x8f0   : > { %v6264_v44 = vmul.f32 0.3275911, %v11592_v47  ;;  %v11599_v63 = vand.u32 2147483647, %v11595_v9  ;;  %v11602_v0 = vmul.f32 0.70710677, %v11589_v12  ;;  %v11609_v27 = vadd.f32 %v6104_v24, %v11523_v34 }
 0x8f1   : > { %9164 = vrcp.f32 %v6294_v19  ;;  %v6295_v30 = vadd.f32 1.0, %v6263_v39  ;;  %v6106_v55 = vpop.f32.mrf.mxu1  ;;  %v6709_v25 = vmul.f32 %v6677_v42, %v11559_v59  ;;  %v6678_v42 = vsub.f32 0.0, %v11566_v8 }
 0x8f2   : > { %v6296_v10 = vadd.f32 1.0, %v6264_v44  ;;  %v6265_v23 = vmul.f32 0.3275911, %v11599_v63  ;;  %v11614_v20 = vand.u32 2147483647, %v11602_v0  ;;  %v11635_v38 = vadd.f32 %v6106_v55, %v11527_v36 }
 0x8f3   : > { %9166 = vrcp.f32 %v6295_v30  ;;  %v11623_v39 = vmul.f32 0.70710677, %v11609_v27  ;;  %vm6872_vm12 = vcmp.ge.f32.partialorder %v11582_v53, 0.0  ;;  %vm6873_vm13 = vcmp.ge.f32.partialorder %v11595_v9, 0.0 }
 0x8f4   : > { %9168 = vrcp.f32 %v6296_v10  ;;  %v6297_v18 = vadd.f32 1.0, %v6265_v23  ;;  %v6266_v19 = vmul.f32 0.3275911, %v11614_v20  ;;  %v6682_v35 = vsub.f32 0.0, %v11614_v20 }
 0x8f5   : > { %v11631_v23 = vand.u32 2147483647, %v11623_v39  ;;  %vm6874_vm14 = vcmp.ge.f32.partialorder %v11602_v0, 0.0  ;;  %vm6875_vm15 = vcmp.ge.f32.partialorder %v11623_v39, 0.0 }
 0x8f6   : > { %9170 = vrcp.f32 %v6297_v18  ;;  %v6298_v44 = vadd.f32 1.0, %v6266_v19 }
 0x8f7   : > { %v11604_v32 = vpop.eup %9158  ;;  %v6267_v18 = vmul.f32 0.3275911, %v11631_v23 }
 0x8f8   : > { %v6387_v22 = vmul.f32 1.0614054, %v11604_v32  ;;  %9172 = vrcp.f32 %v6298_v44  ;;  %v6743_v44 = vmul.f32 1.442695, %v6709_v25  ;;  %v6710_v25 = vmul.f32 %v6678_v42, %v11566_v8 }
 0x8f9   : > { %v11616_v13 = vpop.eup %9160  ;;  %v6299_v55 = vadd.f32 1.0, %v6267_v18 }
 0x8fa   : > { %v6419_v16 = vadd.f32 -1.4531521, %v6387_v22  ;;  %v6388_v49 = vmul.f32 1.0614054, %v11616_v13 }
 0x8fb   : > { %v11625_v30 = vpop.eup %9162 }
 0x8fc   : > { %v6451_v24 = vmul.f32 %v11604_v32, %v6419_v16  ;;  %v6420_v45 = vadd.f32 -1.4531521, %v6388_v49  ;;  %v6389_v10 = vmul.f32 1.0614054, %v11625_v30  ;;  %v6739_v16 = vmul.f32 1.442695, %v6707_v40 }
 0x8fd   : > { %v6741_v49 = vmul.f32 1.442695, %v6708_v29  ;;  %v11646_v40 = vmul.f32 0.70710677, %v11635_v38  ;;  %v6679_v29 = vsub.f32 0.0, %v11579_v57 }
 0x8fe   : > { %v6483_v31 = vadd.f32 1.4214138, %v6451_v24  ;;  %v11637_v22 = vpop.eup %9164  ;;  %v6452_v51 = vmul.f32 %v11616_v13, %v6420_v45  ;;  %v6421_v37 = vadd.f32 -1.4531521, %v6389_v10  ;;  %9174 = vpow2.f32 %v6739_v16 }
 0x8ff   : > { %v6390_v46 = vmul.f32 1.0614054, %v11637_v22  ;;  %v11655_v18 = vand.u32 2147483647, %v11646_v40  ;;  %9176 = vrcp.f32 %v6299_v55  ;;  %vm6876_vm0 = vcmp.ge.f32.partialorder %v11646_v40, 0.0 }
 0x900   : > { %v6515_v19 = vmul.f32 %v11604_v32, %v6483_v31  ;;  %v6484_v24 = vadd.f32 1.4214138, %v6452_v51  ;;  %v6453_v59 = vmul.f32 %v11625_v30, %v6421_v37  ;;  %v11648_v45 = vpop.eup %9166  ;;  %9178 = vpow2.f32 %v6741_v49 }
 0x901   : > { %v6422_v26 = vadd.f32 -1.4531521, %v6390_v46  ;;  %v6391_v37 = vmul.f32 1.0614054, %v11648_v45  ;;  %v11659_v43 = vpop.eup %9168  ;;  %v6268_v56 = vmul.f32 0.3275911, %v11655_v18  ;;  %9180 = vpow2.f32 %v6743_v44 }
 0x902   : > { %v6547_v10 = vadd.f32 -0.28449672, %v6515_v19  ;;  %v6485_v33 = vadd.f32 1.4214138, %v6453_v59  ;;  %v6516_v31 = vmul.f32 %v11616_v13, %v6484_v24  ;;  %v6680_v59 = vsub.f32 0.0, %v11592_v47 }
 0x903   : > { %v6454_v51 = vmul.f32 %v11637_v22, %v6422_v26  ;;  %v6423_v19 = vadd.f32 -1.4531521, %v6391_v37  ;;  %v6711_v26 = vmul.f32 %v6679_v29, %v11579_v57  ;;  %v6392_v6 = vmul.f32 1.0614054, %v11659_v43  ;;  %v11667_v42 = vpop.eup %9170 }
 0x904   : > { %v6517_v46 = vmul.f32 %v11625_v30, %v6485_v33  ;;  %v6579_v58 = vmul.f32 %v11604_v32, %v6547_v10  ;;  %v6548_v33 = vadd.f32 -0.28449672, %v6516_v31  ;;  %v6745_v49 = vmul.f32 1.442695, %v6710_v25 }
 0x905   : > { %v6486_v16 = vadd.f32 1.4214138, %v6454_v51  ;;  %v6455_v8 = vmul.f32 %v11648_v45, %v6423_v19  ;;  %v6424_v55 = vadd.f32 -1.4531521, %v6392_v6  ;;  %v6681_v51 = vsub.f32 0.0, %v11599_v63  ;;  %v11673_v11 = vpop.eup %9172 }
 0x906   : > { %v6549_v24 = vadd.f32 -0.28449672, %v6517_v46  ;;  %v6300_v37 = vadd.f32 1.0, %v6268_v56  ;;  %v6393_v14 = vmul.f32 1.0614054, %v11667_v42  ;;  %v6712_v31 = vmul.f32 %v6680_v59, %v11592_v47 }
 0x907   : > { %v6518_v57 = vmul.f32 %v11637_v22, %v6486_v16  ;;  %v6487_v29 = vadd.f32 1.4214138, %v6455_v8  ;;  %v6747_v10 = vmul.f32 1.442695, %v6711_v26  ;;  %v6456_v44 = vmul.f32 %v11659_v43, %v6424_v55 }
 0x908   : > { %v6581_v46 = vmul.f32 %v11625_v30, %v6549_v24  ;;  %9182 = vrcp.f32 %v6300_v37  ;;  %v6611_v25 = vadd.f32 0.2548296, %v6579_v58  ;;  %v6580_v6 = vmul.f32 %v11616_v13, %v6548_v33 }
 0x909   : > { %v6519_v56 = vmul.f32 %v11648_v45, %v6487_v29  ;;  %v6425_v19 = vadd.f32 -1.4531521, %v6393_v14  ;;  %v6488_v24 = vadd.f32 1.4214138, %v6456_v44  ;;  %v6713_v16 = vmul.f32 %v6681_v51, %v11599_v63 }
 0x90a   : > { %v6394_v8 = vmul.f32 1.0614054, %v11673_v11  ;;  %v6613_v15 = vadd.f32 0.2548296, %v6581_v46  ;;  %v6550_v26 = vadd.f32 -0.28449672, %v6518_v57  ;;  %9184 = vpow2.f32 %v6745_v49 }
 0x90b   : > { %v6457_v55 = vmul.f32 %v11667_v42, %v6425_v19  ;;  %v6551_v47 = vadd.f32 -0.28449672, %v6519_v56  ;;  %v6520_v58 = vmul.f32 %v11659_v43, %v6488_v24  ;;  %v9175_v33 = vpop.eup %9174  ;;  %v6643_v37 = vmul.f32 %v11604_v32, %v6611_v25 }
 0x90c   : > { %v6426_v59 = vadd.f32 -1.4531521, %v6394_v8  ;;  %v6612_v14 = vadd.f32 0.2548296, %v6580_v6  ;;  %v6749_v29 = vmul.f32 1.442695, %v6712_v31  ;;  %9186 = vpow2.f32 %v6747_v10  ;;  %v11686_v3 = vpop.eup %9176 }
 0x90d   : > { %v6489_v44 = vadd.f32 1.4214138, %v6457_v55  ;;  %v6751_v63 = vmul.f32 1.442695, %v6713_v16  ;;  %v6714_v51 = vmul.f32 %v6682_v35, %v11614_v20  ;;  %v6645_v46 = vmul.f32 %v11625_v30, %v6613_v15  ;;  %v9179_v19 = vpop.eup %9178  ;;  %v6108_v55 = vpop.f32.mrf.mxu1 }
 0x90e   : > { %v6582_v49 = vmul.f32 %v11637_v22, %v6550_v26  ;;  %v6458_v56 = vmul.f32 %v11673_v11, %v6426_v59  ;;  %v6583_v32 = vmul.f32 %v11648_v45, %v6551_v47  ;;  %v6552_v25 = vadd.f32 -0.28449672, %v6520_v58  ;;  %v9181_v35 = vpop.eup %9180 }
 0x90f   : > { %v6521_v57 = vmul.f32 %v11667_v42, %v6489_v44  ;;  %v6803_v31 = vmul.f32 %v9175_v33, %v6643_v37  ;;  %v6644_v10 = vmul.f32 %v11616_v13, %v6612_v14  ;;  %9188 = vpow2.f32 %v6749_v29 }
 0x910   : > { %v11695_v20 = vmul.f32 0.5, %v11530_v2  ;;  %9190 = vpow2.f32 %v6751_v63  ;;  %v6490_v15 = vadd.f32 1.4214138, %v6458_v56  ;;  %v6395_v30 = vmul.f32 1.0614054, %v11686_v3 }
 0x911   : > { %v6553_v6 = vadd.f32 -0.28449672, %v6521_v57  ;;  %v11698_v24 = vmul.f32 %v9181_v35, %v6645_v46  ;;  %v6614_v16 = vadd.f32 0.2548296, %v6582_v49  ;;  %v6753_v8 = vmul.f32 1.442695, %v6714_v51 }
 0x912   : > { %v6683_v26 = vsub.f32 0.0, %v11631_v23  ;;  %v6615_v47 = vadd.f32 0.2548296, %v6583_v32  ;;  %v6584_v13 = vmul.f32 %v11659_v43, %v6552_v25  ;;  %v6522_v58 = vmul.f32 %v11673_v11, %v6490_v15 }
 0x913   : > { %v6427_v59 = vadd.f32 -1.4531521, %v6395_v30  ;;  %v6835_v2 = vsub.f32 1.0, %v6803_v31  ;;  %v6804_v37 = vmul.f32 %v9179_v19, %v6644_v10  ;;  %v6585_v14 = vmul.f32 %v11667_v42, %v6553_v6  ;;  %v6110_v19 = vpop.f32.mrf.mxu1 }
 0x914   : > { %v11708_v29 = vmul.f32 0.5, %v11536_v5  ;;  %v11711_v44 = vmul.f32 0.5, %v11545_v17  ;;  %v11714_v63 = vmul.f32 0.5, %v11555_v54  ;;  %v6554_v51 = vadd.f32 -0.28449672, %v6522_v58 }
 0x915   : > { %v11703_v33 = vpop.eup %9182  ;;  %v6646_v46 = vmul.f32 %v11637_v22, %v6614_v16  ;;  %v6459_v49 = vmul.f32 %v11686_v3, %v6427_v59  ;;  %v6715_v57 = vmul.f32 %v6683_v26, %v11631_v23  ;;  %v6837_v5 = vsub.f32 1.0, %v11698_v24 }
 0x916   : > { %v6396_v56 = vmul.f32 1.0614054, %v11703_v33  ;;  %v6647_v17 = vmul.f32 %v11648_v45, %v6615_v47  ;;  %v6616_v54 = vadd.f32 0.2548296, %v6584_v13  ;;  %9192 = vpow2.f32 %v6753_v8 }
 0x917   : > { %v9185_v32 = vpop.eup %9184  ;;  %v6899_v25 = vsub.f32 0.0, %v6835_v2  ;;  %v6836_v31 = vsub.f32 1.0, %v6804_v37  ;;  %v6617_v10 = vadd.f32 0.2548296, %v6585_v14  ;;  %v6491_v22 = vadd.f32 1.4214138, %v6459_v49  ;;  %v6114_v14 = vpop.f32.mrf.mxu1 }
 0x918   : > { %v6586_v6 = vmul.f32 %v11673_v11, %v6554_v51  ;;  %v6428_v35 = vadd.f32 -1.4531521, %v6396_v56  ;;  %v11726_v23 = vadd.f32 %v6108_v55, %v11523_v34  ;;  %v11729_v15 = vadd.f32 %v6110_v19, %v11527_v36 }
 0x919   : > { %v9187_v30 = vpop.eup %9186  ;;  %v6806_v24 = vmul.f32 %v9185_v32, %v6646_v46  ;;  %v11732_v45 = vmul.f32 0.5, %v11569_v60  ;;  %v11735_v16 = vmul.f32 0.5, %v11572_v61  ;;  %v6755_v8 = vmul.f32 1.442695, %v6715_v57 }
 0x91a   : > { %v6901_v26 = vsub.f32 0.0, %v6837_v5  ;;  %v6807_v47 = vmul.f32 %v9187_v30, %v6647_v17  ;;  %v6648_v13 = vmul.f32 %v11659_v43, %v6616_v54  ;;  %v11739_v58 = vmul.f32 0.5, %v11585_v4 }
 0x91b   : > { %v6931_v55 = vsel %vm6867_vm7, %v6835_v2, %v6899_v25  ;;  %v6900_v59 = vsub.f32 0.0, %v6836_v31  ;;  %v6649_v37 = vmul.f32 %v11667_v42, %v6617_v10  ;;  %v6523_v60 = vmul.f32 %v11686_v3, %v6491_v22  ;;  %v6116_v22 = vpop.f32.mrf.mxu1 }
 0x91c   : > { %v9189_v51 = vpop.eup %9188  ;;  %v6618_v61 = vadd.f32 0.2548296, %v6586_v6  ;;  %v6460_v46 = vmul.f32 %v11703_v33, %v6428_v35  ;;  %v11748_v43 = vmul.f32 0.70710677, %v11726_v23  ;;  %v11751_v4 = vmul.f32 0.70710677, %v11729_v15 }
 0x91d   : > { %v9191_v62 = vpop.eup %9190  ;;  %v6838_v2 = vsub.f32 1.0, %v6806_v24  ;;  %v11755_v42 = vmul.f32 0.5, %v11589_v12  ;;  %9194 = vpow2.f32 %v6755_v8  ;;  %v6684_v49 = vsub.f32 0.0, %v11655_v18 }
 0x91e   : > { %v6933_v57 = vsel %vm6869_vm8, %v6837_v5, %v6901_v26  ;;  %v6839_v56 = vsub.f32 1.0, %v6807_v47  ;;  %v6808_v19 = vmul.f32 %v9189_v51, %v6648_v13  ;;  %v11761_v17 = vand.u32 2147483647, %v11748_v43 }
 0x91f   : > { %v6963_v54 = vadd.f32 1.0, %v6931_v55  ;;  %v6932_v32 = vsel %vm6868_vm9, %v6836_v31, %v6900_v59  ;;  %v6809_v25 = vmul.f32 %v9191_v62, %v6649_v37  ;;  %v6555_v10 = vadd.f32 -0.28449672, %v6523_v60  ;;  %v6118_v37 = vpop.f32.mrf.mxu1 }
 0x920   : > { %v6650_v12 = vmul.f32 %v11673_v11, %v6618_v61  ;;  %v6492_v6 = vadd.f32 1.4214138, %v6460_v46  ;;  %v6269_v35 = vmul.f32 0.3275911, %v11761_v17  ;;  %v11768_v48 = vand.u32 2147483647, %v11751_v4 }
 0x921   : > { %v6965_v5 = vadd.f32 1.0, %v6933_v57  ;;  %v6902_v30 = vsub.f32 0.0, %v6838_v2  ;;  %v6716_v24 = vmul.f32 %v6684_v49, %v11655_v18  ;;  %v11772_v8 = vadd.f32 %v6114_v14, %v11523_v34  ;;  %v6120_v50 = vpop.f32.mrf.mxu1 }
 0x922   : > { %v6903_v21 = vsub.f32 0.0, %v6839_v56  ;;  %v6840_v31 = vsub.f32 1.0, %v6808_v19  ;;  %v6301_v11 = vadd.f32 1.0, %v6269_v35  ;;  %v6270_v26 = vmul.f32 0.3275911, %v11768_v48 }
 0x923   : > { %v9193_v47 = vpop.eup %9192  ;;  %v11778_v13 = vmul.f32 %v6963_v54, %v11695_v20  ;;  %v6841_v55 = vsub.f32 1.0, %v6809_v25  ;;  %v11781_v59 = vmul.f32 0.5, %v11609_v27  ;;  %v6587_v18 = vmul.f32 %v11686_v3, %v6555_v10 }
 0x924   : > { %v6810_v60 = vmul.f32 %v9193_v47, %v6650_v12  ;;  %v6524_v14 = vmul.f32 %v11703_v33, %v6492_v6  ;;  %9196 = vrcp.f32 %v6301_v11  ;;  %v6302_v51 = vadd.f32 1.0, %v6270_v26  ;;  %v6124_v26 = vpop.f32.mrf.mxu1 }
 0x925   : > { %v6964_v61 = vadd.f32 1.0, %v6932_v32  ;;  %v11786_v46 = vmul.f32 %v6965_v5, %v11711_v44  ;;  %v6934_v20 = vsel %vm6870_vm10, %v6838_v2, %v6902_v30  ;;  %v11791_v62 = vmul.f32 0.70710677, %v11772_v8 }
 0x926   : > { %v6935_v27 = vsel %vm6871_vm11, %v6839_v56, %v6903_v21  ;;  %v6904_v49 = vsub.f32 0.0, %v6840_v31  ;;  %v6757_v57 = vmul.f32 1.442695, %v6716_v24  ;;  %v11796_v19 = vadd.f32 %v6116_v22, %v11527_v36 }
 0x927   : > { %v6905_v54 = vsub.f32 0.0, %v6841_v55  ;;  %v6619_v32 = vadd.f32 0.2548296, %v6587_v18  ;;  %9198 = vrcp.f32 %v6302_v51  ;;  %v11800_v44 = vand.u32 2147483647, %v11791_v62 }
 0x928   : > { %v6842_v2 = vsub.f32 1.0, %v6810_v60  ;;  %v6556_v25 = vadd.f32 -0.28449672, %v6524_v14  ;;  %v11803_v10 = vmul.f32 0.70710677, %v11796_v19  ;;  %v11806_v1 = vadd.f32 %v6118_v37, %v11523_v34 }
 0x929   : > { %v11809_v56 = vmul.f32 %v6964_v61, %v11708_v29  ;;  %v6966_v22 = vadd.f32 1.0, %v6934_v20  ;;  %v11812_v12 = vmul.f32 0.5, %v11635_v38  ;;  %v6271_v6 = vmul.f32 0.3275911, %v11800_v44 }
 0x92a   : > { %v9195_v35 = vpop.eup %9194  ;;  %v6967_v30 = vadd.f32 1.0, %v6935_v27  ;;  %9200 = vpow2.f32 %v6757_v57  ;;  %v11818_v24 = vand.u32 2147483647, %v11803_v10  ;;  %v6936_v21 = vsel %vm6872_vm12, %v6840_v31, %v6904_v49  ;;  %v6126_v49 = vpop.f32.mrf.mxu1 }
 0x92b   : > { %v6937_v29 = vsel %vm6873_vm13, %v6841_v55, %v6905_v54  ;;  %v6651_v38 = vmul.f32 %v11686_v3, %v6619_v32  ;;  %v6303_v11 = vadd.f32 1.0, %v6271_v6  ;;  %v6906_v47 = vsub.f32 0.0, %v6842_v2 }
 0x92c   : > { %v6588_v18 = vmul.f32 %v11703_v33, %v6556_v25  ;;  %v6272_v37 = vmul.f32 0.3275911, %v11818_v24  ;;  %v11828_v60 = vmul.f32 0.70710677, %v11806_v1  ;;  %v11831_v14 = vmul.f32 %v6966_v22, %v11714_v63 }
 0x92d   : > { %v6685_v53 = vsub.f32 0.0, %v11761_v17  ;;  %9202 = vrcp.f32 %v6303_v11  ;;  %v11835_v9 = vadd.f32 %v6120_v50, %v11527_v36  ;;  %v6968_v3 = vadd.f32 1.0, %v6936_v21 }
 0x92e   : > { %v11838_v31 = vmul.f32 0.5, %v11726_v23  ;;  %v6304_v55 = vadd.f32 1.0, %v6272_v37  ;;  %v11841_v51 = vand.u32 2147483647, %v11828_v60  ;;  %v11844_v61 = vmul.f32 %v6967_v30, %v11732_v45 }
 0x92f   : > { %v6969_v20 = vadd.f32 1.0, %v6937_v29  ;;  %v6811_v63 = vmul.f32 %v9195_v35, %v6651_v38  ;;  %v11847_v27 = vmul.f32 0.70710677, %v11835_v9  ;;  %v6938_v57 = vsel %vm6874_vm14, %v6842_v2, %v6906_v47 }
 0x930   : > { %12821 = vst [vmem:[#allocation39_spill] sm:$0xff] %v11844_v61  ;;  %v6620_v54 = vadd.f32 0.2548296, %v6588_v18  ;;  %9204 = vrcp.f32 %v6304_v55  ;;  %v6273_v23 = vmul.f32 0.3275911, %v11841_v51  ;;  %v6717_v50 = vmul.f32 %v6685_v53, %v11761_v17  ;;  %v6128_v55 = vpop.f32.mrf.mxu1 }
 0x931   : > { %v11852_v32 = vpop.eup %9196  ;;  %v11856_v45 = vmul.f32 0.5, %v11729_v15  ;;  %v11859_v25 = vand.u32 2147483647, %v11847_v27  ;;  %v11862_v22 = vadd.f32 %v6124_v26, %v11523_v34  ;;  %v11865_v0 = vmul.f32 %v6968_v3, %v11735_v16 }
 0x932   : > { %v6397_v2 = vmul.f32 1.0614054, %v11852_v32  ;;  %v6305_v6 = vadd.f32 1.0, %v6273_v23  ;;  %v11870_v35 = vadd.f32 %v6126_v49, %v11527_v36  ;;  %v11873_v15 = vmul.f32 %v6969_v20, %v11739_v58 }
 0x933   : > { %v6970_v17 = vadd.f32 1.0, %v6938_v57  ;;  %v6843_v30 = vsub.f32 1.0, %v6811_v63  ;;  %v6274_v21 = vmul.f32 0.3275911, %v11859_v25  ;;  %v6652_v16 = vmul.f32 %v11703_v33, %v6620_v54 }
 0x934   : > { %12822 = vst [vmem:[#allocation41_spill] sm:$0xff] %v11873_v15  ;;  %v11876_v29 = vpop.eup %9198  ;;  %v6429_v38 = vadd.f32 -1.4531521, %v6397_v2  ;;  %9206 = vrcp.f32 %v6305_v6  ;;  %v11880_v11 = vmul.f32 0.70710677, %v11862_v22  ;;  %v11884_v18 = vmul.f32 0.5, %v11772_v8 }
 0x935   : > { %v6759_v26 = vmul.f32 1.442695, %v6717_v50  ;;  %v6398_v47 = vmul.f32 1.0614054, %v11876_v29  ;;  %v6306_v58 = vadd.f32 1.0, %v6274_v21  ;;  %v6686_v53 = vsub.f32 0.0, %v11768_v48 }
 0x936   : > { %v6461_v37 = vmul.f32 %v11852_v32, %v6429_v38  ;;  %v11889_v3 = vand.u32 2147483647, %v11880_v11  ;;  %v11892_v33 = vmul.f32 0.70710677, %v11870_v35  ;;  %v11897_v49 = vmul.f32 %v6970_v17, %v11755_v42 }
 0x937   : > { %v9201_v20 = vpop.eup %9200  ;;  %v6907_v8 = vsub.f32 0.0, %v6843_v30  ;;  %v6430_v57 = vadd.f32 -1.4531521, %v6398_v47  ;;  %9208 = vrcp.f32 %v6306_v58  ;;  %v11905_v21 = vadd.f32 %v6128_v55, %v11523_v34 }
 0x938   : > { %v6812_v54 = vmul.f32 %v9201_v20, %v6652_v16  ;;  %v6493_v23 = vadd.f32 1.4214138, %v6461_v37  ;;  %v6275_v50 = vmul.f32 0.3275911, %v11889_v3  ;;  %9210 = vpow2.f32 %v6759_v26 }
 0x939   : > { %v6462_v2 = vmul.f32 %v11876_v29, %v6430_v57  ;;  %v11902_v6 = vand.u32 2147483647, %v11892_v33  ;;  %v6718_v17 = vmul.f32 %v6686_v53, %v11768_v48  ;;  %v6687_v16 = vsub.f32 0.0, %v11800_v44 }
 0x93a   : > { %v11907_v38 = vpop.eup %9202  ;;  %v6525_v42 = vmul.f32 %v11852_v32, %v6493_v23  ;;  %v6307_v47 = vadd.f32 1.0, %v6275_v50  ;;  %v6939_v26 = vsel %vm6875_vm15, %v6843_v30, %v6907_v8  ;;  %v6844_v57 = vsub.f32 1.0, %v6812_v54 }
 0x93b   : > { %v6494_v58 = vadd.f32 1.4214138, %v6462_v2  ;;  %v6399_v37 = vmul.f32 1.0614054, %v11907_v38  ;;  %v6276_v20 = vmul.f32 0.3275911, %v11902_v6 }
 0x93c   : > { %v6557_v55 = vadd.f32 -0.28449672, %v6525_v42  ;;  %v6688_v63 = vsub.f32 0.0, %v11818_v24  ;;  %9212 = vrcp.f32 %v6307_v47  ;;  %v6689_v53 = vsub.f32 0.0, %v11841_v51 }
 0x93d   : > { %v11918_v23 = vpop.eup %9204  ;;  %v6431_v48 = vadd.f32 -1.4531521, %v6399_v37  ;;  %v6308_v50 = vadd.f32 1.0, %v6276_v20  ;;  %v11922_v39 = vmul.f32 0.70710677, %v11905_v21  ;;  %v6526_v30 = vmul.f32 %v11876_v29, %v6494_v58 }
 0x93e   : > { %v6761_v8 = vmul.f32 1.442695, %v6718_v17  ;;  %v11926_v54 = vmul.f32 0.5, %v11796_v19  ;;  %v6400_v2 = vmul.f32 1.0614054, %v11918_v23  ;;  %v6719_v47 = vmul.f32 %v6687_v16, %v11800_v44 }
 0x93f   : > { %v6463_v42 = vmul.f32 %v11907_v38, %v6431_v48  ;;  %9214 = vrcp.f32 %v6308_v50  ;;  %v11932_v37 = vand.u32 2147483647, %v11922_v39  ;;  %v6971_v20 = vadd.f32 1.0, %v6939_v26 }
 0x940   : > { %v6908_v5 = vsub.f32 0.0, %v6844_v57  ;;  %v6432_v28 = vadd.f32 -1.4531521, %v6400_v2  ;;  %v6720_v52 = vmul.f32 %v6688_v63, %v11818_v24  ;;  %v6589_v19 = vmul.f32 %v11852_v32, %v6557_v55 }
 0x941   : > { %v11935_v58 = vpop.eup %9206  ;;  %v6495_v17 = vadd.f32 1.4214138, %v6463_v42  ;;  %v6721_v41 = vmul.f32 %v6689_v53, %v11841_v51  ;;  %v6277_v48 = vmul.f32 0.3275911, %v11932_v37  ;;  %v6558_v7 = vadd.f32 -0.28449672, %v6526_v30 }
 0x942   : > { %v6464_v44 = vmul.f32 %v11918_v23, %v6432_v28  ;;  %v11942_v16 = vmul.f32 0.5, %v11806_v1  ;;  %v6401_v26 = vmul.f32 1.0614054, %v11935_v58  ;;  %v6763_v24 = vmul.f32 1.442695, %v6719_v47 }
 0x943   : > { %v6527_v50 = vmul.f32 %v11907_v38, %v6495_v17  ;;  %v6690_v63 = vsub.f32 0.0, %v11859_v25  ;;  %v6309_v2 = vadd.f32 1.0, %v6277_v48  ;;  %9216 = vpow2.f32 %v6761_v8 }
 0x944   : > { %v6496_v55 = vadd.f32 1.4214138, %v6464_v44  ;;  %v6765_v42 = vmul.f32 1.442695, %v6720_v52  ;;  %v6433_v51 = vadd.f32 -1.4531521, %v6401_v26  ;;  %v11947_v53 = vpop.eup %9208  ;;  %v6940_v28 = vsel %vm6876_vm0, %v6844_v57, %v6908_v5 }
 0x945   : > { %v6621_v30 = vadd.f32 0.2548296, %v6589_v19  ;;  %v6767_v1 = vmul.f32 1.442695, %v6721_v41  ;;  %9218 = vrcp.f32 %v6309_v2  ;;  %v9211_v61 = vpop.eup %9210  ;;  %v6590_v15 = vmul.f32 %v11876_v29, %v6558_v7 }
 0x946   : > { %v6528_v47 = vmul.f32 %v11918_v23, %v6496_v55  ;;  %v6465_v17 = vmul.f32 %v11935_v58, %v6433_v51  ;;  %v6402_v8 = vmul.f32 1.0614054, %v11947_v53  ;;  %v11956_v52 = vmul.f32 %v6971_v20, %v11781_v59 }
 0x947   : > { %v6559_v48 = vadd.f32 -0.28449672, %v6527_v50  ;;  %9220 = vpow2.f32 %v6763_v24  ;;  %v6722_v40 = vmul.f32 %v6690_v63, %v11859_v25  ;;  %v6972_v5 = vadd.f32 1.0, %v6940_v28 }
 0x948   : > { %9222 = vpow2.f32 %v6765_v42  ;;  %v6497_v41 = vadd.f32 1.4214138, %v6465_v17  ;;  %v11960_v57 = vmul.f32 0.5, %v11835_v9  ;;  %v6653_v19 = vmul.f32 %v11852_v32, %v6621_v30  ;;  %v6130_v17 = vpop.f32.mrf.mxu1 }
 0x949   : > { %v11962_v7 = vpop.eup %9212  ;;  %9224 = vpow2.f32 %v6767_v1  ;;  %v6434_v44 = vadd.f32 -1.4531521, %v6402_v8  ;;  %v6691_v26 = vsub.f32 0.0, %v11889_v3  ;;  %v6622_v59 = vadd.f32 0.2548296, %v6590_v15 }
 0x94a   : > { %v6560_v20 = vadd.f32 -0.28449672, %v6528_v47  ;;  %v6529_v50 = vmul.f32 %v11935_v58, %v6497_v41  ;;  %v6403_v25 = vmul.f32 1.0614054, %v11962_v7  ;;  %v6591_v24 = vmul.f32 %v11907_v38, %v6559_v48 }
 0x94b   : > { %v6466_v63 = vmul.f32 %v11947_v53, %v6434_v44  ;;  %v6769_v9 = vmul.f32 1.442695, %v6722_v40  ;;  %v11971_v2 = vmul.f32 0.5, %v11862_v22  ;;  %v11976_v51 = vmul.f32 0.5, %v11870_v35 }
 0x94c   : > { %v11973_v55 = vpop.eup %9214  ;;  %v6561_v32 = vadd.f32 -0.28449672, %v6529_v50  ;;  %v6435_v42 = vadd.f32 -1.4531521, %v6403_v25  ;;  %v6692_v15 = vsub.f32 0.0, %v11902_v6  ;;  %v11979_v28 = vmul.f32 %v9211_v61, %v6653_v19 }
 0x94d   : > { %v6498_v30 = vadd.f32 1.4214138, %v6466_v63  ;;  %v6723_v1 = vmul.f32 %v6691_v26, %v11889_v3  ;;  %v6693_v47 = vsub.f32 0.0, %v11932_v37  ;;  %v6654_v22 = vmul.f32 %v11876_v29, %v6622_v59 }
 0x94e   : > { %v6592_v8 = vmul.f32 %v11918_v23, %v6560_v20  ;;  %v6593_v48 = vmul.f32 %v11935_v58, %v6561_v32  ;;  %v6467_v40 = vmul.f32 %v11962_v7, %v6435_v42  ;;  %v6623_v35 = vadd.f32 0.2548296, %v6591_v24 }
 0x94f   : > { %v6530_v41 = vmul.f32 %v11947_v53, %v6498_v30  ;;  %9226 = vpow2.f32 %v6769_v9  ;;  %v6404_v61 = vmul.f32 1.0614054, %v11973_v55  ;;  %v6724_v3 = vmul.f32 %v6692_v15, %v11902_v6 }
 0x950   : > { %v6625_v19 = vadd.f32 0.2548296, %v6593_v48  ;;  %v6499_v44 = vadd.f32 1.4214138, %v6467_v40  ;;  %v11991_v26 = vadd.f32 %v6130_v17, %v11527_v36  ;;  %v9217_v29 = vpop.eup %9216  ;;  %vm6877_vm1 = vcmp.ge.f32.partialorder %v11748_v43, 0.0 }
 0x951   : > { %v6562_v59 = vadd.f32 -0.28449672, %v6530_v41  ;;  %v6771_v20 = vmul.f32 1.442695, %v6723_v1  ;;  %v6436_v50 = vadd.f32 -1.4531521, %v6404_v61  ;;  %v6725_v25 = vmul.f32 %v6693_v47, %v11932_v37 }
 0x952   : > { %v11995_v24 = vpop.eup %9218  ;;  %v6845_v63 = vsub.f32 1.0, %v11979_v28  ;;  %v6814_v9 = vmul.f32 %v9217_v29, %v6654_v22  ;;  %v6624_v32 = vadd.f32 0.2548296, %v6592_v8  ;;  %v6531_v42 = vmul.f32 %v11962_v7, %v6499_v44  ;;  %v6134_v28 = vpop.f32.mrf.mxu1 }
 0x953   : > { %v6655_v6 = vmul.f32 %v11907_v38, %v6623_v35  ;;  %v6594_v15 = vmul.f32 %v11947_v53, %v6562_v59  ;;  %v6468_v30 = vmul.f32 %v11973_v55, %v6436_v50  ;;  %v6405_v17 = vmul.f32 1.0614054, %v11995_v24 }
 0x954   : > { %v9221_v1 = vpop.eup %9220  ;;  %v6657_v48 = vmul.f32 %v11935_v58, %v6625_v19  ;;  %v6563_v37 = vadd.f32 -0.28449672, %v6531_v42  ;;  %v6773_v47 = vmul.f32 1.442695, %v6724_v3  ;;  %v12005_v40 = vmul.f32 0.70710677, %v11991_v26 }
 0x955   : > { %v9223_v22 = vpop.eup %9222  ;;  %v12008_v8 = vmul.f32 %v6972_v5, %v11812_v12  ;;  %vm6878_vm2 = vcmp.ge.f32.partialorder %v11751_v4, 0.0  ;;  %v6626_v38 = vadd.f32 0.2548296, %v6594_v15  ;;  %v6500_v35 = vadd.f32 1.4214138, %v6468_v30  ;;  %v6136_v15 = vpop.f32.mrf.mxu1 }
 0x956   : > { %v6437_v41 = vadd.f32 -1.4531521, %v6405_v17  ;;  %v9225_v61 = vpop.eup %9224  ;;  %v6909_v44 = vsub.f32 0.0, %v6845_v63  ;;  %v6846_v29 = vsub.f32 1.0, %v6814_v9  ;;  %v6656_v58 = vmul.f32 %v11918_v23, %v6624_v32 }
 0x957   : > { %9228 = vpow2.f32 %v6771_v20  ;;  %v6815_v19 = vmul.f32 %v9221_v1, %v6655_v6  ;;  %v6532_v3 = vmul.f32 %v11973_v55, %v6500_v35  ;;  %v6775_v50 = vmul.f32 1.442695, %v6725_v25 }
 0x958   : > { %v6469_v59 = vmul.f32 %v11995_v24, %v6437_v41  ;;  %v6817_v42 = vmul.f32 %v9225_v61, %v6657_v48  ;;  %9230 = vpow2.f32 %v6773_v47  ;;  %v12015_v12 = vand.u32 2147483647, %v12005_v40 }
 0x959   : > { %v6135_v5 = vadd.f32 %v6134_v28, %v11523_v34  ;;  %v6658_v30 = vmul.f32 %v11947_v53, %v6626_v38  ;;  %v6595_v9 = vmul.f32 %v11962_v7, %v6563_v37  ;;  %v6564_v23 = vadd.f32 -0.28449672, %v6532_v3 }
 0x95a   : > { %v6501_v20 = vadd.f32 1.4214138, %v6469_v59  ;;  %v6941_v32 = vsel %vm6877_vm1, %v6845_v63, %v6909_v44  ;;  %v6910_v6 = vsub.f32 0.0, %v6846_v29  ;;  %vm6879_vm3 = vcmp.ge.f32.partialorder %v11791_v62, 0.0  ;;  %v6138_v63 = vpop.f32.mrf.mxu1 }
 0x95b   : > { %v6816_v25 = vmul.f32 %v9223_v22, %v6656_v58  ;;  %v6278_v17 = vmul.f32 0.3275911, %v12015_v12  ;;  %v6847_v1 = vsub.f32 1.0, %v6815_v19  ;;  %vm6881_vm4 = vcmp.ge.f32.partialorder %v11828_v60, 0.0 }
 0x95c   : > { %v6596_v48 = vmul.f32 %v11973_v55, %v6564_v23  ;;  %v6533_v53 = vmul.f32 %v11995_v24, %v6501_v20  ;;  %9232 = vpow2.f32 %v6775_v50  ;;  %v9227_v37 = vpop.eup %9226  ;;  %v6849_v47 = vsub.f32 1.0, %v6817_v42 }
 0x95d   : > { %v6310_v28 = vadd.f32 1.0, %v6278_v17  ;;  %v12027_v38 = vmul.f32 0.70710677, %v6135_v5  ;;  %v6137_v43 = vadd.f32 %v6136_v15, %v11527_v36  ;;  %v6973_v35 = vadd.f32 1.0, %v6941_v32 }
 0x95e   : > { %vm6880_vm5 = vcmp.ge.f32.partialorder %v11803_v10, 0.0  ;;  %v6818_v22 = vmul.f32 %v9227_v37, %v6658_v30  ;;  %v6627_v41 = vadd.f32 0.2548296, %v6595_v9  ;;  %v6565_v61 = vadd.f32 -0.28449672, %v6533_v53  ;;  %v6140_v9 = vpop.f32.mrf.mxu1 }
 0x95f   : > { %v6942_v44 = vsel %vm6878_vm2, %v6846_v29, %v6910_v6  ;;  %v6848_v58 = vsub.f32 1.0, %v6816_v25  ;;  %9234 = vrcp.f32 %v6310_v28  ;;  %v12034_v19 = vand.u32 2147483647, %v12027_v38 }
 0x960   : > { %v6911_v3 = vsub.f32 0.0, %v6847_v1  ;;  %v6628_v59 = vadd.f32 0.2548296, %v6596_v48  ;;  %v12037_v50 = vmul.f32 0.5, %v11905_v21  ;;  %v12040_v42 = vmul.f32 0.5, %v11991_v26 }
 0x961   : > { %v6913_v15 = vsub.f32 0.0, %v6849_v47  ;;  %vm6882_vm6 = vcmp.ge.f32.partialorder %v11847_v27, 0.0  ;;  %v6597_v30 = vmul.f32 %v11995_v24, %v6565_v61  ;;  %v12044_v4 = vmul.f32 0.5, %v6135_v5 }
 0x962   : > { %v6279_v29 = vmul.f32 0.3275911, %v12034_v19  ;;  %v12048_v23 = vmul.f32 %v6973_v35, %v11838_v31  ;;  %v6974_v20 = vadd.f32 1.0, %v6942_v44  ;;  %v6850_v32 = vsub.f32 1.0, %v6818_v22  ;;  %v6144_v44 = vpop.f32.mrf.mxu1 }
 0x963   : > { %v6659_v21 = vmul.f32 %v11962_v7, %v6627_v41  ;;  %v6912_v6 = vsub.f32 0.0, %v6848_v58  ;;  %v12051_v25 = vmul.f32 0.70710677, %v6137_v43  ;;  %v12054_v17 = vadd.f32 %v6138_v63, %v11523_v34 }
 0x964   : > { %v6311_v26 = vadd.f32 1.0, %v6279_v29  ;;  %v9229_v48 = vpop.eup %9228  ;;  %v6943_v5 = vsel %vm6879_vm3, %v6847_v1, %v6911_v3  ;;  %v6660_v53 = vmul.f32 %v11973_v55, %v6628_v59  ;;  %v6694_v31 = vsub.f32 0.0, %v12015_v12 }
 0x965   : > { %v12061_v37 = vadd.f32 %v6140_v9, %v11527_v36  ;;  %v6945_v7 = vsel %vm6881_vm4, %v6849_v47, %v6913_v15  ;;  %v6629_v28 = vadd.f32 0.2548296, %v6597_v30  ;;  %v12066_v35 = vand.u32 2147483647, %v12051_v25  ;;  %v9231_v63 = vpop.eup %9230 }
 0x966   : > { %9236 = vrcp.f32 %v6311_v26  ;;  %v7031_v62 = vpack.c.bf16 %v12048_v23, %v11956_v52  ;;  %v12071_v1 = vmul.f32 %v6974_v20, %v11856_v45  ;;  %v6914_v55 = vsub.f32 0.0, %v6850_v32 }
 0x967   : > { %v6819_v22 = vmul.f32 %v9229_v48, %v6659_v21  ;;  %v6975_v41 = vadd.f32 1.0, %v6943_v5  ;;  %v6944_v61 = vsel %vm6880_vm5, %v6848_v58, %v6912_v6  ;;  %v6280_v60 = vmul.f32 0.3275911, %v12066_v35 }
 0x968   : > { %v12077_v47 = vmul.f32 0.70710677, %v12054_v17  ;;  %v6977_v3 = vadd.f32 1.0, %v6945_v7  ;;  %v6820_v59 = vmul.f32 %v9231_v63, %v6660_v53  ;;  %v6726_v15 = vmul.f32 %v6694_v31, %v12015_v12 }
 0x969   : > { %v12081_v30 = vmul.f32 0.70710677, %v12061_v37  ;;  %v9233_v45 = vpop.eup %9232  ;;  %vm6883_vm7 = vcmp.ge.f32.partialorder %v11880_v11, 0.0  ;;  %v6661_v29 = vmul.f32 %v11995_v24, %v6629_v28  ;;  %v12085_v10 = vmul.f32 0.5, %v6137_v43  ;;  %v6146_v43 = vpop.f32.mrf.mxu1 }
 0x96a   : > { %v6312_v58 = vadd.f32 1.0, %v6280_v60  ;;  %v12088_v9 = vand.u32 2147483647, %v12077_v47  ;;  %v6946_v20 = vsel %vm6882_vm6, %v6850_v32, %v6914_v55  ;;  %v6851_v21 = vsub.f32 1.0, %v6819_v22 }
 0x96b   : > { %v6695_v12 = vsub.f32 0.0, %v12034_v19  ;;  %v12094_v6 = vand.u32 2147483647, %v12081_v30  ;;  %v12097_v26 = vmul.f32 %v6975_v41, %v11884_v18  ;;  %v6976_v48 = vadd.f32 1.0, %v6944_v61 }
 0x96c   : > { %vm6884_vm8 = vcmp.ge.f32.partialorder %v11892_v33, 0.0  ;;  %9238 = vrcp.f32 %v6312_v58  ;;  %v6281_v24 = vmul.f32 0.3275911, %v12088_v9  ;;  %v12101_v5 = vpop.eup %9234  ;;  %v12104_v27 = vmul.f32 %v6977_v3, %v11942_v16 }
 0x96d   : > { %v6852_v32 = vsub.f32 1.0, %v6820_v59  ;;  %v6777_v53 = vmul.f32 1.442695, %v6726_v15  ;;  %v6282_v31 = vmul.f32 0.3275911, %v12094_v6  ;;  %v6978_v7 = vadd.f32 1.0, %v6946_v20  ;;  %v6148_v59 = vpop.f32.mrf.mxu1 }
 0x96e   : > { %v6821_v28 = vmul.f32 %v9233_v45, %v6661_v29  ;;  %v6406_v18 = vmul.f32 1.0614054, %v12101_v5  ;;  %v6313_v63 = vadd.f32 1.0, %v6281_v24  ;;  %v6915_v55 = vsub.f32 0.0, %v6851_v21 }
 0x96f   : > { %v6727_v22 = vmul.f32 %v6695_v12, %v12034_v19  ;;  %v6314_v41 = vadd.f32 1.0, %v6282_v31  ;;  %v7028_v61 = vpack.c.bf16 %v11831_v14, %v11809_v56  ;;  %v6696_v16 = vsub.f32 0.0, %v12066_v35 }
 0x970   : > { %v6438_v60 = vadd.f32 -1.4531521, %v6406_v18  ;;  %9240 = vrcp.f32 %v6313_v63  ;;  %v7030_v3 = vpack.c.bf16 %v11897_v49, %v11865_v0  ;;  %v12115_v15 = vmul.f32 %v6976_v48, %v11926_v54 }
 0x971   : > { %v7033_v45 = vpack.c.bf16 %v12104_v27, %v12097_v26  ;;  %v6916_v29 = vsub.f32 0.0, %v6852_v32  ;;  %9242 = vrcp.f32 %v6314_v41  ;;  %7210 = vmatprep.mubr.bf16.mxu0 %v7028_v61  ;;  %v6853_v19 = vsub.f32 1.0, %v6821_v28 }
 0x972   : > { %vm6885_vm9 = vcmp.ge.f32.partialorder %v11922_v39, 0.0  ;;  %v6470_v56 = vmul.f32 %v12101_v5, %v6438_v60  ;;  %9244 = vpow2.f32 %v6777_v53  ;;  %v12823_v14 = vpack.c.bf16 %v11786_v46, %v11778_v13 }
 0x973   : > { %v12125_v0 = vadd.f32 %v6144_v44, %v11523_v34  ;;  %v12127_v49 = vpop.eup %9236  ;;  %v12130_v54 = vmul.f32 %v6978_v7, %v11960_v57  ;;  %v12134_v58 = vsel %vm6883_vm7, %v6851_v21, %v6915_v55  ;;  %v12137_v20 = vadd.f32 %v6146_v43, %v11527_v36 }
 0x974   : > { %7211 = vmatmul.mubr.bf16.vlgmr.msra.gmra.mxu0 %v12823_v14  ;;  %v12140_v12 = vadd.f32 %v6148_v59, %v11523_v34  ;;  %v6502_v13 = vadd.f32 1.4214138, %v6470_v56  ;;  %v6407_v46 = vmul.f32 1.0614054, %v12127_v49  ;;  %v6779_v44 = vmul.f32 1.442695, %v6727_v22  ;;  %v6150_v22 = vpop.f32.mrf.mxu1 }
 0x975   : > { %7218 = vmatprep.mubr.bf16.mxu0 %v7030_v3  ;;  %v6728_v48 = vmul.f32 %v6696_v16, %v12066_v35  ;;  %v6948_v57 = vsel %vm6884_vm8, %v6852_v32, %v6916_v29  ;;  %v6697_v11 = vsub.f32 0.0, %v12088_v9  ;;  %v12148_v21 = vmul.f32 0.70710677, %v12125_v0  ;;  %v12824_v56 = vld [vmem:[#allocation41_spill] sm:$0xff]  ;;  %v12825_v14 = vld [vmem:[#allocation39_spill] sm:$0xff] }
 0x976   : > { %v12151_v24 = vmul.f32 0.70710677, %v12137_v20  ;;  %v6917_v43 = vsub.f32 0.0, %v6853_v19  ;;  %v6534_v53 = vmul.f32 %v12101_v5, %v6502_v13  ;;  %v6439_v31 = vadd.f32 -1.4531521, %v6407_v46 }
 0x977   : > { %v12155_v7 = vmul.f32 0.70710677, %v12140_v12  ;;  %v6698_v35 = vsub.f32 0.0, %v12094_v6  ;;  %v7032_v33 = vpack.c.bf16 %v12071_v1, %v12008_v8  ;;  %v12161_v32 = vand.u32 2147483647, %v12148_v21 }
 0x978   : > { %v12164_v28 = vand.u32 2147483647, %v12151_v24  ;;  %v6566_v18 = vadd.f32 -0.28449672, %v6534_v53  ;;  %v6471_v63 = vmul.f32 %v12127_v49, %v6439_v31  ;;  %9246 = vpow2.f32 %v6779_v44 }
 0x979   : > { %v6781_v55 = vmul.f32 1.442695, %v6728_v48  ;;  %v12167_v41 = vpop.eup %9238  ;;  %v6729_v61 = vmul.f32 %v6697_v11, %v12088_v9  ;;  %v6283_v60 = vmul.f32 0.3275911, %v12161_v32  ;;  %v12173_v1 = vand.u32 2147483647, %v12155_v7 }
 0x97a   : > { %v6284_v8 = vmul.f32 0.3275911, %v12164_v28  ;;  %v12175_v16 = vadd.f32 1.0, %v6948_v57  ;;  %v6598_v3 = vmul.f32 %v12101_v5, %v6566_v18  ;;  %v6503_v59 = vadd.f32 1.4214138, %v6471_v63 }
 0x97b   : > { %v6408_v29 = vmul.f32 1.0614054, %v12167_v41  ;;  %v12826_v13 = vpack.c.bf16 %v12824_v56, %v12825_v14  ;;  %v6949_v9 = vsel %vm6885_vm9, %v6853_v19, %v6917_v43  ;;  %v6730_v46 = vmul.f32 %v6698_v35, %v12094_v6 }
 0x97c   : > { %v6315_v44 = vadd.f32 1.0, %v6283_v60  ;;  %v12186_v48 = vadd.f32 %v6150_v22, %v11527_v36  ;;  %v6630_v57 = vadd.f32 0.2548296, %v6598_v3  ;;  %v6535_v11 = vmul.f32 %v12127_v49, %v6503_v59 }
 0x97d   : > { %7219 = vmatmul.mubr.bf16.gmra.mxu0 %v12826_v13  ;;  %v6440_v53 = vadd.f32 -1.4531521, %v6408_v29  ;;  %9248 = vpow2.f32 %v6781_v55  ;;  %v12189_v31 = vpop.eup %9240  ;;  %vm6886_vm10 = vcmp.ge.f32.partialorder %v12005_v40, 0.0  ;;  %v6783_v18 = vmul.f32 1.442695, %v6729_v61 }
 0x97e   : > { %7226 = vmatprep.mubr.bf16.mxu0 %v7032_v33  ;;  %9250 = vrcp.f32 %v6315_v44  ;;  %v6316_v39 = vadd.f32 1.0, %v6284_v8  ;;  %v6285_v19 = vmul.f32 0.3275911, %v12173_v1  ;;  %v12193_v6 = vpop.eup %9242  ;;  %v6662_v43 = vmul.f32 %v12101_v5, %v6630_v57 }
 0x97f   : > { %v6567_v35 = vadd.f32 -0.28449672, %v6535_v11  ;;  %v6472_v33 = vmul.f32 %v12167_v41, %v6440_v53  ;;  %v6409_v63 = vmul.f32 1.0614054, %v12189_v31  ;;  %v9245_v22 = vpop.eup %9244  ;;  %v6410_v55 = vmul.f32 1.0614054, %v12193_v6 }
 0x980   : > { %v6785_v60 = vmul.f32 1.442695, %v6730_v46  ;;  %v7034_v61 = vpack.c.bf16 %v12130_v54, %v12115_v15  ;;  %v12202_v8 = vmul.f32 0.70710677, %v12186_v48  ;;  %v6822_v3 = vmul.f32 %v9245_v22, %v6662_v43 }
 0x981   : > { %v6599_v59 = vmul.f32 %v12127_v49, %v6567_v35  ;;  %v6504_v29 = vadd.f32 1.4214138, %v6472_v33  ;;  %v6441_v5 = vadd.f32 -1.4531521, %v6409_v63  ;;  %v6442_v56 = vadd.f32 -1.4531521, %v6410_v55 }
 0x982   : > { %9252 = vrcp.f32 %v6316_v39  ;;  %v6317_v14 = vadd.f32 1.0, %v6285_v19  ;;  %v12206_v13 = vand.u32 2147483647, %v12202_v8  ;;  %v6854_v44 = vsub.f32 1.0, %v6822_v3 }
 0x983   : > { %v6631_v57 = vadd.f32 0.2548296, %v6599_v59  ;;  %v6536_v46 = vmul.f32 %v12167_v41, %v6504_v29  ;;  %v6473_v15 = vmul.f32 %v12189_v31, %v6441_v5  ;;  %v6981_v54 = vadd.f32 1.0, %v6949_v9 }
 0x984   : > { %9254 = vpow2.f32 %v6783_v18  ;;  %v6474_v11 = vmul.f32 %v12193_v6, %v6442_v56  ;;  %v6286_v53 = vmul.f32 0.3275911, %v12206_v13  ;;  %v6918_v39 = vsub.f32 0.0, %v6854_v44  ;;  %v6154_v18 = vpop.f32.mrf.mxu1 }
 0x985   : > { %7227 = vmatmul.mubr.bf16.gmra.mxu0 %v7031_v62  ;;  %v6568_v19 = vadd.f32 -0.28449672, %v6536_v46  ;;  %v6505_v43 = vadd.f32 1.4214138, %v6473_v15  ;;  %9256 = vpow2.f32 %v6785_v60  ;;  %v9247_v35 = vpop.eup %9246  ;;  %v6699_v63 = vsub.f32 0.0, %v12161_v32 }
 0x986   : > { %7234 = vmatprep.mubr.bf16.mxu0 %v7034_v61  ;;  %v6506_v33 = vadd.f32 1.4214138, %v6474_v11  ;;  %9258 = vrcp.f32 %v6317_v14  ;;  %v6318_v22 = vadd.f32 1.0, %v6286_v53  ;;  %v6950_v52 = vsel %vm6886_vm10, %v6854_v44, %v6918_v39 }
 0x987   : > { %v6663_v23 = vmul.f32 %v12127_v49, %v6631_v57  ;;  %v6537_v62 = vmul.f32 %v12189_v31, %v6505_v43  ;;  %v6700_v9 = vsub.f32 0.0, %v12164_v28  ;;  %v6979_v55 = vadd.f32 1.0, %v12134_v58 }
 0x988   : > { %v6982_v61 = vadd.f32 1.0, %v6950_v52  ;;  %v6600_v60 = vmul.f32 %v12167_v41, %v6568_v19  ;;  %v6538_v3 = vmul.f32 %v12193_v6, %v6506_v33  ;;  %v7012_v59 = vmul.f32 %v12175_v16, %v11976_v51 }
 0x989   : > { %v6569_v29 = vadd.f32 -0.28449672, %v6537_v62  ;;  %v6701_v40 = vsub.f32 0.0, %v12173_v1  ;;  %9260 = vrcp.f32 %v6318_v22  ;;  %v7013_v5 = vmul.f32 %v6981_v54, %v12037_v50  ;;  %v6156_v50 = vpop.f32.mrf.mxu1 }
 0x98a   : > { %v9249_v49 = vpop.eup %9248  ;;  %v7014_v56 = vmul.f32 %v6982_v61, %v12040_v42  ;;  %v6570_v14 = vadd.f32 -0.28449672, %v6538_v3  ;;  %v6731_v58 = vmul.f32 %v6699_v63, %v12161_v32  ;;  %v12232_v57 = vmul.f32 %v9247_v35, %v6663_v23 }
 0x98b   : > { %v12230_v44 = vpop.eup %9250  ;;  %v6601_v46 = vmul.f32 %v12189_v31, %v6569_v29  ;;  %v6732_v51 = vmul.f32 %v6700_v9, %v12164_v28  ;;  %v12240_v16 = vadd.f32 %v6154_v18, %v11523_v34  ;;  %v6632_v42 = vadd.f32 0.2548296, %v6600_v60 }
 0x98c   : > { %v6602_v15 = vmul.f32 %v12193_v6, %v6570_v14  ;;  %v6411_v32 = vmul.f32 1.0614054, %v12230_v44  ;;  %v7036_v54 = vpack.c.bf16 %v7014_v56, %v7012_v59  ;;  %v7011_v11 = vmul.f32 %v6979_v55, %v11971_v2 }
 0x98d   : > { %7235 = vmatmul.mubr.bf16.gmra.mxu0 %v7033_v45  ;;  %v12246_v53 = vmul.f32 0.5, %v12054_v17  ;;  %v6633_v28 = vadd.f32 0.2548296, %v6601_v46  ;;  %v6733_v39 = vmul.f32 %v6701_v40, %v12173_v1  ;;  %v6787_v45 = vmul.f32 1.442695, %v6731_v58 }
 0x98e   : > { %v6634_v26 = vadd.f32 0.2548296, %v6602_v15  ;;  %v6443_v27 = vadd.f32 -1.4531521, %v6411_v32  ;;  %7242 = vmatprep.mubr.bf16.mxu0 %v7036_v54  ;;  %v12250_v19 = vadd.f32 %v6156_v50, %v11527_v36  ;;  %v7035_v35 = vpack.c.bf16 %v7013_v5, %v7011_v11 }
 0x98f   : > { %v12252_v43 = vpop.eup %9252  ;;  %vm6887_vm11 = vcmp.ge.f32.partialorder %v12027_v38, 0.0  ;;  %v6789_v33 = vmul.f32 1.442695, %v6732_v51  ;;  %v6702_v2 = vsub.f32 0.0, %v12206_v13  ;;  %v12257_v17 = vmul.f32 0.70710677, %v12240_v16 }
 0x990   : > { %v6855_v1 = vsub.f32 1.0, %v12232_v57  ;;  %v6664_v63 = vmul.f32 %v12167_v41, %v6632_v42  ;;  %v6475_v22 = vmul.f32 %v12230_v44, %v6443_v27  ;;  %v6412_v52 = vmul.f32 1.0614054, %v12252_v43 }
 0x991   : > { %v9255_v23 = vpop.eup %9254  ;;  %v6665_v62 = vmul.f32 %v12189_v31, %v6633_v28  ;;  %v6666_v9 = vmul.f32 %v12193_v6, %v6634_v26  ;;  %v6791_v18 = vmul.f32 1.442695, %v6733_v39  ;;  %v12266_v55 = vand.u32 2147483647, %v12257_v17  ;;  %v6158_v26 = vpop.f32.mrf.mxu1 }
 0x992   : > { %v9257_v61 = vpop.eup %9256  ;;  %v6507_v60 = vadd.f32 1.4214138, %v6475_v22  ;;  %9262 = vpow2.f32 %v6787_v45  ;;  %v6444_v3 = vadd.f32 -1.4531521, %v6412_v52  ;;  %v12269_v59 = vmul.f32 0.70710677, %v12250_v19 }
 0x993   : > { %v12271_v41 = vpop.eup %9258  ;;  %v12274_v29 = vmul.f32 0.5, %v12061_v37  ;;  %9264 = vpow2.f32 %v6789_v33  ;;  %v6734_v31 = vmul.f32 %v6702_v2, %v12206_v13  ;;  %v6287_v6 = vmul.f32 0.3275911, %v12266_v55 }
 0x994   : > { %v6919_v40 = vsub.f32 0.0, %v6855_v1  ;;  %v6824_v5 = vmul.f32 %v9249_v49, %v6664_v63  ;;  %v6539_v56 = vmul.f32 %v12230_v44, %v6507_v60  ;;  %v6476_v14 = vmul.f32 %v12252_v43, %v6444_v3 }
 0x995   : > { %7243 = vmatmul.mubr.bf16.gmra.mxu0 %v7035_v35  ;;  %v6825_v58 = vmul.f32 %v9255_v23, %v6665_v62  ;;  %v6826_v57 = vmul.f32 %v9257_v61, %v6666_v9  ;;  %v6413_v46 = vmul.f32 1.0614054, %v12271_v41  ;;  %v6319_v51 = vadd.f32 1.0, %v6287_v6 }
 0x996   : > { %v12281_v50 = vpop.eup %9260  ;;  %v6571_v37 = vadd.f32 -0.28449672, %v6539_v56  ;;  %v6508_v42 = vadd.f32 1.4214138, %v6476_v14  ;;  %9266 = vpow2.f32 %v6791_v18  ;;  %v12284_v13 = vand.u32 2147483647, %v12269_v59  ;;  %v6160_v18 = vpop.f32.mrf.mxu1 }
 0x997   : > { %v6445_v15 = vadd.f32 -1.4531521, %v6413_v46  ;;  %v6414_v49 = vmul.f32 1.0614054, %v12281_v50  ;;  %v6793_v32 = vmul.f32 1.442695, %v6734_v31  ;;  %9268 = vrcp.f32 %v6319_v51 }
 0x998   : > { %v6951_v54 = vsel %vm6887_vm11, %v6855_v1, %v6919_v40  ;;  %v6856_v11 = vsub.f32 1.0, %v6824_v5  ;;  %v6603_v28 = vmul.f32 %v12230_v44, %v6571_v37  ;;  %v6540_v39 = vmul.f32 %v12252_v43, %v6508_v42 }
 0x999   : > { %vm6888_vm12 = vcmp.ge.f32.partialorder %v12051_v25, 0.0  ;;  %v6857_v27 = vsub.f32 1.0, %v6825_v58  ;;  %v6858_v45 = vsub.f32 1.0, %v6826_v57  ;;  %v6477_v35 = vmul.f32 %v12271_v41, %v6445_v15 }
 0x99a   : > { %v6446_v33 = vadd.f32 -1.4531521, %v6414_v49  ;;  %v6635_v2 = vadd.f32 0.2548296, %v6603_v28  ;;  %v6572_v63 = vadd.f32 -0.28449672, %v6540_v39  ;;  %9270 = vpow2.f32 %v6793_v32 }
 0x99b   : > { %v6288_v22 = vmul.f32 0.3275911, %v12284_v13  ;;  %vm6889_vm13 = vcmp.ge.f32.partialorder %v12077_v47, 0.0  ;;  %v6509_v38 = vadd.f32 1.4214138, %v6477_v35  ;;  %v6983_v52 = vadd.f32 1.0, %v6951_v54 }
 0x99c   : > { %v6478_v1 = vmul.f32 %v12281_v50, %v6446_v33  ;;  %v6667_v23 = vmul.f32 %v12230_v44, %v6635_v2  ;;  %v6604_v62 = vmul.f32 %v12252_v43, %v6572_v63  ;;  %v6920_v61 = vsub.f32 0.0, %v6856_v11 }
 0x99d   : > { %v6320_v9 = vadd.f32 1.0, %v6288_v22  ;;  %v6922_v60 = vsub.f32 0.0, %v6858_v45  ;;  %v6541_v3 = vmul.f32 %v12271_v41, %v6509_v38  ;;  %v6921_v6 = vsub.f32 0.0, %v6857_v27 }
 0x99e   : > { %v6510_v31 = vadd.f32 1.4214138, %v6478_v1  ;;  %v6636_v40 = vadd.f32 0.2548296, %v6604_v62  ;;  %v12300_v5 = vadd.f32 %v6158_v26, %v11523_v34  ;;  %vm6890_vm14 = vcmp.ge.f32.partialorder %v12081_v30, 0.0 }
 0x99f   : > { %9272 = vrcp.f32 %v6320_v9  ;;  %v9263_v56 = vpop.eup %9262  ;;  %v6573_v14 = vadd.f32 -0.28449672, %v6541_v3  ;;  %v12305_v58 = vadd.f32 %v6160_v18, %v11527_v36  ;;  %v12308_v51 = vmul.f32 0.5, %v12137_v20 }
 0x9a0   : > { %v6542_v44 = vmul.f32 %v12281_v50, %v6510_v31  ;;  %v9265_v57 = vpop.eup %9264  ;;  %v6827_v46 = vmul.f32 %v9263_v56, %v6667_v23  ;;  %v6668_v37 = vmul.f32 %v12252_v43, %v6636_v40  ;;  %v12312_v42 = vmul.f32 0.70710677, %v12300_v5 }
 0x9a1   : > { %v12315_v34 = vmul.f32 %v6983_v52, %v12044_v4  ;;  %v6954_v30 = vsel %vm6890_vm14, %v6858_v45, %v6922_v60  ;;  %v6605_v15 = vmul.f32 %v12271_v41, %v6573_v14  ;;  %v6952_v36 = vsel %vm6888_vm12, %v6856_v11, %v6920_v61 }
 0x9a2   : > { %v6574_v49 = vadd.f32 -0.28449672, %v6542_v44  ;;  %v6953_v32 = vsel %vm6889_vm13, %v6857_v27, %v6921_v6  ;;  %v6828_v20 = vmul.f32 %v9265_v57, %v6668_v37  ;;  %vm6892_vm15 = vcmp.ge.f32.partialorder %v12151_v24, 0.0 }
 0x9a3   : > { %v12324_v43 = vand.u32 2147483647, %v12312_v42  ;;  %v9267_v54 = vpop.eup %9266  ;;  %vm6891_vm0 = vcmp.ge.f32.partialorder %v12148_v21, 0.0  ;;  %v6637_v4 = vadd.f32 0.2548296, %v6605_v15  ;;  %v6703_v39 = vsub.f32 0.0, %v12266_v55 }
 0x9a4   : > { %v6606_v28 = vmul.f32 %v12281_v50, %v6574_v49  ;;  %v12330_v25 = vmul.f32 0.70710677, %v12305_v58  ;;  %v12332_v11 = vpop.eup %9268  ;;  %v6986_v47 = vadd.f32 1.0, %v6954_v30  ;;  %v6859_v26 = vsub.f32 1.0, %v6827_v46 }
 0x9a5   : > { %v6860_v27 = vsub.f32 1.0, %v6828_v20  ;;  %vm6893_vm1 = vcmp.ge.f32.partialorder %v12155_v7, 0.0  ;;  %v6289_v45 = vmul.f32 0.3275911, %v12324_v43  ;;  %v6985_v35 = vadd.f32 1.0, %v6953_v32 }
 0x9a6   : > { %v6669_v33 = vmul.f32 %v12271_v41, %v6637_v4  ;;  %v6638_v2 = vadd.f32 0.2548296, %v6606_v28  ;;  %v6415_v63 = vmul.f32 1.0614054, %v12332_v11  ;;  %v6984_v22 = vadd.f32 1.0, %v6952_v36 }
 0x9a7   : > { %v6704_v38 = vsub.f32 0.0, %v12284_v13  ;;  %v6321_v1 = vadd.f32 1.0, %v6289_v45  ;;  %v12340_v52 = vand.u32 2147483647, %v12330_v25  ;;  %v6924_v23 = vsub.f32 0.0, %v6860_v27  ;;  %v9271_v61 = vpop.eup %9270 }
 0x9a8   : > { %v6829_v62 = vmul.f32 %v9267_v54, %v6669_v33  ;;  %v6670_v9 = vmul.f32 %v12281_v50, %v6638_v2  ;;  %v6447_v18 = vadd.f32 -1.4531521, %v6415_v63  ;;  %v7018_v60 = vmul.f32 %v6986_v47, %v12274_v29 }
 0x9a9   : > { %v6923_v3 = vsub.f32 0.0, %v6859_v26  ;;  %9274 = vrcp.f32 %v6321_v1  ;;  %v6290_v41 = vmul.f32 0.3275911, %v12340_v52  ;;  %v7017_v31 = vmul.f32 %v6985_v35, %v12246_v53 }
 0x9aa   : > { %v6861_v6 = vsub.f32 1.0, %v6829_v62  ;;  %v6830_v40 = vmul.f32 %v9271_v61, %v6670_v9  ;;  %v6479_v56 = vmul.f32 %v12332_v11, %v6447_v18  ;;  %v7016_v14 = vmul.f32 %v6984_v22, %v12085_v10 }
 0x9ab   : > { %v6735_v44 = vmul.f32 %v6703_v39, %v12266_v55  ;;  %v6736_v50 = vmul.f32 %v6704_v38, %v12284_v13  ;;  %v6322_v57 = vadd.f32 1.0, %v6290_v41  ;;  %v6956_v29 = vsel %vm6892_vm15, %v6860_v27, %v6924_v23 }
 0x9ac   : > { %v9273_v46 = vpop.eup %9272  ;;  %v6925_v37 = vsub.f32 0.0, %v6861_v6  ;;  %v6862_v30 = vsub.f32 1.0, %v6830_v40  ;;  %v6511_v15 = vadd.f32 1.4214138, %v6479_v56  ;;  %v6955_v53 = vsel %vm6891_vm0, %v6859_v26, %v6923_v3 }
 0x9ad   : > { %v6416_v49 = vmul.f32 1.0614054, %v9273_v46  ;;  %9276 = vrcp.f32 %v6322_v57  ;;  %v7038_v36 = vpack.c.bf16 %v7018_v60, %v7016_v14  ;;  %v7037_v10 = vpack.c.bf16 %v7017_v31, %v12315_v34 }
 0x9ae   : > { %v6957_v55 = vsel %vm6893_vm1, %v6861_v6, %v6925_v37  ;;  %v6926_v13 = vsub.f32 0.0, %v6862_v30  ;;  %v6705_v32 = vsub.f32 0.0, %v12324_v43  ;;  %v6988_v20 = vadd.f32 1.0, %v6956_v29 }
 0x9af   : > { %v6989_v24 = vadd.f32 1.0, %v6957_v55  ;;  %vm6894_vm2 = vcmp.ge.f32.partialorder %v12202_v8, 0.0  ;;  %v6448_v54 = vadd.f32 -1.4531521, %v6416_v49  ;;  %7250 = vmatprep.mubr.bf16.mxu0 %v7038_v36  ;;  %v6987_v4 = vadd.f32 1.0, %v6955_v53 }
 0x9b0   : > { %v6189_v21 = vmul.f32 0.5, %v12140_v12  ;;  %v6958_v28 = vsel %vm6894_vm2, %v6862_v30, %v6926_v13  ;;  %v6543_v39 = vmul.f32 %v12332_v11, %v6511_v15  ;;  %7251 = vmatmul.mubr.bf16.gmra.mxu0 %v7037_v10  ;;  %v6190_v34 = vmul.f32 0.5, %v12186_v48 }
 0x9b1   : > { %v6990_v7 = vadd.f32 1.0, %v6958_v28  ;;  %v6480_v47 = vmul.f32 %v9273_v46, %v6448_v54  ;;  %v6797_v26 = vmul.f32 1.442695, %v6736_v50  ;;  %v6187_v27 = vmul.f32 0.5, %v12125_v0 }
 0x9b2   : > { %v7021_v45 = vmul.f32 %v6989_v24, %v6189_v21  ;;  %v6795_v35 = vmul.f32 1.442695, %v6735_v44  ;;  %v6737_v8 = vmul.f32 %v6705_v32, %v12324_v43  ;;  %v7020_v33 = vmul.f32 %v6988_v20, %v12308_v51 }
 0x9b3   : > { %v7022_v2 = vmul.f32 %v6990_v7, %v6190_v34  ;;  %v6512_v63 = vadd.f32 1.4214138, %v6480_v47  ;;  %v6706_v12 = vsub.f32 0.0, %v12340_v52  ;;  %v7019_v22 = vmul.f32 %v6987_v4, %v6187_v27 }
 0x9b4   : > { %v6575_v38 = vadd.f32 -0.28449672, %v6543_v39  ;;  %9278 = vpow2.f32 %v6797_v26  ;;  %v6799_v9 = vmul.f32 1.442695, %v6737_v8  ;;  %vm6896_vm3 = vcmp.ge.f32.partialorder %v12269_v59, 0.0 }
 0x9b5   : > { %v6544_v1 = vmul.f32 %v9273_v46, %v6512_v63  ;;  %v7040_v48 = vpack.c.bf16 %v7022_v2, %v7020_v33  ;;  %v7039_v62 = vpack.c.bf16 %v7021_v45, %v7019_v22  ;;  %9280 = vpow2.f32 %v6795_v35 }
 0x9b6   : > { %v9275_v23 = vpop.eup %9274  ;;  %v6738_v61 = vmul.f32 %v6706_v12, %v12340_v52  ;;  %v6607_v51 = vmul.f32 %v12332_v11, %v6575_v38  ;;  %9282 = vpow2.f32 %v6799_v9  ;;  %vm6897_vm4 = vcmp.ge.f32.partialorder %v12312_v42, 0.0 }
 0x9b7   : > { %v6576_v0 = vadd.f32 -0.28449672, %v6544_v1  ;;  %v6417_v18 = vmul.f32 1.0614054, %v9275_v23  ;;  %7258 = vmatprep.mubr.bf16.mxu0 %v7040_v48  ;;  %vm6895_vm5 = vcmp.ge.f32.partialorder %v12257_v17, 0.0  ;;  %vm6898_vm6 = vcmp.ge.f32.partialorder %v12330_v25, 0.0 }
 0x9b8   : > { %7259 = vmatmul.mubr.bf16.gmra.mxu0 %v7039_v62  ;;  %v6801_v40 = vmul.f32 1.442695, %v6738_v61  ;;  %v6639_v56 = vadd.f32 0.2548296, %v6607_v51  ;;  %v6193_v38 = vmul.f32 0.5, %v12300_v5  ;;  %v6192_v48 = vmul.f32 0.5, %v12250_v19 }
 0x9b9   : > { %v6608_v43 = vmul.f32 %v9273_v46, %v6576_v0  ;;  %v6449_v60 = vadd.f32 -1.4531521, %v6417_v18  ;;  %v6194_v59 = vmul.f32 0.5, %v12305_v58  ;;  %v6191_v17 = vmul.f32 0.5, %v12240_v16  ;;  %v12380_v5 = vld [vmem:[%s12654_s17] ss:$0 sm:$0xff] }
 0x9ba   : > { %v9277_v3 = vpop.eup %9276  ;;  %9284 = vpow2.f32 %v6801_v40  ;;  %v6671_v52 = vmul.f32 %v12332_v11, %v6639_v56 }
 0x9bb   : > { %v6640_v41 = vadd.f32 0.2548296, %v6608_v43  ;;  %v6481_v31 = vmul.f32 %v9275_v23, %v6449_v60  ;;  %v6418_v6 = vmul.f32 1.0614054, %v9277_v3 }
 0x9bd   : > { %v6513_v14 = vadd.f32 1.4214138, %v6481_v31  ;;  %v6450_v44 = vadd.f32 -1.4531521, %v6418_v6  ;;  %v6672_v50 = vmul.f32 %v9273_v46, %v6640_v41 }
 0x9bf   : > { %v6545_v57 = vmul.f32 %v9275_v23, %v6513_v14  ;;  %v6482_v29 = vmul.f32 %v9277_v3, %v6450_v44  ;;  %v12828_v14 = vld [vmem:[#allocation50_spill] sm:$0xff] }
 0x9c1   : > { %v6577_v37 = vadd.f32 -0.28449672, %v6545_v57  ;;  %v6514_v30 = vadd.f32 1.4214138, %v6482_v29  ;;  %v9279_v15 = vpop.eup %9278 }
 0x9c2   : > { %v9281_v53 = vpop.eup %9280  ;;  %v6832_v49 = vmul.f32 %v9279_v15, %v6672_v50 }
 0x9c3   : > { %v6609_v36 = vmul.f32 %v9275_v23, %v6577_v37  ;;  %v6546_v10 = vmul.f32 %v9277_v3, %v6514_v30  ;;  %v6831_v55 = vmul.f32 %v9281_v53, %v6671_v52  ;;  %v9283_v20 = vpop.eup %9282  ;;  %v12829_v37 = vld [vmem:[#allocation52_spill] sm:$0xff] }
 0x9c4   : > { %v6864_v24 = vsub.f32 1.0, %v6832_v49 }
 0x9c5   : > { %v6641_v13 = vadd.f32 0.2548296, %v6609_v36  ;;  %v6578_v32 = vadd.f32 -0.28449672, %v6546_v10  ;;  %v6863_v46 = vsub.f32 1.0, %v6831_v55  ;;  %v12830_v10 = vld [vmem:[#allocation51_spill] sm:$0xff] }
 0x9c6   : > { %v6928_v39 = vsub.f32 0.0, %v6864_v24 }
 0x9c7   : > { %v6673_v54 = vmul.f32 %v9275_v23, %v6641_v13  ;;  %v6610_v4 = vmul.f32 %v9277_v3, %v6578_v32  ;;  %v9285_v7 = vpop.eup %9284  ;;  %v6927_v47 = vsub.f32 0.0, %v6863_v46 }
 0x9c8   : > { %v6960_v45 = vsel %vm6896_vm3, %v6864_v24, %v6928_v39 }
 0x9c9   : > { %v6833_v21 = vmul.f32 %v9283_v20, %v6673_v54  ;;  %v6642_v28 = vadd.f32 0.2548296, %v6610_v4  ;;  %v6959_v33 = vsel %vm6895_vm5, %v6863_v46, %v6927_v47  ;;  %v6992_v12 = vadd.f32 1.0, %v6960_v45  ;;  %v12831_v54 = vld [vmem:[#allocation53_spill] sm:$0xff]  ;;  %v12833_v45 = vld [vmem:[#allocation56_spill] sm:$0xff] }
 0x9ca   : > { %v6991_v22 = vadd.f32 1.0, %v6959_v33 }
 0x9cb   : > { %v6865_v34 = vsub.f32 1.0, %v6833_v21  ;;  %v6674_v11 = vmul.f32 %v9277_v3, %v6642_v28  ;;  %v7024_v62 = vmul.f32 %v6992_v12, %v6192_v48  ;;  %v12827_v3 = vld [vmem:[#allocation49_spill] sm:$0xff]  ;;  %v12834_v12 = vld [vmem:[#allocation55_spill] sm:$0xff] }
 0x9cc   : > { %v7023_v0 = vmul.f32 %v6991_v22, %v6191_v17 }
 0x9cd   : > { %v6929_v26 = vsub.f32 0.0, %v6865_v34  ;;  %v6834_v27 = vmul.f32 %v9285_v7, %v6674_v11 }
 0x9cf   : > { %v6961_v35 = vsel %vm6897_vm4, %v6865_v34, %v6929_v26  ;;  %v6866_v8 = vsub.f32 1.0, %v6834_v27  ;;  %v12832_v34 = vld [vmem:[#allocation54_spill] sm:$0xff] }
 0x9d0   : > { %v6993_v2 = vadd.f32 1.0, %v6961_v35 }
 0x9d1   : > { %v6930_v63 = vsub.f32 0.0, %v6866_v8 }
 0x9d2   : > { %v7025_v23 = vmul.f32 %v6993_v2, %v6193_v38 }
 0x9d3   : > { %v6962_v1 = vsel %vm6898_vm6, %v6866_v8, %v6930_v63 }
 0x9d4   : > { %v6994_v42 = vadd.f32 1.0, %v6962_v1  ;;  %v7041_v61 = vpack.c.bf16 %v7025_v23, %v7023_v0 }
 0x9d6   : > { %v7026_v9 = vmul.f32 %v6994_v42, %v6194_v59  ;;  %v12835_v42 = vld [vmem:[#allocation57_spill] sm:$0xff] }
 0x9d8   : > { %v7042_v18 = vpack.c.bf16 %v7026_v9, %v7024_v62  ;;  %v12836_v62 = vld [vmem:[#allocation34_spill] sm:$0xff] }
 0x9da   : > { %7266 = vmatprep.mubr.bf16.mxu0 %v7042_v18 }
 0x9db   : > { %7267 = vmatmul.mubr.bf16.gmra.mxu0 %v7041_v61 }
 0xa34   : > { %v8210_v25 = vpop.f32.mrf.mxu0 }
 0xa36   : > { %v8211_v19 = vpop.f32.mrf.mxu0 }
 0xa37   : > { %v8212_v51 = vadd.f32 %v8211_v19, %v8210_v25 }
 0xa38   : > { %v8213_v58 = vpop.f32.mrf.mxu0 }
 0xa39   : > { %v7213_v43 = vadd.f32 %v8212_v51, %v12380_v5 }
 0xa3a   : > { %v8214_v16 = vpop.f32.mrf.mxu0 }
 0xa3b   : > { %v8215_v60 = vadd.f32 %v8214_v16, %v8213_v58  ;;  %v12384_v41 = vadd.f32 %v7213_v43, %v12827_v3  ;;  %v12837_v43 = vld [vmem:[#allocation33_spill] sm:$0xff] }
 0xa3d   : > { %v8216_v31 = vpop.f32.mrf.mxu0  ;;  %v7216_v6 = vadd.f32 %v8215_v60, %v12380_v5  ;;  %7291 = vadd.xlane.f32.xlu1 %v12384_v41 }
 0xa3f   : > { %v8217_v40 = vpop.f32.mrf.mxu0  ;;  %v12389_v44 = vadd.f32 %v7216_v6, %v12828_v14  ;;  %v12838_v6 = vld [vmem:[#allocation35_spill] sm:$0xff] }
 0xa40   : > { %v8218_v56 = vadd.f32 %v8217_v40, %v8216_v31 }
 0xa41   : > { %v8219_v50 = vpop.f32.mrf.mxu0  ;;  %7293 = vadd.xlane.f32.xlu0 %v12389_v44 }
 0xa42   : > { %v7221_v57 = vadd.f32 %v8218_v56, %v12380_v5 }
 0xa43   : > { %v8220_v29 = vpop.f32.mrf.mxu0 }
 0xa44   : > { %v8221_v52 = vadd.f32 %v8220_v29, %v8219_v50  ;;  %v12394_v30 = vadd.f32 %v7221_v57, %v12829_v37 }
 0xa45   : > { %v8222_v15 = vpop.f32.mrf.mxu0 }
 0xa46   : > { %v7224_v53 = vadd.f32 %v8221_v52, %v12380_v5  ;;  %7295 = vadd.xlane.f32.xlu1 %v12394_v30  ;;  %v12839_v52 = vld [vmem:[#allocation36_spill] sm:$0xff] }
 0xa47   : > { %v8223_v49 = vpop.f32.mrf.mxu0 }
 0xa48   : > { %v8224_v36 = vadd.f32 %v8223_v49, %v8222_v15  ;;  %v12399_v55 = vadd.f32 %v7224_v53, %v12830_v10  ;;  %v12840_v53 = vld [vmem:[#allocation37_spill] sm:$0xff] }
 0xa49   : > { %v8225_v13 = vpop.f32.mrf.mxu0 }
 0xa4a   : > { %v7229_v32 = vadd.f32 %v8224_v36, %v12380_v5  ;;  %7297 = vadd.xlane.f32.xlu0 %v12399_v55 }
 0xa4b   : > { %v8226_v20 = vpop.f32.mrf.mxu0 }
 0xa4c   : > { %v8227_v24 = vadd.f32 %v8226_v20, %v8225_v13  ;;  %v12404_v4 = vadd.f32 %v7229_v32, %v12831_v54 }
 0xa4d   : > { %v8228_v46 = vpop.f32.mrf.mxu0 }
 0xa4e   : > { %v7232_v21 = vadd.f32 %v8227_v24, %v12380_v5  ;;  %7299 = vadd.xlane.f32.xlu1 %v12404_v4 }
 0xa4f   : > { %v8229_v28 = vpop.f32.mrf.mxu0 }
 0xa50   : > { %v8230_v39 = vadd.f32 %v8229_v28, %v8228_v46  ;;  %v12409_v11 = vadd.f32 %v7232_v21, %v12832_v34  ;;  %v12841_v46 = vld [vmem:[#allocation38_spill] sm:$0xff] }
 0xa51   : > { %v8231_v7 = vpop.f32.mrf.mxu0 }
 0xa52   : > { %v7237_v47 = vadd.f32 %v8230_v39, %v12380_v5  ;;  %7301 = vadd.xlane.f32.xlu0 %v12409_v11  ;;  %v12842_v39 = vld [vmem:[#allocation42_spill] sm:$0xff] }
 0xa53   : > { %v8232_v26 = vpop.f32.mrf.mxu0 }
 0xa54   : > { %v8233_v27 = vadd.f32 %v8232_v26, %v8231_v7  ;;  %v12414_v35 = vadd.f32 %v7237_v47, %v12833_v45 }
 0xa55   : > { %v8234_v8 = vpop.f32.mrf.mxu0 }
 0xa56   : > { %v7240_v33 = vadd.f32 %v8233_v27, %v12380_v5  ;;  %7303 = vadd.xlane.f32.xlu1 %v12414_v35 }
 0xa57   : > { %v8235_v2 = vpop.f32.mrf.mxu0 }
 0xa58   : > { %v8236_v63 = vadd.f32 %v8235_v2, %v8234_v8  ;;  %v12419_v22 = vadd.f32 %v7240_v33, %v12834_v12 }
 0xa59   : > { %v8237_v38 = vpop.f32.mrf.mxu0 }
 0xa5a   : > { %v7245_v1 = vadd.f32 %v8236_v63, %v12380_v5  ;;  %7305 = vadd.xlane.f32.xlu0 %v12419_v22 }
 0xa5b   : > { %v8238_v48 = vpop.f32.mrf.mxu0 }
 0xa5c   : > { %v8239_v59 = vadd.f32 %v8238_v48, %v8237_v38  ;;  %v12424_v17 = vadd.f32 %v7245_v1, %v12835_v42 }
 0xa5e   : > { %v7248_v23 = vadd.f32 %v8239_v59, %v12380_v5  ;;  %7307 = vadd.xlane.f32.xlu1 %v12424_v17 }
 0xa60   : > { %v12429_v9 = vadd.f32 %v7248_v23, %v12836_v62 }
 0xa62   : > { %7309 = vadd.xlane.f32.xlu0 %v12429_v9 }
 0xa70   : > { %v8240_v0 = vpop.f32.mrf.mxu0 }
 0xa72   : > { %v8241_v18 = vpop.f32.mrf.mxu0 }
 0xa73   : > { %v8242_v61 = vadd.f32 %v8241_v18, %v8240_v0 }
 0xa74   : > { %v8243_v25 = vpop.f32.mrf.mxu0 }
 0xa75   : > { %v7253_v19 = vadd.f32 %v8242_v61, %v12380_v5 }
 0xa76   : > { %v8244_v51 = vpop.f32.mrf.mxu0 }
 0xa77   : > { %v8245_v58 = vadd.f32 %v8244_v51, %v8243_v25  ;;  %v12434_v16 = vadd.f32 %v7253_v19, %v12837_v43 }
 0xa78   : > { %v8246_v60 = vpop.f32.mrf.mxu0 }
 0xa79   : > { %v7256_v3 = vadd.f32 %v8245_v58, %v12380_v5  ;;  %7311 = vadd.xlane.f32.xlu1 %v12434_v16 }
 0xa7a   : > { %v8247_v31 = vpop.f32.mrf.mxu0 }
 0xa7b   : > { %v12439_v40 = vadd.f32 %v7256_v3, %v12838_v6  ;;  %v8248_v56 = vadd.f32 %v8247_v31, %v8246_v60 }
 0xa7c   : > { %v8249_v14 = vpop.f32.mrf.mxu0 }
 0xa7d   : > { %7313 = vadd.xlane.f32.xlu0 %v12439_v40  ;;  %v7261_v50 = vadd.f32 %v8248_v56, %v12380_v5 }
 0xa7e   : > { %v8250_v57 = vpop.f32.mrf.mxu0 }
 0xa7f   : > { %v8251_v29 = vadd.f32 %v8250_v57, %v8249_v14  ;;  %v12444_v37 = vadd.f32 %v7261_v50, %v12839_v52 }
 0xa81   : > { %v7264_v15 = vadd.f32 %v8251_v29, %v12380_v5  ;;  %7315 = vadd.xlane.f32.xlu1 %v12444_v37 }
 0xa83   : > { %v12449_v49 = vadd.f32 %v7264_v15, %v12840_v53 }
 0xa85   : > { %7317 = vadd.xlane.f32.xlu0 %v12449_v49 }
 0xa9b   : > { %v8252_v36 = vpop.f32.mrf.mxu0 }
 0xa9d   : > { %v8253_v10 = vpop.f32.mrf.mxu0 }
 0xa9e   : > { %v8254_v13 = vadd.f32 %v8253_v10, %v8252_v36 }
 0xa9f   : > { %v8255_v32 = vpop.f32.mrf.mxu0 }
 0xaa0   : > { %v7269_v20 = vadd.f32 %v8254_v13, %v12380_v5 }
 0xaa1   : > { %v8256_v24 = vpop.f32.mrf.mxu0 }
 0xaa2   : > { %v8257_v54 = vadd.f32 %v8256_v24, %v8255_v32  ;;  %v12454_v21 = vadd.f32 %v7269_v20, %v12841_v46 }
 0xaa4   : > { %v7272_v28 = vadd.f32 %v8257_v54, %v12380_v5  ;;  %7319 = vadd.xlane.f32.xlu1 %v12454_v21 }
 0xaa6   : > { %v12459_v34 = vadd.f32 %v7272_v28, %v12842_v39 }
 0xaa8   : > { %7321 = vadd.xlane.f32.xlu0 %v12459_v34 }
 0xac6   : > { %v7292_v7 = vpop.xlane.xlu1 %7291 }
 0xac7   : > { %v7323_v47 = vmul.f32 0.0078125, %v7292_v7 }
 0xac9   : > { %v12463_v26 = vsub.f32 %v12384_v41, %v7323_v47 }
 0xaca   : > { %v7294_v27 = vpop.xlane.xlu0 %7293 }
 0xacb   : > { %v7324_v45 = vmul.f32 0.0078125, %v7294_v27  ;;  %v7355_v8 = vmul.f32 %v12463_v26, %v12463_v26 }
 0xacd   : > { %v12468_v33 = vsub.f32 %v12389_v44, %v7324_v45  ;;  %7371 = vadd.xlane.f32.xlu1 %v7355_v8 }
 0xacf   : > { %v7296_v5 = vpop.xlane.xlu1 %7295  ;;  %v7356_v63 = vmul.f32 %v12468_v33, %v12468_v33 }
 0xad0   : > { %v7325_v2 = vmul.f32 0.0078125, %v7296_v5 }
 0xad1   : > { %7373 = vadd.xlane.f32.xlu0 %v7356_v63 }
 0xad2   : > { %v12473_v12 = vsub.f32 %v12394_v30, %v7325_v2 }
 0xad3   : > { %v7298_v41 = vpop.xlane.xlu0 %7297 }
 0xad4   : > { %v7326_v38 = vmul.f32 0.0078125, %v7298_v41  ;;  %v7357_v1 = vmul.f32 %v12473_v12, %v12473_v12 }
 0xad6   : > { %v12478_v48 = vsub.f32 %v12399_v55, %v7326_v38  ;;  %7375 = vadd.xlane.f32.xlu1 %v7357_v1 }
 0xad7   : > { %v7300_v44 = vpop.xlane.xlu1 %7299 }
 0xad8   : > { %v7327_v59 = vmul.f32 0.0078125, %v7300_v44  ;;  %v7358_v42 = vmul.f32 %v12478_v48, %v12478_v48 }
 0xada   : > { %v12483_v23 = vsub.f32 %v12404_v4, %v7327_v59  ;;  %7377 = vadd.xlane.f32.xlu0 %v7358_v42 }
 0xadb   : > { %v7302_v30 = vpop.xlane.xlu0 %7301 }
 0xadc   : > { %v7328_v62 = vmul.f32 0.0078125, %v7302_v30  ;;  %v7359_v0 = vmul.f32 %v12483_v23, %v12483_v23 }
 0xade   : > { %v12488_v18 = vsub.f32 %v12409_v11, %v7328_v62  ;;  %7379 = vadd.xlane.f32.xlu1 %v7359_v0  ;;  %v12545_v62 = vld [vmem:[%s12649_s12] ss:$0 sm:$0xff] }
 0xadf   : > { %v7304_v55 = vpop.xlane.xlu1 %7303 }
 0xae0   : > { %v7329_v61 = vmul.f32 0.0078125, %v7304_v55  ;;  %v7360_v25 = vmul.f32 %v12488_v18, %v12488_v18 }
 0xae2   : > { %v12493_v19 = vsub.f32 %v12414_v35, %v7329_v61  ;;  %7381 = vadd.xlane.f32.xlu0 %v7360_v25  ;;  %v12551_v25 = vld [vmem:[%s12650_s13] ss:$0 sm:$0xff] }
 0xae3   : > { %v7306_v4 = vpop.xlane.xlu0 %7305 }
 0xae4   : > { %v7330_v51 = vmul.f32 0.0078125, %v7306_v4  ;;  %v7361_v58 = vmul.f32 %v12493_v19, %v12493_v19 }
 0xae6   : > { %v12498_v43 = vsub.f32 %v12419_v22, %v7330_v51  ;;  %7383 = vadd.xlane.f32.xlu1 %v7361_v58 }
 0xae7   : > { %v7308_v11 = vpop.xlane.xlu1 %7307 }
 0xae8   : > { %v7331_v60 = vmul.f32 0.0078125, %v7308_v11  ;;  %v7362_v3 = vmul.f32 %v12498_v43, %v12498_v43 }
 0xaea   : > { %v12503_v31 = vsub.f32 %v12424_v17, %v7331_v60  ;;  %7385 = vadd.xlane.f32.xlu0 %v7362_v3 }
 0xaeb   : > { %v7310_v35 = vpop.xlane.xlu0 %7309 }
 0xaec   : > { %v7332_v6 = vmul.f32 0.0078125, %v7310_v35  ;;  %v7363_v56 = vmul.f32 %v12503_v31, %v12503_v31 }
 0xaee   : > { %v12508_v14 = vsub.f32 %v12429_v9, %v7332_v6  ;;  %7387 = vadd.xlane.f32.xlu1 %v7363_v56 }
 0xaf0   : > { %v7364_v22 = vmul.f32 %v12508_v14, %v12508_v14 }
 0xaf2   : > { %7389 = vadd.xlane.f32.xlu0 %v7364_v22 }
 0xb02   : > { %v7312_v50 = vpop.xlane.xlu1 %7311 }
 0xb03   : > { %v7333_v57 = vmul.f32 0.0078125, %v7312_v50 }
 0xb05   : > { %v12513_v29 = vsub.f32 %v12434_v16, %v7333_v57 }
 0xb06   : > { %v7314_v17 = vpop.xlane.xlu0 %7313 }
 0xb07   : > { %v7334_v52 = vmul.f32 0.0078125, %v7314_v17  ;;  %v7365_v15 = vmul.f32 %v12513_v29, %v12513_v29 }
 0xb09   : > { %v12518_v53 = vsub.f32 %v12439_v40, %v7334_v52  ;;  %7391 = vadd.xlane.f32.xlu1 %v7365_v15 }
 0xb0a   : > { %v7316_v9 = vpop.xlane.xlu1 %7315 }
 0xb0b   : > { %v7366_v36 = vmul.f32 %v12518_v53, %v12518_v53  ;;  %v7335_v10 = vmul.f32 0.0078125, %v7316_v9 }
 0xb0d   : > { %7393 = vadd.xlane.f32.xlu0 %v7366_v36  ;;  %v12523_v13 = vsub.f32 %v12444_v37, %v7335_v10 }
 0xb0e   : > { %v7318_v16 = vpop.xlane.xlu0 %7317 }
 0xb0f   : > { %v7336_v32 = vmul.f32 0.0078125, %v7318_v16  ;;  %v7367_v20 = vmul.f32 %v12523_v13, %v12523_v13 }
 0xb11   : > { %v12528_v24 = vsub.f32 %v12449_v49, %v7336_v32  ;;  %7395 = vadd.xlane.f32.xlu1 %v7367_v20 }
 0xb13   : > { %v7368_v40 = vmul.f32 %v12528_v24, %v12528_v24 }
 0xb15   : > { %7397 = vadd.xlane.f32.xlu0 %v7368_v40 }
 0xb2d   : > { %v7320_v54 = vpop.xlane.xlu1 %7319 }
 0xb2e   : > { %v7337_v46 = vmul.f32 0.0078125, %v7320_v54 }
 0xb30   : > { %v12533_v28 = vsub.f32 %v12454_v21, %v7337_v46 }
 0xb31   : > { %v7322_v37 = vpop.xlane.xlu0 %7321 }
 0xb32   : > { %v7338_v39 = vmul.f32 0.0078125, %v7322_v37  ;;  %v7369_v7 = vmul.f32 %v12533_v28, %v12533_v28 }
 0xb34   : > { %v12538_v47 = vsub.f32 %v12459_v34, %v7338_v39  ;;  %7399 = vadd.xlane.f32.xlu1 %v7369_v7 }
 0xb36   : > { %v7370_v49 = vmul.f32 %v12538_v47, %v12538_v47 }
 0xb38   : > { %7401 = vadd.xlane.f32.xlu0 %v7370_v49 }
 0xb56   : > { %v7372_v27 = vpop.xlane.xlu1 %7371 }
 0xb57   : > { %v7403_v45 = vmul.f32 0.0078125, %v7372_v27 }
 0xb59   : > { %v7419_v8 = vadd.f32 1e-05, %v7403_v45 }
 0xb5a   : > { %v7374_v5 = vpop.xlane.xlu0 %7373 }
 0xb5b   : > { %9286 = vrsqrt.f32 %v7419_v8  ;;  %v7404_v21 = vmul.f32 0.0078125, %v7374_v5 }
 0xb5d   : > { %v7420_v2 = vadd.f32 1e-05, %v7404_v21 }
 0xb5f   : > { %v7376_v63 = vpop.xlane.xlu1 %7375  ;;  %9288 = vrsqrt.f32 %v7420_v2 }
 0xb60   : > { %v7405_v41 = vmul.f32 0.0078125, %v7376_v63 }
 0xb62   : > { %v7421_v38 = vadd.f32 1e-05, %v7405_v41 }
 0xb63   : > { %v7378_v1 = vpop.xlane.xlu0 %7377 }
 0xb64   : > { %9290 = vrsqrt.f32 %v7421_v38  ;;  %v7406_v34 = vmul.f32 0.0078125, %v7378_v1 }
 0xb66   : > { %v7422_v44 = vadd.f32 1e-05, %v7406_v34 }
 0xb67   : > { %v7380_v59 = vpop.xlane.xlu1 %7379 }
 0xb68   : > { %9292 = vrsqrt.f32 %v7422_v44  ;;  %v7407_v42 = vmul.f32 0.0078125, %v7380_v59  ;;  %v9287_v30 = vpop.eup %9286 }
 0xb69   : > { %v7451_v55 = vmul.f32 %v9287_v30, %v12463_v26 }
 0xb6a   : > { %v7423_v0 = vadd.f32 1e-05, %v7407_v42 }
 0xb6b   : > { %v7382_v61 = vpop.xlane.xlu0 %7381  ;;  %v7474_v51 = vmul.f32 %v12545_v62, %v7451_v55 }
 0xb6c   : > { %9294 = vrsqrt.f32 %v7423_v0  ;;  %v7408_v4 = vmul.f32 0.0078125, %v7382_v61  ;;  %v9289_v58 = vpop.eup %9288 }
 0xb6d   : > { %v7497_v60 = vadd.f32 %v12551_v25, %v7474_v51  ;;  %v7452_v3 = vmul.f32 %v9289_v58, %v12468_v33 }
 0xb6e   : > { %v7424_v11 = vadd.f32 1e-05, %v7408_v4 }
 0xb6f   : > { %v7384_v35 = vpop.xlane.xlu1 %7383  ;;  %7513 = vxpose.xlu1.b32.start [1/16] %v7497_v60, 128  ;;  %v7475_v26 = vmul.f32 %v12545_v62, %v7452_v3 }
 0xb70   : > { %9296 = vrsqrt.f32 %v7424_v11  ;;  %v7409_v6 = vmul.f32 0.0078125, %v7384_v35 }
 0xb71   : > { %v9291_v56 = vpop.eup %9290  ;;  %v7498_v50 = vadd.f32 %v12551_v25, %v7475_v26 }
 0xb72   : > { %v7425_v22 = vadd.f32 1e-05, %v7409_v6  ;;  %v7453_v57 = vmul.f32 %v9291_v56, %v12473_v12 }
 0xb73   : > { %v7386_v17 = vpop.xlane.xlu0 %7385  ;;  %7514 = vxpose.xlu1.b32.cont [2/16] %v7498_v50, 128 }
 0xb74   : > { %9298 = vrsqrt.f32 %v7425_v22  ;;  %v7410_v52 = vmul.f32 0.0078125, %v7386_v17  ;;  %v7476_v15 = vmul.f32 %v12545_v62, %v7453_v57 }
 0xb75   : > { %v9293_v9 = vpop.eup %9292 }
 0xb76   : > { %v7426_v33 = vadd.f32 1e-05, %v7410_v52  ;;  %v7499_v36 = vadd.f32 %v12551_v25, %v7476_v15  ;;  %v7454_v10 = vmul.f32 %v9293_v9, %v12478_v48 }
 0xb77   : > { %v7388_v16 = vpop.xlane.xlu1 %7387 }
 0xb78   : > { %9300 = vrsqrt.f32 %v7426_v33  ;;  %v7411_v32 = vmul.f32 0.0078125, %v7388_v16  ;;  %7515 = vxpose.xlu1.b32.cont [3/16] %v7499_v36, 128  ;;  %v7477_v20 = vmul.f32 %v12545_v62, %v7454_v10 }
 0xb79   : > { %v9295_v40 = vpop.eup %9294 }
 0xb7a   : > { %v7427_v12 = vadd.f32 1e-05, %v7411_v32  ;;  %v7500_v54 = vadd.f32 %v12551_v25, %v7477_v20  ;;  %v7455_v46 = vmul.f32 %v9295_v40, %v12483_v23 }
 0xb7b   : > { %v7390_v37 = vpop.xlane.xlu0 %7389 }
 0xb7c   : > { %9302 = vrsqrt.f32 %v7427_v12  ;;  %v7412_v39 = vmul.f32 0.0078125, %v7390_v37  ;;  %7516 = vxpose.xlu1.b32.cont [4/16] %v7500_v54, 128  ;;  %v7478_v7 = vmul.f32 %v12545_v62, %v7455_v46 }
 0xb7d   : > { %v9297_v49 = vpop.eup %9296 }
 0xb7e   : > { %v7428_v48 = vadd.f32 1e-05, %v7412_v39  ;;  %v7501_v27 = vadd.f32 %v12551_v25, %v7478_v7  ;;  %v7456_v45 = vmul.f32 %v9297_v49, %v12488_v18 }
 0xb80   : > { %9304 = vrsqrt.f32 %v7428_v48  ;;  %7517 = vxpose.xlu1.b32.cont [5/16] %v7501_v27, 128  ;;  %v7479_v8 = vmul.f32 %v12545_v62, %v7456_v45 }
 0xb81   : > { %v9299_v5 = vpop.eup %9298 }
 0xb82   : > { %v7502_v21 = vadd.f32 %v12551_v25, %v7479_v8  ;;  %v7457_v23 = vmul.f32 %v9299_v5, %v12493_v19 }
 0xb84   : > { %7518 = vxpose.xlu1.b32.cont [6/16] %v7502_v21, 128  ;;  %v7480_v2 = vmul.f32 %v12545_v62, %v7457_v23 }
 0xb85   : > { %v9301_v63 = vpop.eup %9300 }
 0xb86   : > { %v7503_v41 = vadd.f32 %v12551_v25, %v7480_v2  ;;  %v7458_v38 = vmul.f32 %v9301_v63, %v12498_v43 }
 0xb88   : > { %7519 = vxpose.xlu1.b32.cont [7/16] %v7503_v41, 128  ;;  %v7481_v18 = vmul.f32 %v12545_v62, %v7458_v38  ;;  %v7546_v41 = vld [vmem:[#allocation16 + $0x8] sm:$0xff] }
 0xb89   : > { %v9303_v1 = vpop.eup %9302 }
 0xb8a   : > { %v7504_v34 = vadd.f32 %v12551_v25, %v7481_v18  ;;  %v7459_v44 = vmul.f32 %v9303_v1, %v12503_v31  ;;  %v7545_v18 = vld [vmem:[#allocation16] sm:$0xff]  ;;  %v7547_v1 = vld [vmem:[#allocation16 + $0x10] sm:$0xff] }
 0xb8c   : > { %7520 = vxpose.xlu1.b32.cont [8/16] %v7504_v34, 128  ;;  %v7482_v59 = vmul.f32 %v12545_v62, %v7459_v44  ;;  %v7548_v44 = vld [vmem:[#allocation16 + $0x18] sm:$0xff] }
 0xb8d   : > { %v9305_v19 = vpop.eup %9304 }
 0xb8e   : > { %v7505_v42 = vadd.f32 %v12551_v25, %v7482_v59  ;;  %v7460_v30 = vmul.f32 %v9305_v19, %v12508_v14 }
 0xb90   : > { %7521 = vxpose.xlu1.b32.cont [9/16] %v7505_v42, 128  ;;  %v7483_v0 = vmul.f32 %v12545_v62, %v7460_v30  ;;  %v7550_v30 = vld [vmem:[#allocation16 + $0x28] sm:$0xff] }
 0xb92   : > { %v7506_v43 = vadd.f32 %v12551_v25, %v7483_v0  ;;  %v7392_v55 = vpop.xlane.xlu1 %7391 }
 0xb93   : > { %v7413_v61 = vmul.f32 0.0078125, %v7392_v55 }
 0xb94   : > { %7522 = vxpose.xlu1.b32.cont [10/16] %v7506_v43, 128 }
 0xb95   : > { %v7429_v4 = vadd.f32 1e-05, %v7413_v61  ;;  %v7551_v61 = vld [vmem:[#allocation16 + $0x30] sm:$0xff] }
 0xb96   : > { %v7394_v51 = vpop.xlane.xlu0 %7393 }
 0xb97   : > { %9306 = vrsqrt.f32 %v7429_v4  ;;  %v7414_v31 = vmul.f32 0.0078125, %v7394_v51 }
 0xb99   : > { %v7430_v58 = vadd.f32 1e-05, %v7414_v31  ;;  %v7552_v31 = vld [vmem:[#allocation16 + $0x38] sm:$0xff] }
 0xb9a   : > { %v7396_v11 = vpop.xlane.xlu1 %7395 }
 0xb9b   : > { %9308 = vrsqrt.f32 %v7430_v58  ;;  %v7415_v60 = vmul.f32 0.0078125, %v7396_v11 }
 0xb9d   : > { %v7431_v3 = vadd.f32 1e-05, %v7415_v60 }
 0xb9e   : > { %v7398_v35 = vpop.xlane.xlu0 %7397 }
 0xb9f   : > { %9310 = vrsqrt.f32 %v7431_v3  ;;  %v7416_v14 = vmul.f32 0.0078125, %v7398_v35  ;;  %v7553_v3 = vld [vmem:[#allocation16 + $0x40] sm:$0xff] }
 0xba1   : > { %v7432_v6 = vadd.f32 1e-05, %v7416_v14 }
 0xba3   : > { %9312 = vrsqrt.f32 %v7432_v6  ;;  %v7554_v6 = vld [vmem:[#allocation16 + $0x48] sm:$0xff] }
 0xba4   : > { %v9307_v26 = vpop.eup %9306 }
 0xba5   : > { %v7461_v56 = vmul.f32 %v9307_v26, %v12513_v29 }
 0xba7   : > { %v7484_v22 = vmul.f32 %v12545_v62, %v7461_v56 }
 0xba8   : > { %v9309_v50 = vpop.eup %9308 }
 0xba9   : > { %v7507_v57 = vadd.f32 %v12551_v25, %v7484_v22  ;;  %v7462_v17 = vmul.f32 %v9309_v50, %v12518_v53  ;;  %v7555_v50 = vld [vmem:[#allocation16 + $0x50] sm:$0xff] }
 0xbab   : > { %7523 = vxpose.xlu1.b32.cont [11/16] %v7507_v57, 128  ;;  %v7485_v52 = vmul.f32 %v12545_v62, %v7462_v17 }
 0xbac   : > { %v9311_v15 = vpop.eup %9310 }
 0xbad   : > { %v7508_v9 = vadd.f32 %v12551_v25, %v7485_v52  ;;  %v7463_v33 = vmul.f32 %v9311_v15, %v12523_v13  ;;  %v7556_v52 = vld [vmem:[#allocation16 + $0x58] sm:$0xff] }
 0xbaf   : > { %7524 = vxpose.xlu1.b32.cont [12/16] %v7508_v9, 128  ;;  %v7486_v36 = vmul.f32 %v12545_v62, %v7463_v33 }
 0xbb0   : > { %v9313_v10 = vpop.eup %9312 }
 0xbb1   : > { %v7509_v29 = vadd.f32 %v12551_v25, %v7486_v36  ;;  %v7464_v16 = vmul.f32 %v9313_v10, %v12528_v24  ;;  %v7557_v36 = vld [vmem:[#allocation16 + $0x60] sm:$0xff] }
 0xbb3   : > { %7525 = vxpose.xlu1.b32.cont [13/16] %v7509_v29, 128  ;;  %v7487_v32 = vmul.f32 %v12545_v62, %v7464_v16  ;;  %v7558_v16 = vld [vmem:[#allocation16 + $0x68] sm:$0xff] }
 0xbb5   : > { %v7510_v53 = vadd.f32 %v12551_v25, %v7487_v32 }
 0xbb7   : > { %7526 = vxpose.xlu1.b32.cont [14/16] %v7510_v53, 128 }
 0xbbd   : > { %v7400_v20 = vpop.xlane.xlu1 %7399 }
 0xbbe   : > { %v7417_v40 = vmul.f32 0.0078125, %v7400_v20 }
 0xbc0   : > { %v7433_v12 = vadd.f32 1e-05, %v7417_v40  ;;  %v7559_v40 = vld [vmem:[#allocation16 + $0x70] sm:$0xff] }
 0xbc1   : > { %v7402_v54 = vpop.xlane.xlu0 %7401 }
 0xbc2   : > { %9314 = vrsqrt.f32 %v7433_v12  ;;  %v7418_v13 = vmul.f32 0.0078125, %v7402_v54 }
 0xbc4   : > { %v7434_v46 = vadd.f32 1e-05, %v7418_v13 }
 0xbc6   : > { %9316 = vrsqrt.f32 %v7434_v46 }
 0xbcf   : > { %v9315_v37 = vpop.eup %9314 }
 0xbd0   : > { %v7465_v39 = vmul.f32 %v9315_v37, %v12533_v28 }
 0xbd2   : > { %v7488_v7 = vmul.f32 %v12545_v62, %v7465_v39  ;;  %v7560_v39 = vld [vmem:[#allocation16 + $0x78] sm:$0xff] }
 0xbd3   : > { %v9317_v24 = vpop.eup %9316 }
 0xbd4   : > { %v7511_v49 = vadd.f32 %v12551_v25, %v7488_v7  ;;  %v7466_v48 = vmul.f32 %v9317_v24, %v12538_v47 }
 0xbd6   : > { %7527 = vxpose.xlu1.b32.cont [15/16] %v7511_v49, 128  ;;  %v7489_v27 = vmul.f32 %v12545_v62, %v7466_v48  ;;  %v7549_v62 = vld [vmem:[#allocation16 + $0x20] sm:$0xff] }
 0xbd8   : > { %v7512_v45 = vadd.f32 %v12551_v25, %v7489_v27 }
 0xbda   : > { %7528 = vxpose.xlu1.b32.end [16/16] %v7512_v45, 128 }
 0xc1a   : > { %v7529_v8 = vpop.trf.xlu1 }
 0xc1b   : > { %v7561_v59 = vmul.f32 %v7545_v18, %v7529_v8 }
 0xc1e   : > { %v7530_v5 = vpop.trf.xlu1 }
 0xc1f   : > { %v7562_v34 = vmul.f32 %v7546_v41, %v7530_v5 }
 0xc21   : > { %v7577_v42 = vadd.f32 %v7562_v34, %v7561_v59 }
 0xc22   : > { %v7531_v21 = vpop.trf.xlu1 }
 0xc23   : > { %v7563_v19 = vmul.f32 %v7547_v1, %v7531_v21 }
 0xc25   : > { %v7578_v43 = vadd.f32 %v7577_v42, %v7563_v19 }
 0xc26   : > { %v7532_v23 = vpop.trf.xlu1 }
 0xc27   : > { %v7564_v25 = vmul.f32 %v7548_v44, %v7532_v23 }
 0xc29   : > { %v7579_v4 = vadd.f32 %v7578_v43, %v7564_v25 }
 0xc2a   : > { %v7533_v2 = vpop.trf.xlu1 }
 0xc2b   : > { %v7565_v55 = vmul.f32 %v7549_v62, %v7533_v2  ;;  %v7598_v2 = vld [vmem:[%s12844_s28] sm:$0x1] }
 0xc2d   : > { %v7580_v11 = vadd.f32 %v7579_v4, %v7565_v55 }
 0xc2e   : > { %v7534_v63 = vpop.trf.xlu1 }
 0xc2f   : > { %v7566_v51 = vmul.f32 %v7550_v30, %v7534_v63 }
 0xc31   : > { %v7581_v35 = vadd.f32 %v7580_v11, %v7566_v51 }
 0xc32   : > { %v7535_v28 = vpop.trf.xlu1 }
 0xc33   : > { %v7567_v60 = vmul.f32 %v7551_v61, %v7535_v28 }
 0xc35   : > { %v7582_v56 = vadd.f32 %v7581_v35, %v7567_v60 }
 0xc36   : > { %v7536_v38 = vpop.trf.xlu1 }
 0xc37   : > { %v7568_v14 = vmul.f32 %v7552_v31, %v7536_v38 }
 0xc39   : > { %v7583_v57 = vadd.f32 %v7582_v56, %v7568_v14 }
 0xc3a   : > { %v7537_v47 = vpop.trf.xlu1 }
 0xc3b   : > { %v7569_v22 = vmul.f32 %v7553_v3, %v7537_v47 }
 0xc3d   : > { %v7584_v9 = vadd.f32 %v7583_v57, %v7569_v22 }
 0xc3e   : > { %v7538_v0 = vpop.trf.xlu1 }
 0xc3f   : > { %v7570_v17 = vmul.f32 %v7554_v6, %v7538_v0 }
 0xc41   : > { %v7585_v10 = vadd.f32 %v7584_v9, %v7570_v17 }
 0xc42   : > { %v7539_v58 = vpop.trf.xlu1 }
 0xc43   : > { %v7571_v33 = vmul.f32 %v7555_v50, %v7539_v58 }
 0xc45   : > { %v7586_v53 = vadd.f32 %v7585_v10, %v7571_v33 }
 0xc46   : > { %v7540_v26 = vpop.trf.xlu1 }
 0xc47   : > { %v7572_v29 = vmul.f32 %v7556_v52, %v7540_v26 }
 0xc49   : > { %v7587_v12 = vadd.f32 %v7586_v53, %v7572_v29 }
 0xc4a   : > { %v7541_v15 = vpop.trf.xlu1 }
 0xc4b   : > { %v7573_v20 = vmul.f32 %v7557_v36, %v7541_v15 }
 0xc4d   : > { %v7588_v46 = vadd.f32 %v7587_v12, %v7573_v20 }
 0xc4e   : > { %v7542_v32 = vpop.trf.xlu1 }
 0xc4f   : > { %v7574_v54 = vmul.f32 %v7558_v16, %v7542_v32 }
 0xc51   : > { %v7589_v7 = vadd.f32 %v7588_v46, %v7574_v54 }
 0xc52   : > { %v7543_v13 = vpop.trf.xlu1 }
 0xc53   : > { %v7575_v37 = vmul.f32 %v7559_v40, %v7543_v13 }
 0xc55   : > { %v7590_v49 = vadd.f32 %v7589_v7, %v7575_v37 }
 0xc56   : > { %v7544_v24 = vpop.trf.xlu1 }
 0xc57   : > { %v7576_v48 = vmul.f32 %v7560_v39, %v7544_v24 }
 0xc59   : > { %v7591_v27 = vadd.f32 %v7590_v49, %v7576_v48 }
 0xc5b   : > { %v7592_v45 = vrot.slane %v7591_v27, 4 }
 0xc5d   : > { %v7593_v8 = vadd.f32 %v7592_v45, %v7591_v27 }
 0xc5f   : > { %v7594_v5 = vrot.slane %v7593_v8, 2 }
 0xc61   : > { %v7595_v21 = vadd.f32 %v7594_v5, %v7593_v8 }
 0xc63   : > { %v7596_v23 = vrot.slane %v7595_v21, 1 }
 0xc65   : > { %v7597_v63 = vadd.f32 %v7596_v23, %v7595_v21 }
 0xc67   : > { %v7599_v28 = vadd.f32 %v7598_v2, %v7597_v63 }
 0xc69   : > { %7600 = vst [vmem:[%s757_s24] sm:$0x1] %v7599_v28 }
 0xc6a   : > { %9565 = shalt.err (!%p9562_p11)
}
 0xc6b   : > { %s9566_s25 = scalar_lea.hbm %s7612_s0, 16  ;;  %s9570_s28 = scalar_lea.hbm %s12845_s29, 32 }
 0xc6c   : > { %p9567_p12 = scmp.ne.s32.totalorder %s7612_s0, %s9566_s25  ;;  %p9571_p6 = scmp.lt.s32.totalorder %s7612_s0, %s12845_s29 }
 0xc6d   : > { %p9572_p5 = scmp.lt.s32.totalorder %s9570_s28, %s9566_s25 }
 0xc6e   : > { %p9568_p0 = pnand %p9567_p12, %p12846_p2 }
 0xc6f   : > { %p9573_p10 = por %p9572_p5, %p9571_p6 }
 0xc70   : > { %p9569_p9 = pneg %p9568_p0 }
 0xc72   : > { %p9574_p1 = pnand %p9573_p10, %p9569_p9 }
 0xc74   : > { %9577 = shalt.err (!%p9574_p1)
}
 0xc75   : > { %8775 = dma.vmem_to_hbm [thread:$0]  (%p12846_p2), %s7615_s1, 16, %s7612_s0, %s7602_s26  }
 0xc76 PF: > { %s12847_s23 = sld [smem:[#allocation26_spill]] }
 0xc77   : > { %s12848_s21 = sld [smem:[#allocation24_spill]] }
 0xc78   : > { %s12849_s19 = sld [smem:[#allocation30_spill]] }
 0xc7c   : > { %p8827_p3 = scmp.ge.s32.totalorder %s12847_s23, 2 }
 0xc7d   : > { %s7626_s4 = sand.u32 1, %s12848_s21  }
 0xc7e   : > { %p12850_p13 = scmp.ne.s32.totalorder %s12849_s19, 0  ;;  %s7627_s30 = scalar_lea.sflag [#allocation4], %s7626_s4 }
 0xc80   : > { %p8806_p4 = pnand %p8827_p3, %p12850_p13 }
 0xc82   : > { %p8807_p7 = pneg %p8806_p4 }
 0xc84   : > { %9615 = dma.done.wait (%p8807_p7), %s7627_s30, 16  }
 0xc85   : > { %9617 = vsyncadd (%p8807_p7), %s7627_s30, 4294967280  ;;  %s12851_s24 = sld [smem:[#allocation27_spill]]  ;;  %s12854_s1 = smov %s9624_s22 }
 0xc86   : > { %s12852_s25 = sld [smem:[#allocation25_spill]] }
 0xc87   : > { %s12853_s23 = sld [smem:[#allocation28_spill]] }
 0xc8b   : > { %p35_p8 = scmp.ge.s32.totalorder %s12851_s24, 4  }
 0xc8c   : > { %s12855_s22 = smov %s12852_s25 }
 0xc8d   :  { %37 = sbr.rel (!%p35_p8) target bundleno = 16 (0x10), region = 175 }
 0xc92   :  { %7631 = vsyncpa [#allocation3], 1 }
 0xc93   :  { %7633 = vsyncpa [#allocation3 + $0x1], 1 }
 0xc94   :  { %7634 = vsyncpa [#allocation6], 1 }
 0xc95   :  { %7635 = vsyncpa [#allocation9], 1 }
 0xc96   :  { %7636 = vsyncpa [#allocation12], 1 }
 0xc97   :  { %7637 = vsyncpa [#allocation15], 1 }
 0xc98   :  { %7638 = vsyncpa [#allocation4], 1 }
 0xc99   :  { %7640 = vsyncpa [#allocation4 + $0x1], 1 }

</bundles_post_ra>
